<compile_context>
chip_gen: v6e
topology: v6e:2x2x1
jax: 0.10.0
libtpu: 0.0.40
codegen_flags: <defaults>
</compile_context>

<pallas_src>
import functools

import jax
import jax.numpy as jnp
import numpy as np
from jax.experimental import pallas as pl
from jax.experimental.pallas import tpu as pltpu


def _round_up(n, m):
    return ((n + m - 1) // m) * m


# ---------------------------------------------------------------------------
# Fully fused kernel: grid = (B, num_q_tiles)
#   qi == 0  : project K^T, V^T for the whole (padded) sequence of batch b
#              into lane-dense (nh, hd, Npad) bf16 VMEM scratch.
#   every qi : project Q for this tile, score against resident K^T, softmax,
#              P@V, then per-head accumulated output projection -> (tq, C).
# ---------------------------------------------------------------------------
def _fused_attn_kernel(xf_ref, xq_ref, wq_ref, wk_ref, wv_ref, wp_ref, b_ref,
                       o_ref, k_sc, v_sc, *, num_heads, n_valid, n_pad):
    qi = pl.program_id(1)

    # ---- per-batch K/V projection into lane-dense scratch -----------------
    @pl.when(qi == 0)
    def _():
        xf = xf_ref[0].astype(jnp.bfloat16)                           # (Npad, C)
        xb = jnp.broadcast_to(xf[None], (num_heads,) + xf.shape)      # (nh, Npad, C)
        # k^T : (nh, hd, Npad)   -- sequence in lanes, hd (=8) in sublanes
        k_sc[...] = jnp.einsum(
            'hdc,hnc->hdn', wk_ref[...], xb,
            preferred_element_type=jnp.float32).astype(jnp.bfloat16)
        # v^T : (nh, hd, Npad)
        v_sc[...] = jnp.einsum(
            'hdc,hnc->hdn', wv_ref[...], xb,
            preferred_element_type=jnp.float32).astype(jnp.bfloat16)

    # ---- Q projection for this query tile (scale folded into wq) ----------
    xq = xq_ref[0].astype(jnp.bfloat16)                               # (tq, C)
    xqb = jnp.broadcast_to(xq[None], (num_heads,) + xq.shape)         # (nh, tq, C)
    q = jnp.einsum('hqc,hcd->hqd', xqb, wq_ref[...],
                   preferred_element_type=jnp.float32).astype(jnp.bfloat16)

    # ---- scores / softmax (whole padded sequence as one "k tile") ---------
    s = jnp.einsum('hqd,hdk->hqk', q, k_sc[...],
                   preferred_element_type=jnp.float32)                # (nh, tq, Npad)
    if n_valid != n_pad:  # static: mask zero-padded key positions
        kidx = jax.lax.broadcasted_iota(jnp.int32, s.shape, 2)
        s = jnp.where(kidx < n_valid, s, -1e30)

    m = jnp.max(s, axis=-1, keepdims=True)
    p = jnp.exp(s - m)                                                # f32, EUP
    l = jnp.sum(p, axis=-1, keepdims=True)

    pv = jnp.einsum('hqk,hdk->hqd', p.astype(jnp.bfloat16), v_sc[...],
                    preferred_element_type=jnp.float32)               # (nh, tq, hd)
    pv = pv * pl.reciprocal(l, approx=False)                          # exact

    # ---- head merge fused with the output projection (no relayout) --------
    # out[n, :] = sum_h pv[h, n, :] @ wp[h]  + bias     -> lane-dense (tq, C)
    acc = jnp.zeros((pv.shape[1], wp_ref.shape[-1]), jnp.float32)
    for h in range(num_heads):
        acc = acc + jnp.dot(pv[h].astype(jnp.bfloat16), wp_ref[h],
                            preferred_element_type=jnp.float32)
    o_ref[0] = (acc + b_ref[...]).astype(o_ref.dtype)


@functools.partial(jax.jit, static_argnums=(5,))
def _attention_fused(x, wq, wkv, wp, bp, num_heads):
    B, N, C = x.shape
    assert C % num_heads == 0
    hd = C // num_heads
    scale = hd ** -0.5

    # ---- tiling / padding plan --------------------------------------------
    if N >= 128:
        tq = 128
        n_pad = _round_up(N, tq)
    else:
        n_pad = _round_up(N, 8)
        tq = n_pad
    nq = n_pad // tq

    if n_pad != N:
        x = jnp.pad(x, ((0, 0), (0, n_pad - N), (0, 0)))

    # ---- weight prep: per-head layouts, scale folded into wq, bf16 ---------
    wk = wkv[:, :C]
    wv = wkv[:, C:]
    wq_h = (wq * scale).reshape(C, num_heads, hd).transpose(1, 0, 2)   # (nh, C, hd)
    wk_t = wk.reshape(C, num_heads, hd).transpose(1, 2, 0)             # (nh, hd, C)
    wv_t = wv.reshape(C, num_heads, hd).transpose(1, 2, 0)             # (nh, hd, C)
    wp_h = wp.reshape(num_heads, hd, C)                                # (nh, hd, C)
    wq_h = wq_h.astype(jnp.bfloat16)
    wk_t = wk_t.astype(jnp.bfloat16)
    wv_t = wv_t.astype(jnp.bfloat16)
    wp_h = wp_h.astype(jnp.bfloat16)
    bp2 = bp.reshape(1, C).astype(jnp.float32)

    kernel = functools.partial(_fused_attn_kernel,
                               num_heads=num_heads, n_valid=N, n_pad=n_pad)

    out = pl.pallas_call(
        kernel,
        out_shape=jax.ShapeDtypeStruct((B, n_pad, C), x.dtype),
        grid_spec=pltpu.PrefetchScalarGridSpec(
            num_scalar_prefetch=0,
            grid=(B, nq),
            in_specs=[
                # full (padded) sequence of batch b: resident across q-tiles
                pl.BlockSpec((1, n_pad, C), lambda b, q: (b, 0, 0)),
                # q-tile rows of the same x
                pl.BlockSpec((1, tq, C), lambda b, q: (b, q, 0)),
                pl.BlockSpec((num_heads, C, hd), lambda b, q: (0, 0, 0)),
                pl.BlockSpec((num_heads, hd, C), lambda b, q: (0, 0, 0)),
                pl.BlockSpec((num_heads, hd, C), lambda b, q: (0, 0, 0)),
                pl.BlockSpec((num_heads, hd, C), lambda b, q: (0, 0, 0)),
                pl.BlockSpec((1, C), lambda b, q: (0, 0)),
            ],
            out_specs=pl.BlockSpec((1, tq, C), lambda b, q: (b, q, 0)),
            scratch_shapes=[
                pltpu.VMEM((num_heads, hd, n_pad), jnp.bfloat16),   # k^T
                pltpu.VMEM((num_heads, hd, n_pad), jnp.bfloat16),   # v^T
            ],
        ),
        compiler_params=pltpu.CompilerParams(
            # B axis parallel (>=2 iterations -> both v7x TensorCores busy);
            # q-tile axis arbitrary so the per-batch K/V scratch init at qi==0
            # always precedes its consumers on the same core.
            dimension_semantics=("parallel", "arbitrary"),
            vmem_limit_bytes=32 * 1024 * 1024,
        ),
        cost_estimate=pl.CostEstimate(
            flops=8 * B * n_pad * C * C + 4 * B * n_pad * n_pad * C,
            transcendentals=B * num_heads * n_pad * n_pad,
            bytes_accessed=2 * B * n_pad * C * 4 + (4 * C * C + C) * 2),
    )(x, x, wq_h, wk_t, wv_t, wp_h, bp2)

    if n_pad != N:
        out = out[:, :N, :]
    return out


def attention_pallas(x, wq, wkv, wp, bp, num_heads, H=None, W=None, D=None):
    """Pallas equivalent of Attention.forward(x, H, W, D) (sr_ratio=1, linear=False)."""
    # TODO(synk): H/W/D are only used by the sr_ratio>1 / linear=True branches,
    # which are not implemented here.
    return _attention_fused(x, wq, wkv, wp, bp, num_heads)


def attention_ref(x, wq, wkv, wp, bp, num_heads):
    """Pure-JAX f32 reference mirroring the PyTorch forward (sr_ratio=1, linear=False)."""
    B, N, C = x.shape
    hd = C // num_heads
    scale = hd ** -0.5
    q = (x @ wq).reshape(B, N, num_heads, hd).transpose(0, 2, 1, 3)
    kv = (x @ wkv).reshape(B, N, 2, num_heads, hd).transpose(2, 0, 3, 1, 4)
    k, v = kv[0], kv[1]
    attn = jnp.einsum('bhqd,bhkd->bhqk', q, k) * scale
    attn = jax.nn.softmax(attn, axis=-1)
    out = jnp.einsum('bhqk,bhkd->bhqd', attn, v)
    out = out.transpose(0, 2, 1, 3).reshape(B, N, C)
    return out @ wp + bp


if __name__ == "__main__":
    dim, num_heads = 64, 8

    key = jax.random.PRNGKey(0)
    kx, kq, kkv, kp, kb = jax.random.split(key, 5)

    def run_case(B, H, W, D):
        N = H * W * D
        x = jax.random.normal(kx, (B, N, dim), dtype=jnp.float32)
        wq = jax.random.normal(kq, (dim, dim), dtype=jnp.float32) * 0.1
        wkv = jax.random.normal(kkv, (dim, 2 * dim), dtype=jnp.float32) * 0.1
        wp = jax.random.normal(kp, (dim, dim), dtype=jnp.float32) * 0.1
        bp = jax.random.normal(kb, (dim,), dtype=jnp.float32) * 0.1

        out = attention_pallas(x, wq, wkv, wp, bp, num_heads, H, W, D)
        out = jax.block_until_ready(out)
        ref = attention_ref(x, wq, wkv, wp, bp, num_heads)
        # bf16 matmul operands -> slightly loosened tolerances vs f32 ref.
        np.testing.assert_allclose(np.asarray(out), np.asarray(ref),
                                   atol=3e-2, rtol=3e-2)

    run_case(2, 4, 4, 4)   # N = 64  : exact tile, no padding/mask path
    run_case(2, 5, 5, 5)   # N = 125 : exercises zero-pad + key-mask path
    print("KERNEL_OK")
</pallas_src>

<mosaic_0001>
module attributes {stable_mosaic.version = 11 : i64} {
  func.func @_fused_attn_kernel(%arg0: i32, %arg1: i32, %arg2: memref<1x64x64xf32, #tpu.memory_space<vmem>>, %arg3: memref<1x64x64xf32, #tpu.memory_space<vmem>>, %arg4: memref<8x64x8xbf16, #tpu.memory_space<vmem>>, %arg5: memref<8x8x64xbf16, #tpu.memory_space<vmem>>, %arg6: memref<8x8x64xbf16, #tpu.memory_space<vmem>>, %arg7: memref<8x8x64xbf16, #tpu.memory_space<vmem>>, %arg8: memref<1x64xf32, #tpu.memory_space<vmem>>, %arg9: memref<1x64x64xf32, #tpu.memory_space<vmem>>, %arg10: memref<8x8x64xbf16, #tpu.memory_space<vmem>>, %arg11: memref<8x8x64xbf16, #tpu.memory_space<vmem>>) attributes {dimension_semantics = [#tpu.dimension_semantics<parallel>, #tpu.dimension_semantics<arbitrary>], iteration_bounds = array<i64: 2, 1>, scalar_prefetch = 0 : i64, scratch_operands = 2 : i64, tpu.core_type = #tpu.core_type<tc>, window_params = [{transform_indices = @transform_0, window_bounds = array<i64: 1, 64, 64>}, {transform_indices = @transform_1, window_bounds = array<i64: 1, 64, 64>}, {pipeline_mode = #tpu.pipeline_mode<synchronous>, transform_indices = @transform_2, window_bounds = array<i64: 8, 64, 8>}, {pipeline_mode = #tpu.pipeline_mode<synchronous>, transform_indices = @transform_3, window_bounds = array<i64: 8, 8, 64>}, {pipeline_mode = #tpu.pipeline_mode<synchronous>, transform_indices = @transform_4, window_bounds = array<i64: 8, 8, 64>}, {pipeline_mode = #tpu.pipeline_mode<synchronous>, transform_indices = @transform_5, window_bounds = array<i64: 8, 8, 64>}, {pipeline_mode = #tpu.pipeline_mode<synchronous>, transform_indices = @transform_6, window_bounds = array<i64: 1, 64>}, {transform_indices = @transform_7, window_bounds = array<i64: 1, 64, 64>}]} {
    %c0_i32 = arith.constant 0 : i32
    %0 = arith.cmpi eq, %arg1, %c0_i32 : i32
    %1 = arith.extui %0 : i1 to i32
    %c0_i32_0 = arith.constant 0 : i32
    %2 = arith.cmpi ne, %1, %c0_i32_0 : i32
    scf.if %2 {
      %c0_47 = arith.constant 0 : index
      %c0_48 = arith.constant 0 : index
      %c0_49 = arith.constant 0 : index
      %90 = vector.load %arg2[%c0_47, %c0_48, %c0_49] : memref<1x64x64xf32, #tpu.memory_space<vmem>>, vector<1x64x64xf32>
      %91 = vector.shape_cast %90 : vector<1x64x64xf32> to vector<64x64xf32>
      %92 = arith.truncf %91 : vector<64x64xf32> to vector<64x64xbf16>
      %93 = vector.shape_cast %92 : vector<64x64xbf16> to vector<1x64x64xbf16>
      %94 = vector.shape_cast %93 : vector<1x64x64xbf16> to vector<1x64x64xbf16>
      %95 = vector.broadcast %94 : vector<1x64x64xbf16> to vector<8x64x64xbf16>
      %c0_50 = arith.constant 0 : index
      %c0_51 = arith.constant 0 : index
      %c0_52 = arith.constant 0 : index
      %96 = vector.load %arg5[%c0_50, %c0_51, %c0_52] : memref<8x8x64xbf16, #tpu.memory_space<vmem>>, vector<8x8x64xbf16>
      "tpu.trace_start"() <{level = 10 : i32, message = "hdc,hnc->hdn"}> : () -> ()
      %cst_53 = arith.constant dense<0.000000e+00> : vector<8x8x64xf32>
      %97 = tpu.matmul %96, %95, %cst_53 {dimension_numbers = #tpu.dot_dimension_numbers<[2], [2], [1], [1], [0, 0, 0, 1, 1, 1], [0], [0]>} : vector<8x8x64xbf16>, vector<8x64x64xbf16>, vector<8x8x64xf32> -> vector<8x8x64xf32>
      "tpu.trace_stop"() : () -> ()
      %98 = arith.truncf %97 : vector<8x8x64xf32> to vector<8x8x64xbf16>
      %c0_54 = arith.constant 0 : index
      %c0_55 = arith.constant 0 : index
      %c0_56 = arith.constant 0 : index
      %99 = vector.load %arg10[%c0_54, %c0_55, %c0_56] : memref<8x8x64xbf16, #tpu.memory_space<vmem>>, vector<8x8x64xbf16>
      tpu.vector_store %arg10[%c0_54, %c0_55, %c0_56], %98 {strides = array<i32>} : memref<8x8x64xbf16, #tpu.memory_space<vmem>>, vector<8x8x64xbf16>,
      %c0_57 = arith.constant 0 : index
      %c0_58 = arith.constant 0 : index
      %c0_59 = arith.constant 0 : index
      %100 = vector.load %arg6[%c0_57, %c0_58, %c0_59] : memref<8x8x64xbf16, #tpu.memory_space<vmem>>, vector<8x8x64xbf16>
      "tpu.trace_start"() <{level = 10 : i32, message = "hdc,hnc->hdn"}> : () -> ()
      %cst_60 = arith.constant dense<0.000000e+00> : vector<8x8x64xf32>
      %101 = tpu.matmul %100, %95, %cst_60 {dimension_numbers = #tpu.dot_dimension_numbers<[2], [2], [1], [1], [0, 0, 0, 1, 1, 1], [0], [0]>} : vector<8x8x64xbf16>, vector<8x64x64xbf16>, vector<8x8x64xf32> -> vector<8x8x64xf32>
      "tpu.trace_stop"() : () -> ()
      %102 = arith.truncf %101 : vector<8x8x64xf32> to vector<8x8x64xbf16>
      %c0_61 = arith.constant 0 : index
      %c0_62 = arith.constant 0 : index
      %c0_63 = arith.constant 0 : index
      %103 = vector.load %arg11[%c0_61, %c0_62, %c0_63] : memref<8x8x64xbf16, #tpu.memory_space<vmem>>, vector<8x8x64xbf16>
      tpu.vector_store %arg11[%c0_61, %c0_62, %c0_63], %102 {strides = array<i32>} : memref<8x8x64xbf16, #tpu.memory_space<vmem>>, vector<8x8x64xbf16>,
    } else {
    }
    %c0 = arith.constant 0 : index
    %c0_1 = arith.constant 0 : index
    %c0_2 = arith.constant 0 : index
    %3 = vector.load %arg3[%c0, %c0_1, %c0_2] : memref<1x64x64xf32, #tpu.memory_space<vmem>>, vector<1x64x64xf32>
    %4 = vector.shape_cast %3 : vector<1x64x64xf32> to vector<64x64xf32>
    %5 = arith.truncf %4 : vector<64x64xf32> to vector<64x64xbf16>
    %6 = vector.shape_cast %5 : vector<64x64xbf16> to vector<1x64x64xbf16>
    %7 = vector.shape_cast %6 : vector<1x64x64xbf16> to vector<1x64x64xbf16>
    %8 = vector.broadcast %7 : vector<1x64x64xbf16> to vector<8x64x64xbf16>
    %c0_3 = arith.constant 0 : index
    %c0_4 = arith.constant 0 : index
    %c0_5 = arith.constant 0 : index
    %9 = vector.load %arg4[%c0_3, %c0_4, %c0_5] : memref<8x64x8xbf16, #tpu.memory_space<vmem>>, vector<8x64x8xbf16>
    "tpu.trace_start"() <{level = 10 : i32, message = "hqc,hcd->hqd"}> : () -> ()
    %cst = arith.constant dense<0.000000e+00> : vector<8x64x8xf32>
    %10 = tpu.matmul %8, %9, %cst {dimension_numbers = #tpu.dot_dimension_numbers<[2], [1], [1], [2], [0, 0, 0, 1, 1, 2], [0], [0]>} : vector<8x64x64xbf16>, vector<8x64x8xbf16>, vector<8x64x8xf32> -> vector<8x64x8xf32>
    "tpu.trace_stop"() : () -> ()
    %11 = arith.truncf %10 : vector<8x64x8xf32> to vector<8x64x8xbf16>
    %c0_6 = arith.constant 0 : index
    %c0_7 = arith.constant 0 : index
    %c0_8 = arith.constant 0 : index
    %12 = vector.load %arg10[%c0_6, %c0_7, %c0_8] : memref<8x8x64xbf16, #tpu.memory_space<vmem>>, vector<8x8x64xbf16>
    "tpu.trace_start"() <{level = 10 : i32, message = "hqd,hdk->hqk"}> : () -> ()
    %cst_9 = arith.constant dense<0.000000e+00> : vector<8x64x64xf32>
    %13 = tpu.matmul %11, %12, %cst_9 {dimension_numbers = #tpu.dot_dimension_numbers<[2], [1], [1], [2], [0, 0, 0, 1, 1, 2], [0], [0]>} : vector<8x64x8xbf16>, vector<8x8x64xbf16>, vector<8x64x64xf32> -> vector<8x64x64xf32>
    "tpu.trace_stop"() : () -> ()
    %cst_10 = arith.constant dense<0xFF800000> : vector<8x64xf32>
    %14 = vector.multi_reduction <maximumf>, %13, %cst_10 [2] : vector<8x64x64xf32> to vector<8x64xf32>
    %15 = vector.shape_cast %14 : vector<8x64xf32> to vector<8x64x1xf32>
    %16 = vector.broadcast %15 : vector<8x64x1xf32> to vector<8x64x64xf32>
    %17 = arith.subf %13, %16 : vector<8x64x64xf32>
    %18 = math.exp %17 : vector<8x64x64xf32>
    %cst_11 = arith.constant dense<0.000000e+00> : vector<8x64xf32>
    %19 = vector.multi_reduction <add>, %18, %cst_11 [2] : vector<8x64x64xf32> to vector<8x64xf32>
    %20 = vector.shape_cast %19 : vector<8x64xf32> to vector<8x64x1xf32>
    %21 = arith.truncf %18 : vector<8x64x64xf32> to vector<8x64x64xbf16>
    %c0_12 = arith.constant 0 : index
    %c0_13 = arith.constant 0 : index
    %c0_14 = arith.constant 0 : index
    %22 = vector.load %arg11[%c0_12, %c0_13, %c0_14] : memref<8x8x64xbf16, #tpu.memory_space<vmem>>, vector<8x8x64xbf16>
    "tpu.trace_start"() <{level = 10 : i32, message = "hqk,hdk->hqd"}> : () -> ()
    %cst_15 = arith.constant dense<0.000000e+00> : vector<8x64x8xf32>
    %23 = tpu.matmul %21, %22, %cst_15 {dimension_numbers = #tpu.dot_dimension_numbers<[2], [2], [1], [1], [0, 0, 0, 1, 1, 1], [0], [0]>} : vector<8x64x64xbf16>, vector<8x8x64xbf16>, vector<8x64x8xf32> -> vector<8x64x8xf32>
    "tpu.trace_stop"() : () -> ()
    %24 = tpu.reciprocal %20 : vector<8x64x1xf32> -> vector<8x64x1xf32>
    %25 = vector.broadcast %24 : vector<8x64x1xf32> to vector<8x64x8xf32>
    %26 = arith.mulf %23, %25 : vector<8x64x8xf32>
    %cst_16 = arith.constant 0.000000e+00 : f32
    %27 = vector.broadcast %cst_16 : f32 to vector<64x64xf32>
    %28 = vector.extract_strided_slice %26 {offsets = [0, 0, 0], sizes = [1, 64, 8], strides = [1, 1, 1]} : vector<8x64x8xf32> to vector<1x64x8xf32>
    %29 = vector.shape_cast %28 : vector<1x64x8xf32> to vector<64x8xf32>
    %30 = arith.truncf %29 : vector<64x8xf32> to vector<64x8xbf16>
    %c0_17 = arith.constant 0 : index
    %c0_18 = arith.constant 0 : index
    %c0_19 = arith.constant 0 : index
    %31 = vector.load %arg7[%c0_17, %c0_18, %c0_19] : memref<8x8x64xbf16, #tpu.memory_space<vmem>>, vector<1x8x64xbf16>
    %32 = vector.shape_cast %31 : vector<1x8x64xbf16> to vector<8x64xbf16>
    %cst_20 = arith.constant dense<0.000000e+00> : vector<64x64xf32>
    %33 = tpu.matmul %30, %32, %cst_20 {dimension_numbers = #tpu.dot_dimension_numbers<[1], [0], [0], [1], [0, 0, 1, 1], [], []>} : vector<64x8xbf16>, vector<8x64xbf16>, vector<64x64xf32> -> vector<64x64xf32>
    %34 = arith.addf %27, %33 : vector<64x64xf32>
    %35 = vector.extract_strided_slice %26 {offsets = [1, 0, 0], sizes = [1, 64, 8], strides = [1, 1, 1]} : vector<8x64x8xf32> to vector<1x64x8xf32>
    %36 = vector.shape_cast %35 : vector<1x64x8xf32> to vector<64x8xf32>
    %37 = arith.truncf %36 : vector<64x8xf32> to vector<64x8xbf16>
    %c1 = arith.constant 1 : index
    %c0_21 = arith.constant 0 : index
    %c0_22 = arith.constant 0 : index
    %38 = vector.load %arg7[%c1, %c0_21, %c0_22] : memref<8x8x64xbf16, #tpu.memory_space<vmem>>, vector<1x8x64xbf16>
    %39 = vector.shape_cast %38 : vector<1x8x64xbf16> to vector<8x64xbf16>
    %cst_23 = arith.constant dense<0.000000e+00> : vector<64x64xf32>
    %40 = tpu.matmul %37, %39, %cst_23 {dimension_numbers = #tpu.dot_dimension_numbers<[1], [0], [0], [1], [0, 0, 1, 1], [], []>} : vector<64x8xbf16>, vector<8x64xbf16>, vector<64x64xf32> -> vector<64x64xf32>
    %41 = arith.addf %34, %40 : vector<64x64xf32>
    %42 = vector.extract_strided_slice %26 {offsets = [2, 0, 0], sizes = [1, 64, 8], strides = [1, 1, 1]} : vector<8x64x8xf32> to vector<1x64x8xf32>
    %43 = vector.shape_cast %42 : vector<1x64x8xf32> to vector<64x8xf32>
    %44 = arith.truncf %43 : vector<64x8xf32> to vector<64x8xbf16>
    %c2 = arith.constant 2 : index
    %c0_24 = arith.constant 0 : index
    %c0_25 = arith.constant 0 : index
    %45 = vector.load %arg7[%c2, %c0_24, %c0_25] : memref<8x8x64xbf16, #tpu.memory_space<vmem>>, vector<1x8x64xbf16>
    %46 = vector.shape_cast %45 : vector<1x8x64xbf16> to vector<8x64xbf16>
    %cst_26 = arith.constant dense<0.000000e+00> : vector<64x64xf32>
    %47 = tpu.matmul %44, %46, %cst_26 {dimension_numbers = #tpu.dot_dimension_numbers<[1], [0], [0], [1], [0, 0, 1, 1], [], []>} : vector<64x8xbf16>, vector<8x64xbf16>, vector<64x64xf32> -> vector<64x64xf32>
    %48 = arith.addf %41, %47 : vector<64x64xf32>
    %49 = vector.extract_strided_slice %26 {offsets = [3, 0, 0], sizes = [1, 64, 8], strides = [1, 1, 1]} : vector<8x64x8xf32> to vector<1x64x8xf32>
    %50 = vector.shape_cast %49 : vector<1x64x8xf32> to vector<64x8xf32>
    %51 = arith.truncf %50 : vector<64x8xf32> to vector<64x8xbf16>
    %c3 = arith.constant 3 : index
    %c0_27 = arith.constant 0 : index
    %c0_28 = arith.constant 0 : index
    %52 = vector.load %arg7[%c3, %c0_27, %c0_28] : memref<8x8x64xbf16, #tpu.memory_space<vmem>>, vector<1x8x64xbf16>
    %53 = vector.shape_cast %52 : vector<1x8x64xbf16> to vector<8x64xbf16>
    %cst_29 = arith.constant dense<0.000000e+00> : vector<64x64xf32>
    %54 = tpu.matmul %51, %53, %cst_29 {dimension_numbers = #tpu.dot_dimension_numbers<[1], [0], [0], [1], [0, 0, 1, 1], [], []>} : vector<64x8xbf16>, vector<8x64xbf16>, vector<64x64xf32> -> vector<64x64xf32>
    %55 = arith.addf %48, %54 : vector<64x64xf32>
    %56 = vector.extract_strided_slice %26 {offsets = [4, 0, 0], sizes = [1, 64, 8], strides = [1, 1, 1]} : vector<8x64x8xf32> to vector<1x64x8xf32>
    %57 = vector.shape_cast %56 : vector<1x64x8xf32> to vector<64x8xf32>
    %58 = arith.truncf %57 : vector<64x8xf32> to vector<64x8xbf16>
    %c4 = arith.constant 4 : index
    %c0_30 = arith.constant 0 : index
    %c0_31 = arith.constant 0 : index
    %59 = vector.load %arg7[%c4, %c0_30, %c0_31] : memref<8x8x64xbf16, #tpu.memory_space<vmem>>, vector<1x8x64xbf16>
    %60 = vector.shape_cast %59 : vector<1x8x64xbf16> to vector<8x64xbf16>
    %cst_32 = arith.constant dense<0.000000e+00> : vector<64x64xf32>
    %61 = tpu.matmul %58, %60, %cst_32 {dimension_numbers = #tpu.dot_dimension_numbers<[1], [0], [0], [1], [0, 0, 1, 1], [], []>} : vector<64x8xbf16>, vector<8x64xbf16>, vector<64x64xf32> -> vector<64x64xf32>
    %62 = arith.addf %55, %61 : vector<64x64xf32>
    %63 = vector.extract_strided_slice %26 {offsets = [5, 0, 0], sizes = [1, 64, 8], strides = [1, 1, 1]} : vector<8x64x8xf32> to vector<1x64x8xf32>
    %64 = vector.shape_cast %63 : vector<1x64x8xf32> to vector<64x8xf32>
    %65 = arith.truncf %64 : vector<64x8xf32> to vector<64x8xbf16>
    %c5 = arith.constant 5 : index
    %c0_33 = arith.constant 0 : index
    %c0_34 = arith.constant 0 : index
    %66 = vector.load %arg7[%c5, %c0_33, %c0_34] : memref<8x8x64xbf16, #tpu.memory_space<vmem>>, vector<1x8x64xbf16>
    %67 = vector.shape_cast %66 : vector<1x8x64xbf16> to vector<8x64xbf16>
    %cst_35 = arith.constant dense<0.000000e+00> : vector<64x64xf32>
    %68 = tpu.matmul %65, %67, %cst_35 {dimension_numbers = #tpu.dot_dimension_numbers<[1], [0], [0], [1], [0, 0, 1, 1], [], []>} : vector<64x8xbf16>, vector<8x64xbf16>, vector<64x64xf32> -> vector<64x64xf32>
    %69 = arith.addf %62, %68 : vector<64x64xf32>
    %70 = vector.extract_strided_slice %26 {offsets = [6, 0, 0], sizes = [1, 64, 8], strides = [1, 1, 1]} : vector<8x64x8xf32> to vector<1x64x8xf32>
    %71 = vector.shape_cast %70 : vector<1x64x8xf32> to vector<64x8xf32>
    %72 = arith.truncf %71 : vector<64x8xf32> to vector<64x8xbf16>
    %c6 = arith.constant 6 : index
    %c0_36 = arith.constant 0 : index
    %c0_37 = arith.constant 0 : index
    %73 = vector.load %arg7[%c6, %c0_36, %c0_37] : memref<8x8x64xbf16, #tpu.memory_space<vmem>>, vector<1x8x64xbf16>
    %74 = vector.shape_cast %73 : vector<1x8x64xbf16> to vector<8x64xbf16>
    %cst_38 = arith.constant dense<0.000000e+00> : vector<64x64xf32>
    %75 = tpu.matmul %72, %74, %cst_38 {dimension_numbers = #tpu.dot_dimension_numbers<[1], [0], [0], [1], [0, 0, 1, 1], [], []>} : vector<64x8xbf16>, vector<8x64xbf16>, vector<64x64xf32> -> vector<64x64xf32>
    %76 = arith.addf %69, %75 : vector<64x64xf32>
    %77 = vector.extract_strided_slice %26 {offsets = [7, 0, 0], sizes = [1, 64, 8], strides = [1, 1, 1]} : vector<8x64x8xf32> to vector<1x64x8xf32>
    %78 = vector.shape_cast %77 : vector<1x64x8xf32> to vector<64x8xf32>
    %79 = arith.truncf %78 : vector<64x8xf32> to vector<64x8xbf16>
    %c7 = arith.constant 7 : index
    %c0_39 = arith.constant 0 : index
    %c0_40 = arith.constant 0 : index
    %80 = vector.load %arg7[%c7, %c0_39, %c0_40] : memref<8x8x64xbf16, #tpu.memory_space<vmem>>, vector<1x8x64xbf16>
    %81 = vector.shape_cast %80 : vector<1x8x64xbf16> to vector<8x64xbf16>
    %cst_41 = arith.constant dense<0.000000e+00> : vector<64x64xf32>
    %82 = tpu.matmul %79, %81, %cst_41 {dimension_numbers = #tpu.dot_dimension_numbers<[1], [0], [0], [1], [0, 0, 1, 1], [], []>} : vector<64x8xbf16>, vector<8x64xbf16>, vector<64x64xf32> -> vector<64x64xf32>
    %83 = arith.addf %76, %82 : vector<64x64xf32>
    %c0_42 = arith.constant 0 : index
    %c0_43 = arith.constant 0 : index
    %84 = vector.load %arg8[%c0_42, %c0_43] : memref<1x64xf32, #tpu.memory_space<vmem>>, vector<1x64xf32>
    %85 = vector.broadcast %84 : vector<1x64xf32> to vector<64x64xf32>
    %86 = arith.addf %83, %85 : vector<64x64xf32>
    %c0_44 = arith.constant 0 : index
    %c0_45 = arith.constant 0 : index
    %c0_46 = arith.constant 0 : index
    %87 = vector.load %arg9[%c0_44, %c0_45, %c0_46] : memref<1x64x64xf32, #tpu.memory_space<vmem>>, vector<1x64x64xf32>
    %88 = vector.shape_cast %87 : vector<1x64x64xf32> to vector<64x64xf32>
    %89 = vector.shape_cast %86 : vector<64x64xf32> to vector<1x64x64xf32>
    tpu.vector_store %arg9[%c0_44, %c0_45, %c0_46], %89 {strides = array<i32>} : memref<1x64x64xf32, #tpu.memory_space<vmem>>, vector<1x64x64xf32>,
    return
  }
  func.func @transform_0(%arg0: i32, %arg1: i32) -> (i32, i32, i32) {
    %c0_i32 = arith.constant 0 : i32
    %c0_i32_0 = arith.constant 0 : i32
    %c0_i32_1 = arith.constant 0 : i32
    return %arg0, %c0_i32, %c0_i32_0 : i32, i32, i32
  }
  func.func @transform_1(%arg0: i32, %arg1: i32) -> (i32, i32, i32) {
    %c0_i32 = arith.constant 0 : i32
    %c0_i32_0 = arith.constant 0 : i32
    return %arg0, %arg1, %c0_i32 : i32, i32, i32
  }
  func.func @transform_2(%arg0: i32, %arg1: i32) -> (i32, i32, i32) {
    %c0_i32 = arith.constant 0 : i32
    %c0_i32_0 = arith.constant 0 : i32
    %c0_i32_1 = arith.constant 0 : i32
    %c0_i32_2 = arith.constant 0 : i32
    return %c0_i32, %c0_i32_0, %c0_i32_1 : i32, i32, i32
  }
  func.func @transform_3(%arg0: i32, %arg1: i32) -> (i32, i32, i32) {
    %c0_i32 = arith.constant 0 : i32
    %c0_i32_0 = arith.constant 0 : i32
    %c0_i32_1 = arith.constant 0 : i32
    %c0_i32_2 = arith.constant 0 : i32
    return %c0_i32, %c0_i32_0, %c0_i32_1 : i32, i32, i32
  }
  func.func @transform_4(%arg0: i32, %arg1: i32) -> (i32, i32, i32) {
    %c0_i32 = arith.constant 0 : i32
    %c0_i32_0 = arith.constant 0 : i32
    %c0_i32_1 = arith.constant 0 : i32
    %c0_i32_2 = arith.constant 0 : i32
    return %c0_i32, %c0_i32_0, %c0_i32_1 : i32, i32, i32
  }
  func.func @transform_5(%arg0: i32, %arg1: i32) -> (i32, i32, i32) {
    %c0_i32 = arith.constant 0 : i32
    %c0_i32_0 = arith.constant 0 : i32
    %c0_i32_1 = arith.constant 0 : i32
    %c0_i32_2 = arith.constant 0 : i32
    return %c0_i32, %c0_i32_0, %c0_i32_1 : i32, i32, i32
  }
  func.func @transform_6(%arg0: i32, %arg1: i32) -> (i32, i32) {
    %c0_i32 = arith.constant 0 : i32
    %c0_i32_0 = arith.constant 0 : i32
    %c0_i32_1 = arith.constant 0 : i32
    return %c0_i32, %c0_i32_0 : i32, i32
  }
  func.func @transform_7(%arg0: i32, %arg1: i32) -> (i32, i32, i32) {
    %c0_i32 = arith.constant 0 : i32
    %c0_i32_0 = arith.constant 0 : i32
    return %arg0, %arg1, %c0_i32 : i32, i32, i32
  }
}

</mosaic_0001>

<bundles_post_ra>
// kernel: _attention_fused.1
= control target key start
LH: loop header
LB: loop body
LE: loop exit
PB: predicated region body
PF: predicated region fallthrough
CT: control target
= control target key end

     0   :  { %12 = vsyncpa [#allocation5], 0  ;;  %s7735_s0 = inlined_call_operand.vmem [shape: f32[2,64,64], index: 0, kind: input, shape index: {}, may-alias: {0,1}]   ;;  %s7736_s1 = inlined_call_operand.vmem [shape: f32[2,64,64], index: 1, kind: input, shape index: {}, may-alias: {0,1}]   ;;  %s7737_s2 = inlined_call_operand.vmem [shape: bf16[8,64,8], index: 2, kind: input, shape index: {}]   ;;  %s7738_s3 = inlined_call_operand.vmem [shape: bf16[8,8,64], index: 3, kind: input, shape index: {}]   ;;  %s7739_s4 = inlined_call_operand.vmem [shape: bf16[8,8,64], index: 4, kind: input, shape index: {}]   ;;  %s7740_s5 = inlined_call_operand.vmem [shape: bf16[8,8,64], index: 5, kind: input, shape index: {}]   ;;  %s7741_s6 = inlined_call_operand.vmem [shape: f32[1,64], index: 6, kind: input, shape index: {}]   ;;  %s7742_s7 = inlined_call_operand.hbm [shape: f32[2,64,64], index: 7, kind: output, shape index: {}]  }
   0x1   :  { %14 = vsyncpa [#allocation5 + $0x1], 0  ;;  %s6347_s24 = smov 0   ;;  %s6349_s25 = smov 0  }
   0x2   :  { %s6351_s26 = smov 0   ;;  %s6353_s27 = smov 0  }
   0x3   :  { %s6355_s28 = smov 0   ;;  %s6357_s29 = smov 0  }
   0x4 LB: > { %s4827_s30 = sadd.s32 4294967295, %s6300_s29   ;;  %s4828_s8 = sadd.s32 4294967294, %s6300_s29   ;;  %s6300_s29 = sphi %s6357_s29, %s20_s29   ;;  %s6296_s28 = sphi %s6355_s28, %s7803_s28   ;;  %s6292_s27 = sphi %s6353_s27, %s7802_s27   ;;  %s6288_s26 = sphi %s6351_s26, %s7801_s26   ;;  %s6284_s25 = sphi %s6349_s25, %s7800_s25   ;;  %s6280_s24 = sphi %s6347_s24, %s7799_s24  }
   0x5   : > { %s32_s9 = sadd.s32 1, %s6296_s28  ;;  %s200_s10 = sadd.s32 1, %s6288_s26 }
   0x6   : > { %p34_p0 = scmp.ge.s32.totalorder %s32_s9, 2  ;;  %p210_p1 = scmp.ne.s32.totalorder %s6288_s26, %s6284_s25 }
   0x7   : > { %p211_p2 = scmp.eq.s32.totalorder %s4827_s30, 1  ;;  %p216_p3 = scmp.ne.s32.totalorder %s6284_s25, %s6280_s24 }
   0x8   : > { %s7805_s9 = smov (%p34_p0, %s32_s9), 0  ;;  %p217_p5 = scmp.eq.s32.totalorder %s4828_s8, 1 }
   0x9   : > { %p6387_p4 = por %p211_p2, %p210_p1  ;;  %s195_s12 = ssub.s32 %s6296_s28, %s7805_s9 }
   0xa   : > { %p4831_p6 = scmp.ge.s32.totalorder %s6300_s29, 1  ;;  %p198_p7 = scmp.eq.s32.totalorder %s195_s12, 0 }
   0xb   : > { %p6394_p8 = por %p217_p5, %p216_p3  ;;  %p271_p9 = scmp.lt.s32.totalorder %s6300_s29, 3 }
   0xc   : > { %s6400_s14 = scalar_select %p198_p7, %s6288_s26, %s200_s10  }
   0xd   : > { %p272_p10 = pnand %p4831_p6, %p271_p9 }
   0xf   : > { %275 = sbr.rel (%p272_p10) target bundleno = 1402 (0x57a), region = 48 }
  0x14   : > { %p312_p11 = scmp.lt.s32.totalorder %s6292_s27, 1  ;;  %v6302_v0 = vmov 0.0   ;;  %vm6303_vm0 = vmmov 0   ;;  %vm353_vm1 = vcmask 523264   ;;  %v345_v17 = vld [vmem:[%s7738_s3] sm:$0xf] }
  0x15   : > { %5293 = vmatprep.subr.bf16.mxu0 %v6302_v0  ;;  %5305 = vmatprep.subr.bf16.mxu1 %v6302_v0  ;;  %v346_v18 = vld [vmem:[%s7738_s3 + $0x4] sm:$0xf]  ;;  %v347_v19 = vld [vmem:[%s7738_s3 + $0x8] sm:$0xf]  ;;  %v348_v20 = vld [vmem:[%s7738_s3 + $0xc] sm:$0xf] }
  0x16   : > { %s6406_s15 = scalar_select %p312_p11, %s6292_s27, 1  ;;  %5301 = vmatprep.mubr.msk.bf16.mxu0 %vm6303_vm0, %v6302_v0  ;;  %5313 = vmatprep.mubr.msk.bf16.mxu1 %vm6303_vm0, %v6302_v0  ;;  %v349_v21 = vld [vmem:[%s7738_s3 + $0x10] sm:$0xf]  ;;  %v350_v22 = vld [vmem:[%s7738_s3 + $0x14] sm:$0xf]  ;;  %vm718_vm2 = vcmask 519168  }
  0x17   : > { %v351_v23 = vld [vmem:[%s7738_s3 + $0x18] sm:$0xf]  ;;  %v352_v24 = vld [vmem:[%s7738_s3 + $0x1c] sm:$0xf]  ;;  %v727_v25 = vld [vmem:[%s7739_s4] sm:$0xf] }
  0x18   : > { %s5026_s16 = sshll.u32 %s6406_s15, 6  ;;  %v728_v26 = vld [vmem:[%s7739_s4 + $0x4] sm:$0xf]  ;;  %v729_v27 = vld [vmem:[%s7739_s4 + $0x8] sm:$0xf]  ;;  %v5936_v41 = vld [vmem:[%s7737_s2 + $0x18] sm:$0xff]  }
  0x19   : > { %s316_s19 = scalar_lea.vmem %s7735_s0, %s5026_s16  ;;  %v730_v28 = vld [vmem:[%s7739_s4 + $0xc] sm:$0xf]  ;;  %v731_v29 = vld [vmem:[%s7739_s4 + $0x10] sm:$0xf]  ;;  %v732_v30 = vld [vmem:[%s7739_s4 + $0x14] sm:$0xf]  ;;  %s6653_s21 = scalar_lea.vmem %s7736_s1, %s5026_s16 }
  0x1a   : > { %v339_v1 = vld [vmem:[%s316_s19 + $0x30] sm:$0xff]  ;;  %v340_v2 = vld [vmem:[%s316_s19 + $0x38] sm:$0xff]  ;;  %v337_v3 = vld [vmem:[%s316_s19 + $0x20] sm:$0xff]  ;;  %vm1949_vm3 = vcmask 1043456   ;;  %vm1936_vm4 = vcmask 64512   ;;  %s5028_s17 = sshll.u32 %s6292_s27, 10 }
  0x1b   : > { %v344_v4 = vpack.c.bf16 %v340_v2, %v339_v1  ;;  %v338_v5 = vld [vmem:[%s316_s19 + $0x28] sm:$0xff]  ;;  %v335_v6 = vld [vmem:[%s316_s19 + $0x10] sm:$0xff]  ;;  %v336_v7 = vld [vmem:[%s316_s19 + $0x18] sm:$0xff]  ;;  %s7679_s22 = scalar_lea.hbm %s7742_s7, %s5028_s17  ;;  %s6304_s30 = smov [#allocation4]  }
  0x1c   : > { %v343_v8 = vpack.c.bf16 %v338_v5, %v337_v3  ;;  %v342_v9 = vpack.c.bf16 %v336_v7, %v335_v6  ;;  %v333_v13 = vld [vmem:[%s316_s19] sm:$0xff]  ;;  %v334_v14 = vld [vmem:[%s316_s19 + $0x8] sm:$0xff]  ;;  %v5937_v42 = vld [vmem:[%s7737_s2 + $0x38] sm:$0xff]   ;;  %s6228_s8 = sshll.u32 %s6304_s30, 4  ;;  %s6229_s8 = int_to_ptr.vmem [resolvable:$false] %s6228_s8 }
  0x1d   : > { %v6419_v10 = vsel %vm353_vm1, %v344_v4, 0  ;;  %v341_v15 = vpack.c.bf16 %v334_v14, %v333_v13  ;;  %v1095_v43 = vld [vmem:[%s6653_s21] sm:$0xff]  ;;  %v1096_v44 = vld [vmem:[%s6653_s21 + $0x8] sm:$0xff]  ;;  %v733_v45 = vld [vmem:[%s7739_s4 + $0x18] sm:$0xf] }
  0x1e   : > { %5294 = vmatpush3.bf16.xpose.msra.mxu0 %v6419_v10  ;;  %5306 = vmatpush3.bf16.xpose.msra.mxu1 %v6419_v10  ;;  %v6426_v11 = vsel %vm353_vm1, %v343_v8, 0  ;;  %v6429_v12 = vsel %vm353_vm1, %v342_v9, 0  ;;  %v734_v46 = vld [vmem:[%s7739_s4 + $0x1c] sm:$0xf]  ;;  %v5938_v47 = vld [vmem:[%s7737_s2 + $0x10] sm:$0xff]   ;;  %v6669_v49 = vpack.c.bf16 %v1096_v44, %v1095_v43  ;;  %v5940_v56 = vld [vmem:[%s7737_s2 + $0x8] sm:$0xff]  }
  0x1f   : > { %5295 = vmatprep.subr.bf16.mxu0 %v6302_v0  ;;  %5307 = vmatprep.subr.bf16.mxu1 %v6302_v0  ;;  %v6440_v16 = vsel %vm353_vm1, %v341_v15, 0  ;;  %v5939_v48 = vld [vmem:[%s7737_s2 + $0x30] sm:$0xff]   ;;  %v5941_v57 = vld [vmem:[%s7737_s2 + $0x28] sm:$0xff]   ;;  %v5942_v62 = vld [vmem:[%s7737_s2] sm:$0xff]  }
  0x20   : > { %v5943_v63 = vld [vmem:[%s7737_s2 + $0x20] sm:$0xff]   ;;  %v1098_v1 = vld [vmem:[%s6653_s21 + $0x18] sm:$0xff]  ;;  %v1100_v6 = vld [vmem:[%s6653_s21 + $0x28] sm:$0xff] }
  0x21   : > { %v5944_v2 = vld [vmem:[%s7737_s2 + $0x58] sm:$0xff]   ;;  %v1099_v5 = vld [vmem:[%s6653_s21 + $0x20] sm:$0xff]  ;;  %v5946_v7 = vld [vmem:[%s7737_s2 + $0x50] sm:$0xff]  }
  0x22   : > { %v5945_v3 = vld [vmem:[%s7737_s2 + $0x78] sm:$0xff]   ;;  %v5947_v8 = vld [vmem:[%s7737_s2 + $0x70] sm:$0xff]   ;;  %v6709_v9 = vpack.c.bf16 %v1100_v6, %v1099_v5  ;;  %v5949_v13 = vld [vmem:[%s7737_s2 + $0x68] sm:$0xff]  }
  0x23   : > { %v5950_v15 = vld [vmem:[%s7737_s2 + $0x40] sm:$0xff]  }
  0x26   : > { %5296 = vmatpush3.bf16.xpose.msra.mxu0 %v6426_v11  ;;  %5308 = vmatpush3.bf16.xpose.msra.mxu1 %v6426_v11 }
  0x27   : > { %5297 = vmatprep.subr.bf16.mxu0 %v6302_v0  ;;  %5309 = vmatprep.subr.bf16.mxu1 %v6302_v0 }
  0x2e   : > { %5298 = vmatpush3.bf16.xpose.msra.mxu0 %v6429_v12  ;;  %5310 = vmatpush3.bf16.xpose.msra.mxu1 %v6429_v12 }
  0x2f   : > { %5299 = vmatprep.subr.bf16.mxu0 %v6302_v0  ;;  %5311 = vmatprep.subr.bf16.mxu1 %v6302_v0 }
  0x36   : > { %5300 = vmatpush3.bf16.xpose.msra.mxu0 %v6440_v16  ;;  %5312 = vmatpush3.bf16.xpose.msra.mxu1 %v6440_v16 }
  0x37   : > { %5317 = vmatprep.subr.bf16.mxu0 %v6302_v0  ;;  %5329 = vmatprep.subr.bf16.mxu1 %v6302_v0 }
  0x3d   : > { %5302 = vmatmul.mubr.msk.bf16.vlgmr.msra.gmra.mxu0 %vm353_vm1, %v345_v17  ;;  %5314 = vmatmul.mubr.msk.bf16.vlgmr.msra.gmra.mxu1 %vm353_vm1, %v346_v18  ;;  %v5952_v17 = vld [vmem:[%s7737_s2 + $0x98] sm:$0xff]  }
  0x3e   : > { %5318 = vmatpush3.bf16.xpose.msra.mxu0 %v6419_v10  ;;  %5330 = vmatpush3.bf16.xpose.msra.mxu1 %v6419_v10  ;;  %v5953_v18 = vld [vmem:[%s7737_s2 + $0xb8] sm:$0xff]  }
  0x3f   : > { %5319 = vmatprep.subr.bf16.mxu0 %v6302_v0  ;;  %5331 = vmatprep.subr.bf16.mxu1 %v6302_v0 }
  0x40   : > { %5325 = vmatprep.mubr.msk.bf16.mxu0 %vm6303_vm0, %v6302_v0  ;;  %5337 = vmatprep.mubr.msk.bf16.mxu1 %vm6303_vm0, %v6302_v0 }
  0x46   : > { %5320 = vmatpush3.bf16.xpose.msra.mxu0 %v6426_v11  ;;  %5332 = vmatpush3.bf16.xpose.msra.mxu1 %v6426_v11 }
  0x47   : > { %5321 = vmatprep.subr.bf16.mxu0 %v6302_v0  ;;  %5333 = vmatprep.subr.bf16.mxu1 %v6302_v0 }
  0x4e   : > { %5322 = vmatpush3.bf16.xpose.msra.mxu0 %v6429_v12  ;;  %5334 = vmatpush3.bf16.xpose.msra.mxu1 %v6429_v12 }
  0x4f   : > { %5323 = vmatprep.subr.bf16.mxu0 %v6302_v0  ;;  %5335 = vmatprep.subr.bf16.mxu1 %v6302_v0 }
  0x56   : > { %5324 = vmatpush3.bf16.xpose.msra.mxu0 %v6440_v16  ;;  %5336 = vmatpush3.bf16.xpose.msra.mxu1 %v6440_v16 }
  0x57   : > { %5341 = vmatprep.subr.bf16.mxu0 %v6302_v0  ;;  %5353 = vmatprep.subr.bf16.mxu1 %v6302_v0 }
  0x5d   : > { %5326 = vmatmul.mubr.msk.bf16.vlgmr.msra.gmra.mxu0 %vm353_vm1, %v347_v19  ;;  %5338 = vmatmul.mubr.msk.bf16.vlgmr.msra.gmra.mxu1 %vm353_vm1, %v348_v20  ;;  %v5954_v19 = vld [vmem:[%s7737_s2 + $0x90] sm:$0xff]  }
  0x5e   : > { %5342 = vmatpush3.bf16.xpose.msra.mxu0 %v6419_v10  ;;  %5354 = vmatpush3.bf16.xpose.msra.mxu1 %v6419_v10  ;;  %v5955_v20 = vld [vmem:[%s7737_s2 + $0xb0] sm:$0xff]  }
  0x5f   : > { %5343 = vmatprep.subr.bf16.mxu0 %v6302_v0  ;;  %5355 = vmatprep.subr.bf16.mxu1 %v6302_v0 }
  0x60   : > { %5349 = vmatprep.mubr.msk.bf16.mxu0 %vm6303_vm0, %v6302_v0  ;;  %5361 = vmatprep.mubr.msk.bf16.mxu1 %vm6303_vm0, %v6302_v0 }
  0x66   : > { %5344 = vmatpush3.bf16.xpose.msra.mxu0 %v6426_v11  ;;  %5356 = vmatpush3.bf16.xpose.msra.mxu1 %v6426_v11 }
  0x67   : > { %5345 = vmatprep.subr.bf16.mxu0 %v6302_v0  ;;  %5357 = vmatprep.subr.bf16.mxu1 %v6302_v0 }
  0x6e   : > { %5346 = vmatpush3.bf16.xpose.msra.mxu0 %v6429_v12  ;;  %5358 = vmatpush3.bf16.xpose.msra.mxu1 %v6429_v12 }
  0x6f   : > { %5347 = vmatprep.subr.bf16.mxu0 %v6302_v0  ;;  %5359 = vmatprep.subr.bf16.mxu1 %v6302_v0 }
  0x76   : > { %5348 = vmatpush3.bf16.xpose.msra.mxu0 %v6440_v16  ;;  %5360 = vmatpush3.bf16.xpose.msra.mxu1 %v6440_v16 }
  0x77   : > { %5365 = vmatprep.subr.bf16.mxu0 %v6302_v0  ;;  %5377 = vmatprep.subr.bf16.mxu1 %v6302_v0 }
  0x7d   : > { %5350 = vmatmul.mubr.msk.bf16.vlgmr.msra.gmra.mxu0 %vm353_vm1, %v349_v21  ;;  %5362 = vmatmul.mubr.msk.bf16.vlgmr.msra.gmra.mxu1 %vm353_vm1, %v350_v22 }
  0x7e   : > { %5366 = vmatpush3.bf16.xpose.msra.mxu0 %v6419_v10  ;;  %5378 = vmatpush3.bf16.xpose.msra.mxu1 %v6419_v10 }
  0x7f   : > { %5367 = vmatprep.subr.bf16.mxu0 %v6302_v0  ;;  %5379 = vmatprep.subr.bf16.mxu1 %v6302_v0 }
  0x80   : > { %5373 = vmatprep.mubr.msk.bf16.mxu0 %vm6303_vm0, %v6302_v0  ;;  %5385 = vmatprep.mubr.msk.bf16.mxu1 %vm6303_vm0, %v6302_v0 }
  0x86   : > { %5368 = vmatpush3.bf16.xpose.msra.mxu0 %v6426_v11  ;;  %5380 = vmatpush3.bf16.xpose.msra.mxu1 %v6426_v11 }
  0x87   : > { %5369 = vmatprep.subr.bf16.mxu0 %v6302_v0  ;;  %5381 = vmatprep.subr.bf16.mxu1 %v6302_v0 }
  0x8e   : > { %5370 = vmatpush3.bf16.xpose.msra.mxu0 %v6429_v12  ;;  %5382 = vmatpush3.bf16.xpose.msra.mxu1 %v6429_v12 }
  0x8f   : > { %5371 = vmatprep.subr.bf16.mxu0 %v6302_v0  ;;  %5383 = vmatprep.subr.bf16.mxu1 %v6302_v0 }
  0x96   : > { %5372 = vmatpush3.bf16.xpose.msra.mxu0 %v6440_v16  ;;  %5384 = vmatpush3.bf16.xpose.msra.mxu1 %v6440_v16 }
  0x97   : > { %5389 = vmatprep.subr.bf16.mxu0 %v6302_v0  ;;  %5401 = vmatprep.subr.bf16.mxu1 %v6302_v0 }
  0x9d   : > { %5374 = vmatmul.mubr.msk.bf16.vlgmr.msra.gmra.mxu0 %vm353_vm1, %v351_v23  ;;  %5386 = vmatmul.mubr.msk.bf16.vlgmr.msra.gmra.mxu1 %vm353_vm1, %v352_v24 }
  0x9e   : > { %5390 = vmatpush3.bf16.xpose.msra.mxu0 %v6419_v10  ;;  %5402 = vmatpush3.bf16.xpose.msra.mxu1 %v6419_v10 }
  0x9f   : > { %5391 = vmatprep.subr.bf16.mxu0 %v6302_v0  ;;  %5403 = vmatprep.subr.bf16.mxu1 %v6302_v0 }
  0xa0   : > { %5397 = vmatprep.mubr.msk.bf16.mxu0 %vm6303_vm0, %v6302_v0  ;;  %5409 = vmatprep.mubr.msk.bf16.mxu1 %vm6303_vm0, %v6302_v0 }
  0xa6   : > { %5392 = vmatpush3.bf16.xpose.msra.mxu0 %v6426_v11  ;;  %5404 = vmatpush3.bf16.xpose.msra.mxu1 %v6426_v11 }
  0xa7   : > { %5393 = vmatprep.subr.bf16.mxu0 %v6302_v0  ;;  %5405 = vmatprep.subr.bf16.mxu1 %v6302_v0 }
  0xae   : > { %5394 = vmatpush3.bf16.xpose.msra.mxu0 %v6429_v12  ;;  %5406 = vmatpush3.bf16.xpose.msra.mxu1 %v6429_v12 }
  0xaf   : > { %5395 = vmatprep.subr.bf16.mxu0 %v6302_v0  ;;  %5407 = vmatprep.subr.bf16.mxu1 %v6302_v0 }
  0xb6   : > { %5396 = vmatpush3.bf16.xpose.msra.mxu0 %v6440_v16  ;;  %5408 = vmatpush3.bf16.xpose.msra.mxu1 %v6440_v16 }
  0xb7   : > { %5413 = vmatprep.subr.bf16.mxu0 %v6302_v0  ;;  %5425 = vmatprep.subr.bf16.mxu1 %v6302_v0 }
  0xbd   : > { %5398 = vmatmul.mubr.msk.bf16.vlgmr.msra.gmra.mxu0 %vm353_vm1, %v727_v25  ;;  %5410 = vmatmul.mubr.msk.bf16.vlgmr.msra.gmra.mxu1 %vm353_vm1, %v728_v26 }
  0xbe   : > { %5414 = vmatpush3.bf16.xpose.msra.mxu0 %v6419_v10  ;;  %5426 = vmatpush3.bf16.xpose.msra.mxu1 %v6419_v10 }
  0xbf   : > { %5415 = vmatprep.subr.bf16.mxu0 %v6302_v0  ;;  %5427 = vmatprep.subr.bf16.mxu1 %v6302_v0 }
  0xc0   : > { %5421 = vmatprep.mubr.msk.bf16.mxu0 %vm6303_vm0, %v6302_v0  ;;  %5433 = vmatprep.mubr.msk.bf16.mxu1 %vm6303_vm0, %v6302_v0 }
  0xc6   : > { %5416 = vmatpush3.bf16.xpose.msra.mxu0 %v6426_v11  ;;  %5428 = vmatpush3.bf16.xpose.msra.mxu1 %v6426_v11 }
  0xc7   : > { %5417 = vmatprep.subr.bf16.mxu0 %v6302_v0  ;;  %5429 = vmatprep.subr.bf16.mxu1 %v6302_v0 }
  0xce   : > { %5418 = vmatpush3.bf16.xpose.msra.mxu0 %v6429_v12  ;;  %5430 = vmatpush3.bf16.xpose.msra.mxu1 %v6429_v12 }
  0xcf   : > { %5419 = vmatprep.subr.bf16.mxu0 %v6302_v0  ;;  %5431 = vmatprep.subr.bf16.mxu1 %v6302_v0 }
  0xd6   : > { %5420 = vmatpush3.bf16.xpose.msra.mxu0 %v6440_v16  ;;  %5432 = vmatpush3.bf16.xpose.msra.mxu1 %v6440_v16 }
  0xd7   : > { %5437 = vmatprep.subr.bf16.mxu0 %v6302_v0  ;;  %5449 = vmatprep.subr.bf16.mxu1 %v6302_v0 }
  0xdd   : > { %5422 = vmatmul.mubr.msk.bf16.vlgmr.msra.gmra.mxu0 %vm353_vm1, %v729_v27  ;;  %5434 = vmatmul.mubr.msk.bf16.vlgmr.msra.gmra.mxu1 %vm353_vm1, %v730_v28  ;;  %v5956_v27 = vld [vmem:[%s7737_s2 + $0x88] sm:$0xff]  }
  0xde   : > { %5438 = vmatpush3.bf16.xpose.msra.mxu0 %v6419_v10  ;;  %5450 = vmatpush3.bf16.xpose.msra.mxu1 %v6419_v10  ;;  %v5957_v28 = vld [vmem:[%s7737_s2 + $0xa8] sm:$0xff]  }
  0xdf   : > { %5439 = vmatprep.subr.bf16.mxu0 %v6302_v0  ;;  %5451 = vmatprep.subr.bf16.mxu1 %v6302_v0 }
  0xe0   : > { %5445 = vmatprep.mubr.msk.bf16.mxu0 %vm6303_vm0, %v6302_v0  ;;  %5457 = vmatprep.mubr.msk.bf16.mxu1 %vm6303_vm0, %v6302_v0 }
  0xe6   : > { %5440 = vmatpush3.bf16.xpose.msra.mxu0 %v6426_v11  ;;  %5452 = vmatpush3.bf16.xpose.msra.mxu1 %v6426_v11 }
  0xe7   : > { %5441 = vmatprep.subr.bf16.mxu0 %v6302_v0  ;;  %5453 = vmatprep.subr.bf16.mxu1 %v6302_v0 }
  0xee   : > { %5442 = vmatpush3.bf16.xpose.msra.mxu0 %v6429_v12  ;;  %5454 = vmatpush3.bf16.xpose.msra.mxu1 %v6429_v12 }
  0xef   : > { %5443 = vmatprep.subr.bf16.mxu0 %v6302_v0  ;;  %5455 = vmatprep.subr.bf16.mxu1 %v6302_v0 }
  0xf6   : > { %5444 = vmatpush3.bf16.xpose.msra.mxu0 %v6440_v16  ;;  %5456 = vmatpush3.bf16.xpose.msra.mxu1 %v6440_v16 }
  0xf7   : > { %5461 = vmatprep.subr.bf16.mxu0 %v6302_v0  ;;  %5473 = vmatprep.subr.bf16.mxu1 %v6302_v0 }
  0xfd   : > { %v403_v31 = vpop.f32.mrf.mxu0  ;;  %v446_v32 = vpop.f32.mrf.mxu1  ;;  %5446 = vmatmul.mubr.msk.bf16.vlgmr.msra.gmra.mxu0 %vm353_vm1, %v731_v29  ;;  %5458 = vmatmul.mubr.msk.bf16.vlgmr.msra.gmra.mxu1 %vm353_vm1, %v732_v30 }
  0xfe   : > { %v710_v33 = vpack.c.bf16 %v403_v31, %v403_v31  ;;  %v711_v34 = vpack.c.bf16 %v446_v32, %v446_v32  ;;  %5462 = vmatpush3.bf16.xpose.msra.mxu0 %v6419_v10  ;;  %5474 = vmatpush3.bf16.xpose.msra.mxu1 %v6419_v10  ;;  %v1101_v10 = vld [vmem:[%s6653_s21 + $0x30] sm:$0xff] }
  0xff   : > { %v5303_v35 = vpop.f32.mrf.mxu0  ;;  %v5315_v36 = vpop.f32.mrf.mxu1  ;;  %5463 = vmatprep.subr.bf16.mxu0 %v6302_v0  ;;  %5475 = vmatprep.subr.bf16.mxu1 %v6302_v0 }
 0x100   : > { %719 = vst.msk [vmem:[#allocation2] sm:$0xf] %vm718_vm2, %v710_v33  ;;  %720 = vst.msk [vmem:[#allocation2 + $0x4] sm:$0xf] %vm718_vm2, %v711_v34  ;;  %5469 = vmatprep.mubr.msk.bf16.mxu0 %vm6303_vm0, %v6302_v0  ;;  %5481 = vmatprep.mubr.msk.bf16.mxu1 %vm6303_vm0, %v6302_v0  ;;  %v5958_v33 = vld [vmem:[%s7737_s2 + $0x80] sm:$0xff]   ;;  %v5960_v35 = vld [vmem:[%s7737_s2 + $0xd8] sm:$0xff]  }
 0x101   : > { %v406_v37 = vpop.f32.mrf.mxu0  ;;  %v449_v38 = vpop.f32.mrf.mxu1  ;;  %v5959_v34 = vld [vmem:[%s7737_s2 + $0xa0] sm:$0xff]   ;;  %v5961_v36 = vld [vmem:[%s7737_s2 + $0xf8] sm:$0xff]  }
 0x102   : > { %v5962_v37 = vld [vmem:[%s7737_s2 + $0xd0] sm:$0xff]  }
 0x103   : > { %v5304_v39 = vpop.f32.mrf.mxu0  ;;  %v5316_v40 = vpop.f32.mrf.mxu1  ;;  %v5963_v38 = vld [vmem:[%s7737_s2 + $0xf0] sm:$0xff]  }
 0x104   : > { %v5964_v39 = vld [vmem:[%s7737_s2 + $0xc8] sm:$0xff]  }
 0x105   : > { %v5965_v40 = vld [vmem:[%s7737_s2 + $0xe8] sm:$0xff]  }
 0x106   : > { %5464 = vmatpush3.bf16.xpose.msra.mxu0 %v6426_v11  ;;  %5476 = vmatpush3.bf16.xpose.msra.mxu1 %v6426_v11  ;;  %v1102_v11 = vld [vmem:[%s6653_s21 + $0x38] sm:$0xff] }
 0x107   : > { %5465 = vmatprep.subr.bf16.mxu0 %v6302_v0  ;;  %5477 = vmatprep.subr.bf16.mxu1 %v6302_v0  ;;  %v6727_v14 = vpack.c.bf16 %v1102_v11, %v1101_v10  ;;  %v1928_v43 = vld [vmem:[#allocation2] sm:$0xf]  ;;  %v1929_v44 = vld [vmem:[#allocation2 + $0x4] sm:$0xf] }
 0x10e   : > { %5466 = vmatpush3.bf16.xpose.msra.mxu0 %v6429_v12  ;;  %5478 = vmatpush3.bf16.xpose.msra.mxu1 %v6429_v12  ;;  %v5948_v12 = vld [vmem:[%s7737_s2 + $0x48] sm:$0xff]  }
 0x10f   : > { %5467 = vmatprep.subr.bf16.mxu0 %v6302_v0  ;;  %5479 = vmatprep.subr.bf16.mxu1 %v6302_v0  ;;  %v1097_v0 = vld [vmem:[%s6653_s21 + $0x10] sm:$0xff]  ;;  %s309_s21 = sand.u32 1, %s6284_s25  }
 0x110   : > { %v6699_v4 = vpack.c.bf16 %v1098_v1, %v1097_v0  ;;  %s4832_s15 = sshll.u32 %s309_s21, 6  ;;  %s7690_s27 = scalar_lea.sflag [#allocation5], %s309_s21 }
 0x111   : > { %s7633_s12 = scalar_lea.vmem [#allocation4], %s4832_s15  ;;  %s6230_s15 = scalar_lea.vmem %s6229_s8, 2048 }
 0x112   : > { %s4736_s18 = sshll.u32 %s7633_s12, 4  ;;  %s7681_s18 = int_to_ptr.vmem [resolvable:$true] %s4736_s18 }
 0x113   : > { %s6224_s23 = scalar_lea.vmem %s7681_s18, 1024  ;;  %p6231_p1 = scmp.lt.s32.totalorder %s7681_s18, %s6229_s8 }
 0x114   : > { %p6225_p12 = scmp.ne.s32.totalorder %s7681_s18, %s6224_s23  ;;  %p6232_p2 = scmp.lt.s32.totalorder %s6230_s15, %s6224_s23 }
 0x116   : > { %5468 = vmatpush3.bf16.xpose.msra.mxu0 %v6440_v16  ;;  %5480 = vmatpush3.bf16.xpose.msra.mxu1 %v6440_v16  ;;  %v5951_v16 = vld [vmem:[%s7737_s2 + $0x60] sm:$0xff]   ;;  %p6226_p13 = pnand %p6225_p12, %p6387_p4  ;;  %p6233_p3 = por %p6232_p2, %p6231_p1 }
 0x117   : > { %5485 = vmatprep.subr.bf16.mxu0 %v5936_v41  ;;  %5501 = vmatprep.subr.bf16.mxu1 %v5937_v42 }
 0x118   : > { %p6227_p0 = pneg %p6226_p13 }
 0x11a   : > { %p6234_p5 = pnand %p6233_p3, %p6227_p0 }
 0x11d   : > { %v489_v50 = vpop.f32.mrf.mxu0  ;;  %v532_v51 = vpop.f32.mrf.mxu1  ;;  %5470 = vmatmul.mubr.msk.bf16.vlgmr.msra.gmra.mxu0 %vm353_vm1, %v733_v45  ;;  %5482 = vmatmul.mubr.msk.bf16.vlgmr.msra.gmra.mxu1 %vm353_vm1, %v734_v46 }
 0x11e   : > { %v712_v52 = vpack.c.bf16 %v489_v50, %v489_v50  ;;  %v713_v53 = vpack.c.bf16 %v532_v51, %v532_v51  ;;  %5486 = vmatpush3.bf16.msra.mxu0 %v5936_v41  ;;  %5502 = vmatpush3.bf16.msra.mxu1 %v5937_v42  ;;  %v5966_v41 = vld [vmem:[%s7737_s2 + $0xc0] sm:$0xff]  }
 0x11f   : > { %v5327_v54 = vpop.f32.mrf.mxu0  ;;  %v5339_v55 = vpop.f32.mrf.mxu1  ;;  %5487 = vmatprep.subr.bf16.mxu0 %v5938_v47  ;;  %5503 = vmatprep.subr.bf16.mxu1 %v5939_v48  ;;  %v5967_v42 = vld [vmem:[%s7737_s2 + $0xe0] sm:$0xff]  }
 0x120   : > { %721 = vst.msk [vmem:[#allocation2 + $0x8] sm:$0xf] %vm718_vm2, %v712_v52  ;;  %722 = vst.msk [vmem:[#allocation2 + $0xc] sm:$0xf] %vm718_vm2, %v713_v53  ;;  %5493 = vmatprep.mubr.msk.bf16.mxu0 %vm353_vm1, %v6669_v49  ;;  %5509 = vmatprep.mubr.msk.bf16.mxu1 %vm353_vm1, %v6669_v49 }
 0x121   : > { %v492_v58 = vpop.f32.mrf.mxu0  ;;  %v535_v59 = vpop.f32.mrf.mxu1 }
 0x122   : > { %5488 = vmatpush3.bf16.msra.mxu0 %v5938_v47  ;;  %5504 = vmatpush3.bf16.msra.mxu1 %v5939_v48  ;;  %v1951_v47 = vsel %vm1949_vm3, %v1928_v43, 0  ;;  %v2031_v48 = vsel %vm1949_vm3, %v1929_v44, 0 }
 0x123   : > { %v5328_v60 = vpop.f32.mrf.mxu0  ;;  %v5340_v61 = vpop.f32.mrf.mxu1  ;;  %5489 = vmatprep.subr.bf16.mxu0 %v5940_v56  ;;  %5505 = vmatprep.subr.bf16.mxu1 %v5941_v57 }
 0x126   : > { %5490 = vmatpush3.bf16.msra.mxu0 %v5940_v56  ;;  %5506 = vmatpush3.bf16.msra.mxu1 %v5941_v57 }
 0x127   : > { %5491 = vmatprep.subr.bf16.mxu0 %v5942_v62  ;;  %5507 = vmatprep.subr.bf16.mxu1 %v5943_v63  ;;  %v6833_v51 = vld [vmem:[#allocation2 + $0x8] sm:$0xf]  ;;  %v6835_v52 = vld [vmem:[#allocation2 + $0xc] sm:$0xf] }
 0x12a   : > { %5492 = vmatpush3.bf16.msra.mxu0 %v5942_v62  ;;  %5508 = vmatpush3.bf16.msra.mxu1 %v5943_v63 }
 0x12b   : > { %5517 = vmatprep.subr.bf16.mxu0 %v5944_v2  ;;  %5533 = vmatprep.subr.bf16.mxu1 %v5945_v3 }
 0x12d   : > { %5494 = vmatmul.mubr.msk.bf16.vlgmr.msra.gmra.mxu0 %vm353_vm1, %v6699_v4  ;;  %5510 = vmatmul.mubr.msk.bf16.vlgmr.msra.gmra.mxu1 %vm353_vm1, %v6699_v4 }
 0x12e   : > { %5518 = vmatpush3.bf16.msra.mxu0 %v5944_v2  ;;  %5534 = vmatpush3.bf16.msra.mxu1 %v5945_v3 }
 0x12f   : > { %5519 = vmatprep.subr.bf16.mxu0 %v5946_v7  ;;  %5535 = vmatprep.subr.bf16.mxu1 %v5947_v8 }
 0x130   : > { %5497 = vmatprep.mubr.msk.bf16.mxu0 %vm353_vm1, %v6709_v9  ;;  %5513 = vmatprep.mubr.msk.bf16.mxu1 %vm353_vm1, %v6709_v9 }
 0x132   : > { %5520 = vmatpush3.bf16.msra.mxu0 %v5946_v7  ;;  %5536 = vmatpush3.bf16.msra.mxu1 %v5947_v8 }
 0x133   : > { %5521 = vmatprep.subr.bf16.mxu0 %v5948_v12  ;;  %5537 = vmatprep.subr.bf16.mxu1 %v5949_v13 }
 0x135   : > { %5498 = vmatmul.mubr.msk.bf16.gmra.mxu0 %vm353_vm1, %v6727_v14  ;;  %5514 = vmatmul.mubr.msk.bf16.gmra.mxu1 %vm353_vm1, %v6727_v14 }
 0x136   : > { %5522 = vmatpush3.bf16.msra.mxu0 %v5948_v12  ;;  %5538 = vmatpush3.bf16.msra.mxu1 %v5949_v13 }
 0x137   : > { %5523 = vmatprep.subr.bf16.mxu0 %v5950_v15  ;;  %5539 = vmatprep.subr.bf16.mxu1 %v5951_v16 }
 0x138   : > { %5525 = vmatprep.mubr.msk.bf16.mxu0 %vm353_vm1, %v6669_v49  ;;  %5541 = vmatprep.mubr.msk.bf16.mxu1 %vm353_vm1, %v6669_v49 }
 0x13a   : > { %5524 = vmatpush3.bf16.msra.mxu0 %v5950_v15  ;;  %5540 = vmatpush3.bf16.msra.mxu1 %v5951_v16 }
 0x13b   : > { %5549 = vmatprep.subr.bf16.mxu0 %v5952_v17  ;;  %5565 = vmatprep.subr.bf16.mxu1 %v5953_v18 }
 0x13d   : > { %v575_v21 = vpop.f32.mrf.mxu0  ;;  %v618_v22 = vpop.f32.mrf.mxu1  ;;  %5526 = vmatmul.mubr.msk.bf16.vlgmr.msra.gmra.mxu0 %vm353_vm1, %v6699_v4  ;;  %5542 = vmatmul.mubr.msk.bf16.vlgmr.msra.gmra.mxu1 %vm353_vm1, %v6699_v4 }
 0x13e   : > { %v714_v23 = vpack.c.bf16 %v575_v21, %v575_v21  ;;  %v715_v24 = vpack.c.bf16 %v618_v22, %v618_v22  ;;  %5550 = vmatpush3.bf16.msra.mxu0 %v5952_v17  ;;  %5566 = vmatpush3.bf16.msra.mxu1 %v5953_v18 }
 0x13f   : > { %v5351_v25 = vpop.f32.mrf.mxu0  ;;  %v5363_v26 = vpop.f32.mrf.mxu1  ;;  %5551 = vmatprep.subr.bf16.mxu0 %v5954_v19  ;;  %5567 = vmatprep.subr.bf16.mxu1 %v5955_v20 }
 0x140   : > { %723 = vst.msk [vmem:[#allocation2 + $0x10] sm:$0xf] %vm718_vm2, %v714_v23  ;;  %724 = vst.msk [vmem:[#allocation2 + $0x14] sm:$0xf] %vm718_vm2, %v715_v24  ;;  %5529 = vmatprep.mubr.msk.bf16.mxu0 %vm353_vm1, %v6709_v9  ;;  %5545 = vmatprep.mubr.msk.bf16.mxu1 %vm353_vm1, %v6709_v9 }
 0x141   : > { %v578_v29 = vpop.f32.mrf.mxu0  ;;  %v621_v30 = vpop.f32.mrf.mxu1 }
 0x142   : > { %5552 = vmatpush3.bf16.msra.mxu0 %v5954_v19  ;;  %5568 = vmatpush3.bf16.msra.mxu1 %v5955_v20 }
 0x143   : > { %v5352_v31 = vpop.f32.mrf.mxu0  ;;  %v5364_v32 = vpop.f32.mrf.mxu1  ;;  %5553 = vmatprep.subr.bf16.mxu0 %v5956_v27  ;;  %5569 = vmatprep.subr.bf16.mxu1 %v5957_v28 }
 0x145   : > { %5530 = vmatmul.mubr.msk.bf16.gmra.mxu0 %vm353_vm1, %v6727_v14  ;;  %5546 = vmatmul.mubr.msk.bf16.gmra.mxu1 %vm353_vm1, %v6727_v14 }
 0x146   : > { %5554 = vmatpush3.bf16.msra.mxu0 %v5956_v27  ;;  %5570 = vmatpush3.bf16.msra.mxu1 %v5957_v28 }
 0x147   : > { %5555 = vmatprep.subr.bf16.mxu0 %v5958_v33  ;;  %5571 = vmatprep.subr.bf16.mxu1 %v5959_v34 }
 0x148   : > { %5557 = vmatprep.mubr.msk.bf16.mxu0 %vm353_vm1, %v6669_v49  ;;  %5573 = vmatprep.mubr.msk.bf16.mxu1 %vm353_vm1, %v6669_v49 }
 0x14a   : > { %5556 = vmatpush3.bf16.msra.mxu0 %v5958_v33  ;;  %5572 = vmatpush3.bf16.msra.mxu1 %v5959_v34 }
 0x14b   : > { %5581 = vmatprep.subr.bf16.mxu0 %v5960_v35  ;;  %5597 = vmatprep.subr.bf16.mxu1 %v5961_v36 }
 0x14d   : > { %5558 = vmatmul.mubr.msk.bf16.vlgmr.msra.gmra.mxu0 %vm353_vm1, %v6699_v4  ;;  %5574 = vmatmul.mubr.msk.bf16.vlgmr.msra.gmra.mxu1 %vm353_vm1, %v6699_v4 }
 0x14e   : > { %5582 = vmatpush3.bf16.msra.mxu0 %v5960_v35  ;;  %5598 = vmatpush3.bf16.msra.mxu1 %v5961_v36 }
 0x14f   : > { %5583 = vmatprep.subr.bf16.mxu0 %v5962_v37  ;;  %5599 = vmatprep.subr.bf16.mxu1 %v5963_v38 }
 0x150   : > { %5561 = vmatprep.mubr.msk.bf16.mxu0 %vm353_vm1, %v6709_v9  ;;  %5577 = vmatprep.mubr.msk.bf16.mxu1 %vm353_vm1, %v6709_v9 }
 0x152   : > { %5584 = vmatpush3.bf16.msra.mxu0 %v5962_v37  ;;  %5600 = vmatpush3.bf16.msra.mxu1 %v5963_v38 }
 0x153   : > { %5585 = vmatprep.subr.bf16.mxu0 %v5964_v39  ;;  %5601 = vmatprep.subr.bf16.mxu1 %v5965_v40 }
 0x155   : > { %5562 = vmatmul.mubr.msk.bf16.gmra.mxu0 %vm353_vm1, %v6727_v14  ;;  %5578 = vmatmul.mubr.msk.bf16.gmra.mxu1 %vm353_vm1, %v6727_v14 }
 0x156   : > { %5586 = vmatpush3.bf16.msra.mxu0 %v5964_v39  ;;  %5602 = vmatpush3.bf16.msra.mxu1 %v5965_v40 }
 0x157   : > { %5587 = vmatprep.subr.bf16.mxu0 %v5966_v41  ;;  %5603 = vmatprep.subr.bf16.mxu1 %v5967_v42 }
 0x158   : > { %5589 = vmatprep.mubr.msk.bf16.mxu0 %vm353_vm1, %v6669_v49  ;;  %5605 = vmatprep.mubr.msk.bf16.mxu1 %vm353_vm1, %v6669_v49 }
 0x15a   : > { %5588 = vmatpush3.bf16.msra.mxu0 %v5966_v41  ;;  %5604 = vmatpush3.bf16.msra.mxu1 %v5967_v42 }
 0x15b   : > { %5853 = vmatprep.subr.msk.bf16.mxu0 %vm1949_vm3, %v1928_v43  ;;  %5854 = vmatprep.subr.msk.bf16.mxu1 %vm1949_vm3, %v1929_v44 }
 0x15d   : > { %v661_v45 = vpop.f32.mrf.mxu0  ;;  %v704_v46 = vpop.f32.mrf.mxu1  ;;  %5590 = vmatmul.mubr.msk.bf16.vlgmr.msra.gmra.mxu0 %vm353_vm1, %v6699_v4  ;;  %5606 = vmatmul.mubr.msk.bf16.vlgmr.msra.gmra.mxu1 %vm353_vm1, %v6699_v4 }
 0x15e   : > { %v716_v49 = vpack.c.bf16 %v661_v45, %v661_v45  ;;  %v717_v50 = vpack.c.bf16 %v704_v46, %v704_v46  ;;  %5614 = vmatpush3.bf16.msra.mxu0 %v1951_v47  ;;  %5624 = vmatpush3.bf16.msra.mxu1 %v2031_v48 }
 0x15f   : > { %v5375_v53 = vpop.f32.mrf.mxu0  ;;  %v5387_v54 = vpop.f32.mrf.mxu1  ;;  %5855 = vmatprep.subr.msk.bf16.mxu0 %vm1949_vm3, %v6833_v51  ;;  %5856 = vmatprep.subr.msk.bf16.mxu1 %vm1949_vm3, %v6835_v52 }
 0x160   : > { %725 = vst.msk [vmem:[#allocation2 + $0x18] sm:$0xf] %vm718_vm2, %v716_v49  ;;  %726 = vst.msk [vmem:[#allocation2 + $0x1c] sm:$0xf] %vm718_vm2, %v717_v50  ;;  %5593 = vmatprep.mubr.msk.bf16.mxu0 %vm353_vm1, %v6709_v9  ;;  %5609 = vmatprep.mubr.msk.bf16.mxu1 %vm353_vm1, %v6709_v9  ;;  %v2111_v53 = vsel %vm1949_vm3, %v6833_v51, 0  ;;  %v2191_v54 = vsel %vm1949_vm3, %v6835_v52, 0 }
 0x161   : > { %v664_v55 = vpop.f32.mrf.mxu0  ;;  %v707_v56 = vpop.f32.mrf.mxu1 }
 0x162   : > { %v1932_v55 = vld [vmem:[#allocation2 + $0x10] sm:$0xf]  ;;  %v1933_v56 = vld [vmem:[#allocation2 + $0x14] sm:$0xf] }
 0x163   : > { %v5376_v57 = vpop.f32.mrf.mxu0  ;;  %v5388_v58 = vpop.f32.mrf.mxu1 }
 0x165   : > { %5594 = vmatmul.mubr.msk.bf16.gmra.mxu0 %vm353_vm1, %v6727_v14  ;;  %5610 = vmatmul.mubr.msk.bf16.gmra.mxu1 %vm353_vm1, %v6727_v14 }
 0x17d   : > { %v772_v59 = vpop.f32.mrf.mxu0  ;;  %v815_v60 = vpop.f32.mrf.mxu1 }
 0x17e   : > { %v1079_v61 = vpack.c.bf16 %v772_v59, %v772_v59  ;;  %v1080_v62 = vpack.c.bf16 %v815_v60, %v815_v60 }
 0x17f   : > { %v5399_v63 = vpop.f32.mrf.mxu0  ;;  %v5411_v0 = vpop.f32.mrf.mxu1 }
 0x180   : > { %1087 = vst.msk [vmem:[#allocation3] sm:$0xf] %vm718_vm2, %v1079_v61  ;;  %1088 = vst.msk [vmem:[#allocation3 + $0x4] sm:$0xf] %vm718_vm2, %v1080_v62 }
 0x181   : > { %v775_v1 = vpop.f32.mrf.mxu0  ;;  %v818_v2 = vpop.f32.mrf.mxu1 }
 0x183   : > { %v5400_v3 = vpop.f32.mrf.mxu0  ;;  %v5412_v4 = vpop.f32.mrf.mxu1 }
 0x19d   : > { %v858_v5 = vpop.f32.mrf.mxu0  ;;  %v901_v6 = vpop.f32.mrf.mxu1 }
 0x19e   : > { %v1081_v7 = vpack.c.bf16 %v858_v5, %v858_v5  ;;  %v1082_v8 = vpack.c.bf16 %v901_v6, %v901_v6 }
 0x19f   : > { %v5423_v9 = vpop.f32.mrf.mxu0  ;;  %v5435_v10 = vpop.f32.mrf.mxu1 }
 0x1a0   : > { %1089 = vst.msk [vmem:[#allocation3 + $0x8] sm:$0xf] %vm718_vm2, %v1081_v7  ;;  %1090 = vst.msk [vmem:[#allocation3 + $0xc] sm:$0xf] %vm718_vm2, %v1082_v8 }
 0x1a1   : > { %v861_v11 = vpop.f32.mrf.mxu0  ;;  %v904_v12 = vpop.f32.mrf.mxu1 }
 0x1a3   : > { %v5424_v13 = vpop.f32.mrf.mxu0  ;;  %v5436_v14 = vpop.f32.mrf.mxu1 }
 0x1bd   : > { %v944_v15 = vpop.f32.mrf.mxu0  ;;  %v987_v16 = vpop.f32.mrf.mxu1 }
 0x1be   : > { %v1083_v17 = vpack.c.bf16 %v944_v15, %v944_v15  ;;  %v1084_v18 = vpack.c.bf16 %v987_v16, %v987_v16  ;;  %v2271_v15 = vsel %vm1949_vm3, %v1932_v55, 0  ;;  %v2351_v16 = vsel %vm1949_vm3, %v1933_v56, 0 }
 0x1bf   : > { %v5447_v19 = vpop.f32.mrf.mxu0  ;;  %v5459_v20 = vpop.f32.mrf.mxu1 }
 0x1c0   : > { %1091 = vst.msk [vmem:[#allocation3 + $0x10] sm:$0xf] %vm718_vm2, %v1083_v17  ;;  %1092 = vst.msk [vmem:[#allocation3 + $0x14] sm:$0xf] %vm718_vm2, %v1084_v18  ;;  %v1934_v17 = vld [vmem:[#allocation2 + $0x18] sm:$0xf] }
 0x1c1   : > { %v947_v21 = vpop.f32.mrf.mxu0  ;;  %v990_v22 = vpop.f32.mrf.mxu1  ;;  %v1935_v18 = vld [vmem:[#allocation2 + $0x1c] sm:$0xf] }
 0x1c3   : > { %v5448_v23 = vpop.f32.mrf.mxu0  ;;  %v5460_v24 = vpop.f32.mrf.mxu1 }
 0x1dd   : > { %v1030_v25 = vpop.f32.mrf.mxu0  ;;  %v1073_v26 = vpop.f32.mrf.mxu1 }
 0x1de   : > { %v1085_v27 = vpack.c.bf16 %v1030_v25, %v1030_v25  ;;  %v1086_v28 = vpack.c.bf16 %v1073_v26, %v1073_v26 }
 0x1df   : > { %v5471_v29 = vpop.f32.mrf.mxu0  ;;  %v5483_v30 = vpop.f32.mrf.mxu1 }
 0x1e0   : > { %1093 = vst.msk [vmem:[#allocation3 + $0x18] sm:$0xf] %vm718_vm2, %v1085_v27  ;;  %1094 = vst.msk [vmem:[#allocation3 + $0x1c] sm:$0xf] %vm718_vm2, %v1086_v28 }
 0x1e1   : > { %v1033_v31 = vpop.f32.mrf.mxu0  ;;  %v1076_v32 = vpop.f32.mrf.mxu1 }
 0x1e3   : > { %v5472_v33 = vpop.f32.mrf.mxu0  ;;  %v5484_v34 = vpop.f32.mrf.mxu1 }
 0x1ed   : > { %v5495_v35 = vpop.f32.mrf.mxu0  ;;  %v5511_v36 = vpop.f32.mrf.mxu1 }
 0x1ef   : > { %v1242_v37 = vpop.f32.mrf.mxu0  ;;  %v1331_v38 = vpop.f32.mrf.mxu1 }
 0x1f1   : > { %v5496_v39 = vpop.f32.mrf.mxu0  ;;  %v5512_v40 = vpop.f32.mrf.mxu1 }
 0x1f2   : > { %v1897_v45 = vpack.c.bf16 %v5496_v39, %v5495_v35  ;;  %v1901_v46 = vpack.c.bf16 %v5512_v40, %v5511_v36 }
 0x1f3   : > { %v1245_v41 = vpop.f32.mrf.mxu0  ;;  %v1334_v42 = vpop.f32.mrf.mxu1 }
 0x1f4   : > { %v1896_v43 = vpack.c.bf16 %v1245_v41, %v1242_v37  ;;  %v1900_v44 = vpack.c.bf16 %v1334_v42, %v1331_v38 }
 0x1f5   : > { %v5499_v47 = vpop.f32.mrf.mxu0  ;;  %v5515_v48 = vpop.f32.mrf.mxu1 }
 0x1f6   : > { %5615 = vmatprep.mubr.msk.bf16.mxu0 %vm1936_vm4, %v1896_v43  ;;  %5625 = vmatprep.mubr.msk.bf16.mxu1 %vm1936_vm4, %v1900_v44  ;;  %v2431_v43 = vsel %vm1949_vm3, %v1934_v17, 0  ;;  %v2511_v44 = vsel %vm1949_vm3, %v1935_v18, 0 }
 0x1f7   : > { %v1258_v49 = vpop.f32.mrf.mxu0  ;;  %v1347_v50 = vpop.f32.mrf.mxu1  ;;  %5616 = vmatmul.mubr.msk.bf16.vlgmr.msra.gmra.mxu0 %vm1936_vm4, %v1897_v45  ;;  %5626 = vmatmul.mubr.msk.bf16.vlgmr.msra.gmra.mxu1 %vm1936_vm4, %v1901_v46  ;;  %v3186_v45 = vld [vmem:[#allocation3] sm:$0xf]  ;;  %v3187_v46 = vld [vmem:[#allocation3 + $0x4] sm:$0xf] }
 0x1f8   : > { %5634 = vmatpush3.bf16.msra.mxu0 %v2111_v53  ;;  %5644 = vmatpush3.bf16.msra.mxu1 %v2191_v54 }
 0x1f9   : > { %5857 = vmatprep.subr.msk.bf16.mxu0 %vm1949_vm3, %v1932_v55  ;;  %5858 = vmatprep.subr.msk.bf16.mxu1 %vm1949_vm3, %v1933_v56  ;;  %v5500_v57 = vpop.f32.mrf.mxu0  ;;  %v5516_v58 = vpop.f32.mrf.mxu1 }
 0x1fa   : > { %v1899_v59 = vpack.c.bf16 %v5500_v57, %v5499_v47  ;;  %v1903_v60 = vpack.c.bf16 %v5516_v58, %v5515_v48 }
 0x1fb   : > { %v1261_v61 = vpop.f32.mrf.mxu0  ;;  %v1350_v62 = vpop.f32.mrf.mxu1 }
 0x1fc   : > { %v1898_v63 = vpack.c.bf16 %v1261_v61, %v1258_v49  ;;  %v1902_v0 = vpack.c.bf16 %v1350_v62, %v1347_v50 }
 0x1fd   : > { %v5527_v51 = vpop.f32.mrf.mxu0  ;;  %v5543_v1 = vpop.f32.mrf.mxu1 }
 0x1fe   : > { %5619 = vmatprep.mubr.msk.bf16.mxu0 %vm1936_vm4, %v1898_v63  ;;  %5629 = vmatprep.mubr.msk.bf16.mxu1 %vm1936_vm4, %v1902_v0 }
 0x1ff   : > { %v1420_v52 = vpop.f32.mrf.mxu0  ;;  %v1509_v2 = vpop.f32.mrf.mxu1  ;;  %5620 = vmatmul.mubr.msk.bf16.gmra.mxu0 %vm1936_vm4, %v1899_v59  ;;  %5630 = vmatmul.mubr.msk.bf16.gmra.mxu1 %vm1936_vm4, %v1903_v60 }
 0x201   : > { %v5528_v3 = vpop.f32.mrf.mxu0  ;;  %v5544_v4 = vpop.f32.mrf.mxu1 }
 0x202   : > { %v1905_v5 = vpack.c.bf16 %v5528_v3, %v5527_v51  ;;  %v1909_v6 = vpack.c.bf16 %v5544_v4, %v5543_v1 }
 0x203   : > { %v1423_v7 = vpop.f32.mrf.mxu0  ;;  %v1512_v8 = vpop.f32.mrf.mxu1 }
 0x204   : > { %v1904_v9 = vpack.c.bf16 %v1423_v7, %v1420_v52  ;;  %v1908_v10 = vpack.c.bf16 %v1512_v8, %v1509_v2 }
 0x205   : > { %v5531_v11 = vpop.f32.mrf.mxu0  ;;  %v5547_v12 = vpop.f32.mrf.mxu1 }
 0x206   : > { %5635 = vmatprep.mubr.msk.bf16.mxu0 %vm1936_vm4, %v1904_v9  ;;  %5645 = vmatprep.mubr.msk.bf16.mxu1 %vm1936_vm4, %v1908_v10  ;;  %v6903_v9 = vld [vmem:[#allocation3 + $0x8] sm:$0xf]  ;;  %v6905_v10 = vld [vmem:[#allocation3 + $0xc] sm:$0xf] }
 0x207   : > { %v1436_v13 = vpop.f32.mrf.mxu0  ;;  %v1525_v14 = vpop.f32.mrf.mxu1  ;;  %5636 = vmatmul.mubr.msk.bf16.vlgmr.msra.gmra.mxu0 %vm1936_vm4, %v1905_v5  ;;  %5646 = vmatmul.mubr.msk.bf16.vlgmr.msra.gmra.mxu1 %vm1936_vm4, %v1909_v6  ;;  %v3207_v5 = vsel %vm353_vm1, %v3186_v45, 0  ;;  %v3287_v6 = vsel %vm353_vm1, %v3187_v46, 0 }
 0x208   : > { %5654 = vmatpush3.bf16.msra.mxu0 %v2271_v15  ;;  %5664 = vmatpush3.bf16.msra.mxu1 %v2351_v16 }
 0x209   : > { %5859 = vmatprep.subr.msk.bf16.mxu0 %vm1949_vm3, %v1934_v17  ;;  %5860 = vmatprep.subr.msk.bf16.mxu1 %vm1949_vm3, %v1935_v18  ;;  %v5532_v19 = vpop.f32.mrf.mxu0  ;;  %v5548_v20 = vpop.f32.mrf.mxu1 }
 0x20a   : > { %v1907_v21 = vpack.c.bf16 %v5532_v19, %v5531_v11  ;;  %v1911_v22 = vpack.c.bf16 %v5548_v20, %v5547_v12 }
 0x20b   : > { %v1439_v23 = vpop.f32.mrf.mxu0  ;;  %v1528_v24 = vpop.f32.mrf.mxu1 }
 0x20c   : > { %v1906_v25 = vpack.c.bf16 %v1439_v23, %v1436_v13  ;;  %v1910_v26 = vpack.c.bf16 %v1528_v24, %v1525_v14 }
 0x20d   : > { %v5559_v27 = vpop.f32.mrf.mxu0  ;;  %v5575_v28 = vpop.f32.mrf.mxu1 }
 0x20e   : > { %5639 = vmatprep.mubr.msk.bf16.mxu0 %vm1936_vm4, %v1906_v25  ;;  %5649 = vmatprep.mubr.msk.bf16.mxu1 %vm1936_vm4, %v1910_v26 }
 0x20f   : > { %v1598_v29 = vpop.f32.mrf.mxu0  ;;  %v1687_v30 = vpop.f32.mrf.mxu1  ;;  %5640 = vmatmul.mubr.msk.bf16.gmra.mxu0 %vm1936_vm4, %v1907_v21  ;;  %5650 = vmatmul.mubr.msk.bf16.gmra.mxu1 %vm1936_vm4, %v1911_v22 }
 0x211   : > { %v5560_v31 = vpop.f32.mrf.mxu0  ;;  %v5576_v32 = vpop.f32.mrf.mxu1 }
 0x212   : > { %v1913_v33 = vpack.c.bf16 %v5560_v31, %v5559_v27  ;;  %v1917_v34 = vpack.c.bf16 %v5576_v32, %v5575_v28 }
 0x213   : > { %v1601_v35 = vpop.f32.mrf.mxu0  ;;  %v1690_v36 = vpop.f32.mrf.mxu1 }
 0x214   : > { %v1912_v37 = vpack.c.bf16 %v1601_v35, %v1598_v29  ;;  %v1916_v38 = vpack.c.bf16 %v1690_v36, %v1687_v30 }
 0x215   : > { %v5563_v39 = vpop.f32.mrf.mxu0  ;;  %v5579_v40 = vpop.f32.mrf.mxu1 }
 0x216   : > { %5655 = vmatprep.mubr.msk.bf16.mxu0 %vm1936_vm4, %v1912_v37  ;;  %5665 = vmatprep.mubr.msk.bf16.mxu1 %vm1936_vm4, %v1916_v38 }
 0x217   : > { %v1614_v41 = vpop.f32.mrf.mxu0  ;;  %v1703_v42 = vpop.f32.mrf.mxu1  ;;  %5656 = vmatmul.mubr.msk.bf16.vlgmr.msra.gmra.mxu0 %vm1936_vm4, %v1913_v33  ;;  %5666 = vmatmul.mubr.msk.bf16.vlgmr.msra.gmra.mxu1 %vm1936_vm4, %v1917_v34 }
 0x218   : > { %5674 = vmatpush3.bf16.msra.mxu0 %v2431_v43  ;;  %5684 = vmatpush3.bf16.msra.mxu1 %v2511_v44 }
 0x219   : > { %5861 = vmatprep.subr.msk.bf16.mxu0 %vm353_vm1, %v3186_v45  ;;  %5862 = vmatprep.subr.msk.bf16.mxu1 %vm353_vm1, %v3187_v46  ;;  %v5564_v47 = vpop.f32.mrf.mxu0  ;;  %v5580_v48 = vpop.f32.mrf.mxu1 }
 0x21a   : > { %v1915_v49 = vpack.c.bf16 %v5564_v47, %v5563_v39  ;;  %v1919_v50 = vpack.c.bf16 %v5580_v48, %v5579_v40 }
 0x21b   : > { %v1617_v53 = vpop.f32.mrf.mxu0  ;;  %v1706_v54 = vpop.f32.mrf.mxu1 }
 0x21c   : > { %v1914_v55 = vpack.c.bf16 %v1617_v53, %v1614_v41  ;;  %v1918_v56 = vpack.c.bf16 %v1706_v54, %v1703_v42 }
 0x21d   : > { %v5591_v57 = vpop.f32.mrf.mxu0  ;;  %v5607_v58 = vpop.f32.mrf.mxu1 }
 0x21e   : > { %5659 = vmatprep.mubr.msk.bf16.mxu0 %vm1936_vm4, %v1914_v55  ;;  %5669 = vmatprep.mubr.msk.bf16.mxu1 %vm1936_vm4, %v1918_v56 }
 0x21f   : > { %v1776_v59 = vpop.f32.mrf.mxu0  ;;  %v1865_v60 = vpop.f32.mrf.mxu1  ;;  %5660 = vmatmul.mubr.msk.bf16.gmra.mxu0 %vm1936_vm4, %v1915_v49  ;;  %5670 = vmatmul.mubr.msk.bf16.gmra.mxu1 %vm1936_vm4, %v1919_v50 }
 0x221   : > { %v5592_v61 = vpop.f32.mrf.mxu0  ;;  %v5608_v62 = vpop.f32.mrf.mxu1 }
 0x222   : > { %v1921_v63 = vpack.c.bf16 %v5592_v61, %v5591_v57  ;;  %v1925_v0 = vpack.c.bf16 %v5608_v62, %v5607_v58 }
 0x223   : > { %v1779_v51 = vpop.f32.mrf.mxu0  ;;  %v1868_v1 = vpop.f32.mrf.mxu1 }
 0x224   : > { %v1920_v52 = vpack.c.bf16 %v1779_v51, %v1776_v59  ;;  %v1924_v2 = vpack.c.bf16 %v1868_v1, %v1865_v60 }
 0x225   : > { %v5595_v3 = vpop.f32.mrf.mxu0  ;;  %v5611_v4 = vpop.f32.mrf.mxu1 }
 0x226   : > { %5675 = vmatprep.mubr.msk.bf16.mxu0 %vm1936_vm4, %v1920_v52  ;;  %5685 = vmatprep.mubr.msk.bf16.mxu1 %vm1936_vm4, %v1924_v2 }
 0x227   : > { %5676 = vmatmul.mubr.msk.bf16.vlgmr.msra.gmra.mxu0 %vm1936_vm4, %v1921_v63  ;;  %5686 = vmatmul.mubr.msk.bf16.vlgmr.msra.gmra.mxu1 %vm1936_vm4, %v1925_v0  ;;  %v1792_v7 = vpop.f32.mrf.mxu0  ;;  %v1881_v8 = vpop.f32.mrf.mxu1 }
 0x228   : > { %5694 = vmatpush3.bf16.xpose.msra.mxu0 %v3207_v5  ;;  %5704 = vmatpush3.bf16.xpose.msra.mxu1 %v3287_v6 }
 0x229   : > { %5863 = vmatprep.subr.msk.bf16.mxu0 %vm353_vm1, %v6903_v9  ;;  %5864 = vmatprep.subr.msk.bf16.mxu1 %vm353_vm1, %v6905_v10  ;;  %v5596_v11 = vpop.f32.mrf.mxu0  ;;  %v5612_v12 = vpop.f32.mrf.mxu1 }
 0x22a   : > { %v1923_v13 = vpack.c.bf16 %v5596_v11, %v5595_v3  ;;  %v1927_v15 = vpack.c.bf16 %v5612_v12, %v5611_v4 }
 0x22b   : > { %v1795_v14 = vpop.f32.mrf.mxu0  ;;  %v1884_v16 = vpop.f32.mrf.mxu1 }
 0x22c   : > { %v1922_v17 = vpack.c.bf16 %v1795_v14, %v1792_v7  ;;  %v1926_v18 = vpack.c.bf16 %v1884_v16, %v1881_v8 }
 0x22e   : > { %5679 = vmatprep.mubr.msk.bf16.mxu0 %vm1936_vm4, %v1922_v17  ;;  %5689 = vmatprep.mubr.msk.bf16.mxu1 %vm1936_vm4, %v1926_v18 }
 0x22f   : > { %5680 = vmatmul.mubr.msk.bf16.gmra.mxu0 %vm1936_vm4, %v1923_v13  ;;  %5690 = vmatmul.mubr.msk.bf16.gmra.mxu1 %vm1936_vm4, %v1927_v15 }
 0x2b7   : > { %v6915_v19 = vpop.f32.mrf.mxu0  ;;  %v6917_v20 = vpop.f32.mrf.mxu1 }
 0x2b8   : > { %v2584_v21 = vsel %vm353_vm1, %v6915_v19, -inf  ;;  %v2608_v27 = vsel %vm353_vm1, %v6917_v20, -inf }
 0x2b9   : > { %v6921_v22 = vpop.f32.mrf.mxu1  ;;  %2585 = vmax.xlane.f32.xlu0 %v2584_v21  ;;  %v6923_v23 = vpop.f32.mrf.mxu0 }
 0x2ba   : > { %v2602_v24 = vsel %vm353_vm1, %v6921_v22, -inf  ;;  %v2578_v32 = vsel %vm353_vm1, %v6923_v23, -inf }
 0x2bb   : > { %2603 = vmax.xlane.f32.xlu1 %v2602_v24  ;;  %v6927_v25 = vpop.f32.mrf.mxu0  ;;  %v6929_v26 = vpop.f32.mrf.mxu1 }
 0x2bc   : > { %v2587_v29 = vsel %vm353_vm1, %v6927_v25, -inf  ;;  %v2611_v33 = vsel %vm353_vm1, %v6929_v26, -inf }
 0x2bd   : > { %2609 = vmax.xlane.f32.xlu0 %v2608_v27  ;;  %v6933_v28 = vpop.f32.mrf.mxu0  ;;  %v6937_v30 = vpop.f32.mrf.mxu1 }
 0x2be   : > { %v2581_v36 = vsel %vm353_vm1, %v6933_v28, -inf  ;;  %v2605_v37 = vsel %vm353_vm1, %v6937_v30, -inf }
 0x2bf   : > { %2588 = vmax.xlane.f32.xlu1 %v2587_v29  ;;  %v6939_v31 = vpop.f32.mrf.mxu0  ;;  %v6945_v34 = vpop.f32.mrf.mxu1 }
 0x2c0   : > { %v2596_v40 = vsel %vm353_vm1, %v6939_v31, -inf  ;;  %v2620_v43 = vsel %vm353_vm1, %v6945_v34, -inf }
 0x2c1   : > { %2579 = vmax.xlane.f32.xlu0 %v2578_v32  ;;  %v6947_v35 = vpop.f32.mrf.mxu0  ;;  %v6953_v38 = vpop.f32.mrf.mxu1 }
 0x2c2   : > { %v2590_v46 = vsel %vm353_vm1, %v6947_v35, -inf  ;;  %v2614_v50 = vsel %vm353_vm1, %v6953_v38, -inf }
 0x2c3   : > { %2612 = vmax.xlane.f32.xlu1 %v2611_v33  ;;  %v6955_v39 = vpop.f32.mrf.mxu0  ;;  %v6961_v42 = vpop.f32.mrf.mxu1 }
 0x2c4   : > { %v2599_v41 = vsel %vm353_vm1, %v6955_v39, -inf  ;;  %v2623_v45 = vsel %vm353_vm1, %v6961_v42, -inf }
 0x2c5   : > { %2582 = vmax.xlane.f32.xlu0 %v2581_v36  ;;  %v6965_v44 = vpop.f32.mrf.mxu0  ;;  %v6975_v49 = vpop.f32.mrf.mxu1 }
 0x2c6   : > { %v2593_v48 = vsel %vm353_vm1, %v6965_v44, -inf  ;;  %v2617_v55 = vsel %vm353_vm1, %v6975_v49, -inf }
 0x2c7   : > { %2606 = vmax.xlane.f32.xlu1 %v2605_v37  ;;  %v6971_v47 = vpop.f32.mrf.mxu0  ;;  %v6981_v54 = vpop.f32.mrf.mxu1 }
 0x2c8   : > { %v2632_v56 = vsel %vm353_vm1, %v6971_v47, -inf  ;;  %v2656_v60 = vsel %vm353_vm1, %v6981_v54, -inf }
 0x2c9   : > { %2597 = vmax.xlane.f32.xlu0 %v2596_v40  ;;  %v6979_v53 = vpop.f32.mrf.mxu0  ;;  %v6989_v58 = vpop.f32.mrf.mxu1 }
 0x2ca   : > { %v2626_v0 = vsel %vm353_vm1, %v6979_v53, -inf  ;;  %v2650_v2 = vsel %vm353_vm1, %v6989_v58, -inf }
 0x2cb   : > { %2600 = vmax.xlane.f32.xlu1 %v2599_v41  ;;  %v6987_v57 = vpop.f32.mrf.mxu0  ;;  %v6995_v61 = vpop.f32.mrf.mxu1 }
 0x2cc   : > { %v2635_v59 = vsel %vm353_vm1, %v6987_v57, -inf  ;;  %v2659_v62 = vsel %vm353_vm1, %v6995_v61, -inf }
 0x2cd   : > { %2621 = vmax.xlane.f32.xlu0 %v2620_v43  ;;  %v6999_v63 = vpop.f32.mrf.mxu0  ;;  %v7007_v52 = vpop.f32.mrf.mxu1 }
 0x2ce   : > { %v2629_v1 = vsel %vm353_vm1, %v6999_v63, -inf  ;;  %v2653_v5 = vsel %vm353_vm1, %v7007_v52, -inf }
 0x2cf   : > { %2624 = vmax.xlane.f32.xlu1 %v2623_v45  ;;  %v7003_v51 = vpop.f32.mrf.mxu0  ;;  %v7013_v4 = vpop.f32.mrf.mxu1 }
 0x2d0   : > { %v2644_v6 = vsel %vm353_vm1, %v7003_v51, -inf  ;;  %v2668_v12 = vsel %vm353_vm1, %v7013_v4, -inf }
 0x2d1   : > { %2591 = vmax.xlane.f32.xlu0 %v2590_v46  ;;  %v7011_v3 = vpop.f32.mrf.mxu0  ;;  %v7021_v8 = vpop.f32.mrf.mxu1 }
 0x2d2   : > { %v2638_v16 = vsel %vm353_vm1, %v7011_v3, -inf  ;;  %v2662_v24 = vsel %vm353_vm1, %v7021_v8, -inf }
 0x2d3   : > { %2594 = vmax.xlane.f32.xlu1 %v2593_v48  ;;  %v7019_v7 = vpop.f32.mrf.mxu0  ;;  %v7027_v13 = vpop.f32.mrf.mxu1 }
 0x2d4   : > { %v2647_v11 = vsel %vm353_vm1, %v7019_v7, -inf  ;;  %v2671_v14 = vsel %vm353_vm1, %v7027_v13, -inf }
 0x2d5   : > { %2615 = vmax.xlane.f32.xlu0 %v2614_v50  ;;  %v7031_v15 = vpop.f32.mrf.mxu0  ;;  %v7039_v21 = vpop.f32.mrf.mxu1 }
 0x2d6   : > { %v2641_v18 = vsel %vm353_vm1, %v7031_v15, -inf  ;;  %v2665_v32 = vsel %vm353_vm1, %v7039_v21, -inf }
 0x2d7   : > { %2618 = vmax.xlane.f32.xlu1 %v2617_v55  ;;  %v7035_v17 = vpop.f32.mrf.mxu0  ;;  %v7045_v29 = vpop.f32.mrf.mxu1 }
 0x2d8   : > { %v2680_v33 = vsel %vm353_vm1, %v7035_v17, -inf  ;;  %v2704_v41 = vsel %vm353_vm1, %v7045_v29, -inf }
 0x2d9   : > { %2633 = vmax.xlane.f32.xlu0 %v2632_v56  ;;  %v7043_v27 = vpop.f32.mrf.mxu0  ;;  %v7053_v37 = vpop.f32.mrf.mxu1 }
 0x2da   : > { %v2674_v48 = vsel %vm353_vm1, %v7043_v27, -inf }
 0x2db   : > { %2636 = vmax.xlane.f32.xlu1 %v2635_v59  ;;  %v7051_v36 = vpop.f32.mrf.mxu0  ;;  %v7059_v43 = vpop.f32.mrf.mxu1  ;;  %v2698_v59 = vsel %vm353_vm1, %v7053_v37, -inf }
 0x2dc   : > { %v2683_v40 = vsel %vm353_vm1, %v7051_v36, -inf  ;;  %v2707_v45 = vsel %vm353_vm1, %v7059_v43, -inf }
 0x2dd   : > { %2657 = vmax.xlane.f32.xlu0 %v2656_v60  ;;  %v7063_v46 = vpop.f32.mrf.mxu0  ;;  %v7071_v56 = vpop.f32.mrf.mxu1 }
 0x2de   : > { %v2677_v55 = vsel %vm353_vm1, %v7063_v46, -inf }
 0x2df   : > { %2660 = vmax.xlane.f32.xlu1 %v2659_v62  ;;  %v7067_v50 = vpop.f32.mrf.mxu0  ;;  %v7077_v62 = vpop.f32.mrf.mxu1 }
 0x2e1   : > { %2627 = vmax.xlane.f32.xlu0 %v2626_v0  ;;  %v7075_v60 = vpop.f32.mrf.mxu0  ;;  %v2701_v0 = vsel %vm353_vm1, %v7071_v56, -inf }
 0x2e3   : > { %2630 = vmax.xlane.f32.xlu1 %v2629_v1  ;;  %v2692_v1 = vsel %vm353_vm1, %v7067_v50, -inf }
 0x2e5   : > { %2651 = vmax.xlane.f32.xlu0 %v2650_v2  ;;  %v7083_v2 = vpop.f32.mrf.mxu0 }
 0x2e7   : > { %2654 = vmax.xlane.f32.xlu1 %v2653_v5  ;;  %v7085_v5 = vpop.f32.mrf.mxu1 }
 0x2e8   : > { %7763 = vst [vmem:[#allocation7_spill] sm:$0xff] %v7085_v5 }
 0x2e9   : > { %2645 = vmax.xlane.f32.xlu0 %v2644_v6  ;;  %v2695_v6 = vsel %vm353_vm1, %v7083_v2, -inf }
 0x2eb   : > { %2648 = vmax.xlane.f32.xlu1 %v2647_v11  ;;  %v2716_v11 = vsel %vm353_vm1, %v7077_v62, -inf }
 0x2ed   : > { %2669 = vmax.xlane.f32.xlu0 %v2668_v12  ;;  %v7091_v12 = vpop.f32.mrf.mxu1 }
 0x2ef   : > { %2672 = vmax.xlane.f32.xlu1 %v2671_v14  ;;  %v2719_v14 = vsel %vm353_vm1, %v7091_v12, -inf }
 0x2f1   : > { %2639 = vmax.xlane.f32.xlu0 %v2638_v16  ;;  %v7095_v16 = vpop.f32.mrf.mxu0 }
 0x2f3   : > { %2642 = vmax.xlane.f32.xlu1 %v2641_v18  ;;  %v2686_v18 = vsel %vm353_vm1, %v7075_v60, -inf }
 0x2f5   : > { %2663 = vmax.xlane.f32.xlu0 %v2662_v24  ;;  %v7099_v24 = vpop.f32.mrf.mxu0 }
 0x2f6   : > { %7764 = vst [vmem:[#allocation8_spill] sm:$0xff] %v7099_v24 }
 0x2f7   : > { %2666 = vmax.xlane.f32.xlu1 %v2665_v32  ;;  %v2689_v32 = vsel %vm353_vm1, %v7095_v16, -inf }
 0x2f9   : > { %2681 = vmax.xlane.f32.xlu0 %v2680_v33  ;;  %v7103_v33 = vpop.f32.mrf.mxu1 }
 0x2fa   : > { %7765 = vst [vmem:[#allocation9_spill] sm:$0xff] %v7103_v33 }
 0x2fb   : > { %2684 = vmax.xlane.f32.xlu1 %v2683_v40  ;;  %v2710_v40 = vsel %vm353_vm1, %v7085_v5, -inf }
 0x2fd   : > { %2705 = vmax.xlane.f32.xlu0 %v2704_v41  ;;  %v7107_v41 = vpop.f32.mrf.mxu0 }
 0x2fe   : > { %7766 = vst [vmem:[#allocation10_spill] sm:$0xff] %v7107_v41 }
 0x2ff   : > { %2708 = vmax.xlane.f32.xlu1 %v2707_v45  ;;  %v7109_v45 = vpop.f32.mrf.mxu1 }
 0x300   : > { %7767 = vst [vmem:[#allocation11_spill] sm:$0xff] %v7109_v45 }
 0x301   : > { %2675 = vmax.xlane.f32.xlu0 %v2674_v48  ;;  %v2713_v48 = vsel %vm353_vm1, %v7103_v33, -inf }
 0x303   : > { %2678 = vmax.xlane.f32.xlu1 %v2677_v55  ;;  %v2728_v55 = vsel %vm353_vm1, %v7099_v24, -inf }
 0x305   : > { %2699 = vmax.xlane.f32.xlu0 %v2698_v59  ;;  %v7115_v59 = vpop.f32.mrf.mxu0 }
 0x306   : > { %7768 = vst [vmem:[#allocation12_spill] sm:$0xff] %v7115_v59 }
 0x307   : > { %2702 = vmax.xlane.f32.xlu1 %v2701_v0  ;;  %v7117_v0 = vpop.f32.mrf.mxu1 }
 0x308   : > { %7769 = vst [vmem:[#allocation13_spill] sm:$0xff] %v7117_v0 }
 0x309   : > { %2693 = vmax.xlane.f32.xlu0 %v2692_v1  ;;  %v2731_v1 = vsel %vm353_vm1, %v7115_v59, -inf }
 0x30b   : > { %2696 = vmax.xlane.f32.xlu1 %v2695_v6  ;;  %v2752_v6 = vsel %vm353_vm1, %v7109_v45, -inf }
 0x30d   : > { %2717 = vmax.xlane.f32.xlu0 %v2716_v11  ;;  %v7123_v11 = vpop.f32.mrf.mxu0 }
 0x30e   : > { %7770 = vst [vmem:[#allocation14_spill] sm:$0xff] %v7123_v11 }
 0x30f   : > { %2720 = vmax.xlane.f32.xlu1 %v2719_v14  ;;  %v7125_v14 = vpop.f32.mrf.mxu1 }
 0x310   : > { %7771 = vst [vmem:[#allocation15_spill] sm:$0xff] %v7125_v14 }
 0x311   : > { %2687 = vmax.xlane.f32.xlu0 %v2686_v18  ;;  %v2755_v18 = vsel %vm353_vm1, %v7125_v14, -inf }
 0x313   : > { %2690 = vmax.xlane.f32.xlu1 %v2689_v32  ;;  %v7129_v32 = vpop.f32.mrf.mxu0 }
 0x314   : > { %7772 = vst [vmem:[#allocation16_spill] sm:$0xff] %v7129_v32 }
 0x315   : > { %2711 = vmax.xlane.f32.xlu0 %v2710_v40  ;;  %v2722_v40 = vsel %vm353_vm1, %v7107_v41, -inf }
 0x317   : > { %2714 = vmax.xlane.f32.xlu1 %v2713_v48  ;;  %v7133_v48 = vpop.f32.mrf.mxu1 }
 0x318   : > { %7773 = vst [vmem:[#allocation17_spill] sm:$0xff] %v7133_v48 }
 0x319   : > { %2729 = vmax.xlane.f32.xlu0 %v2728_v55  ;;  %v2725_v55 = vsel %vm353_vm1, %v7123_v11, -inf  ;;  %v7139_v45 = vpop.f32.mrf.mxu1 }
 0x31a   : > { %7775 = vst [vmem:[#allocation19_spill] sm:$0xff] %v7139_v45 }
 0x31b   : > { %2732 = vmax.xlane.f32.xlu1 %v2731_v1  ;;  %v7137_v1 = vpop.f32.mrf.mxu0  ;;  %v7147_v41 = vpop.f32.mrf.mxu1 }
 0x31c   : > { %7774 = vst [vmem:[#allocation18_spill] sm:$0xff] %v7137_v1  ;;  %7777 = vst [vmem:[#allocation21_spill] sm:$0xff] %v7147_v41 }
 0x31d   : > { %2753 = vmax.xlane.f32.xlu0 %v2752_v6  ;;  %v2746_v6 = vsel %vm353_vm1, %v7117_v0, -inf  ;;  %v7145_v14 = vpop.f32.mrf.mxu0  ;;  %v7155_v59 = vpop.f32.mrf.mxu1 }
 0x31e   : > { %7776 = vst [vmem:[#allocation20_spill] sm:$0xff] %v7145_v14  ;;  %v2743_v11 = vsel %vm353_vm1, %v7145_v14, -inf  ;;  %7779 = vst [vmem:[#allocation23_spill] sm:$0xff] %v7155_v59 }
 0x31f   : > { %2756 = vmax.xlane.f32.xlu1 %v2755_v18  ;;  %v2749_v18 = vsel %vm353_vm1, %v7133_v48, -inf }
 0x321   : > { %2723 = vmax.xlane.f32.xlu0 %v2722_v40  ;;  %v2740_v40 = vsel %vm353_vm1, %v7129_v32, -inf }
 0x323   : > { %2726 = vmax.xlane.f32.xlu1 %v2725_v55  ;;  %v7153_v55 = vpop.f32.mrf.mxu0 }
 0x324   : > { %7778 = vst [vmem:[#allocation22_spill] sm:$0xff] %v7153_v55  ;;  %v2737_v48 = vsel %vm353_vm1, %v7153_v55, -inf }
 0x325   : > { %2747 = vmax.xlane.f32.xlu0 %v2746_v6  ;;  %v2734_v6 = vsel %vm353_vm1, %v7137_v1, -inf }
 0x327   : > { %2750 = vmax.xlane.f32.xlu1 %v2749_v18  ;;  %v7161_v18 = vpop.f32.mrf.mxu1 }
 0x328   : > { %7780 = vst [vmem:[#allocation24_spill] sm:$0xff] %v7161_v18  ;;  %v2761_v14 = vsel %vm353_vm1, %v7161_v18, -inf }
 0x329   : > { %2741 = vmax.xlane.f32.xlu0 %v2740_v40  ;;  %v2758_v40 = vsel %vm353_vm1, %v7147_v41, -inf }
 0x32b   : > { %2744 = vmax.xlane.f32.xlu1 %v2743_v11  ;;  %v2764_v11 = vsel %vm353_vm1, %v7139_v45, -inf }
 0x32d   : > { %2735 = vmax.xlane.f32.xlu0 %v2734_v6  ;;  %v2767_v6 = vsel %vm353_vm1, %v7155_v59, -inf }
 0x32f   : > { %2738 = vmax.xlane.f32.xlu1 %v2737_v48 }
 0x331   : > { %2759 = vmax.xlane.f32.xlu0 %v2758_v40 }
 0x333   : > { %2762 = vmax.xlane.f32.xlu1 %v2761_v14 }
 0x335   : > { %2765 = vmax.xlane.f32.xlu0 %v2764_v11 }
 0x337   : > { %2768 = vmax.xlane.f32.xlu1 %v2767_v6 }
 0x342   : > { %v2586_v55 = vpop.xlane.xlu0 %2585 }
 0x343   : > { %v2772_v48 = vsub.f32 %v6915_v19, %v2586_v55 }
 0x344   : > { %v2604_v1 = vpop.xlane.xlu1 %2603 }
 0x345   : > { %v2778_v41 = vsub.f32 %v6921_v22, %v2604_v1  ;;  %v2838_v18 = vmul.f32 1.442695, %v2772_v48 }
 0x346   : > { %v2610_v32 = vpop.xlane.xlu0 %2609 }
 0x347   : > { %v2780_v40 = vsub.f32 %v6917_v20, %v2610_v32  ;;  %v2850_v11 = vmul.f32 1.442695, %v2778_v41 }
 0x348   : > { %v2589_v0 = vpop.xlane.xlu1 %2588 }
 0x349   : > { %v2854_v14 = vmul.f32 1.442695, %v2780_v40  ;;  %v2773_v24 = vsub.f32 %v6927_v25, %v2589_v0 }
 0x34a   : > { %v2580_v45 = vpop.xlane.xlu0 %2579 }
 0x34b   : > { %5968 = vpow2.f32 %v2854_v14  ;;  %v2770_v59 = vsub.f32 %v6923_v23, %v2580_v45  ;;  %v2840_v6 = vmul.f32 1.442695, %v2773_v24 }
 0x34c   : > { %v2613_v33 = vpop.xlane.xlu1 %2612  ;;  %5970 = vpow2.f32 %v2838_v18 }
 0x34d   : > { %v2781_v19 = vsub.f32 %v6929_v26, %v2613_v33  ;;  %v2834_v55 = vmul.f32 1.442695, %v2770_v59  ;;  %5972 = vpow2.f32 %v2850_v11 }
 0x34e   : > { %v2583_v5 = vpop.xlane.xlu0 %2582  ;;  %5974 = vpow2.f32 %v2840_v6 }
 0x34f   : > { %v2856_v22 = vmul.f32 1.442695, %v2781_v19  ;;  %v2771_v20 = vsub.f32 %v6933_v28, %v2583_v5 }
 0x350   : > { %v2607_v32 = vpop.xlane.xlu1 %2606 }
 0x351   : > { %5976 = vpow2.f32 %v2856_v22  ;;  %v2836_v25 = vmul.f32 1.442695, %v2771_v20  ;;  %v2779_v41 = vsub.f32 %v6937_v30, %v2607_v32 }
 0x352   : > { %5978 = vpow2.f32 %v2834_v55  ;;  %v2598_v0 = vpop.xlane.xlu0 %2597 }
 0x353   : > { %5980 = vpow2.f32 %v2836_v25  ;;  %v2852_v23 = vmul.f32 1.442695, %v2779_v41  ;;  %v2776_v26 = vsub.f32 %v6939_v31, %v2598_v0 }
 0x354   : > { %v2601_v24 = vpop.xlane.xlu1 %2600 }
 0x355   : > { %5982 = vpow2.f32 %v2852_v23  ;;  %v2777_v33 = vsub.f32 %v6955_v39, %v2601_v24  ;;  %v2846_v1 = vmul.f32 1.442695, %v2776_v26 }
 0x356   : > { %v2622_v45 = vpop.xlane.xlu0 %2621 }
 0x357   : > { %v2784_v59 = vsub.f32 %v6945_v34, %v2622_v45  ;;  %v2848_v14 = vmul.f32 1.442695, %v2777_v33 }
 0x358   : > { %v7182_v28 = vpop.eup %5968  ;;  %v2625_v5 = vpop.xlane.xlu1 %2624 }
 0x359   : > { %v2862_v18 = vmul.f32 1.442695, %v2784_v59  ;;  %v2785_v30 = vsub.f32 %v6961_v42, %v2625_v5  ;;  %v2992_v48 = vsel %vm353_vm1, %v7182_v28, 0.0  ;;  %v5971_v40 = vpop.eup %5970 }
 0x35a   : > { %v2592_v11 = vpop.xlane.xlu0 %2591  ;;  %2993 = vadd.xlane.f32.xlu0 %v2992_v48  ;;  %v5973_v6 = vpop.eup %5972  ;;  %v2968_v42 = vsel %vm353_vm1, %v5971_v40, 0.0 }
 0x35b   : > { %5984 = vpow2.f32 %v2862_v18  ;;  %v2864_v31 = vmul.f32 1.442695, %v2785_v30  ;;  %v2774_v39 = vsub.f32 %v6947_v35, %v2592_v11  ;;  %v5975_v19 = vpop.eup %5974  ;;  %v2986_v26 = vsel %vm353_vm1, %v5973_v6, 0.0 }
 0x35c   : > { %v2595_v34 = vpop.xlane.xlu1 %2594  ;;  %5986 = vpow2.f32 %v2846_v1  ;;  %v3155_v5 = vpack.c.bf16 %v5975_v19, %v5971_v40 }
 0x35d   : > { %v2842_v55 = vmul.f32 1.442695, %v2774_v39  ;;  %v2775_v22 = vsub.f32 %v6965_v44, %v2595_v34  ;;  %5988 = vpow2.f32 %v2848_v14  ;;  %v3367_v14 = vsel %vm353_vm1, %v6903_v9, 0  ;;  %v7214_v34 = vld [vmem:[#allocation3 + $0x14] sm:$0xf] }
 0x35e   : > { %v5977_v20 = vpop.eup %5976  ;;  %v2616_v32 = vpop.xlane.xlu0 %2615  ;;  %2969 = vadd.xlane.f32.xlu0 %v2968_v42  ;;  %5990 = vpow2.f32 %v2864_v31  ;;  %v7202_v31 = vld [vmem:[#allocation3 + $0x10] sm:$0xf] }
 0x35f   : > { %v5979_v25 = vpop.eup %5978  ;;  %v2844_v41 = vmul.f32 1.442695, %v2775_v22  ;;  %v2782_v0 = vsub.f32 %v6953_v38, %v2616_v32  ;;  %5992 = vpow2.f32 %v2842_v55  ;;  %v2995_v24 = vsel %vm353_vm1, %v5977_v20, 0.0 }
 0x360   : > { %v5981_v23 = vpop.eup %5980  ;;  %v2619_v35 = vpop.xlane.xlu1 %2618  ;;  %2996 = vadd.xlane.f32.xlu1 %v2995_v24  ;;  %v3159_v11 = vpack.c.bf16 %v5977_v20, %v7182_v28  ;;  %v2962_v9 = vsel %vm353_vm1, %v5979_v25, 0.0  ;;  %v3447_v28 = vsel %vm353_vm1, %v6905_v10, 0 }
 0x361   : > { %5994 = vpow2.f32 %v2844_v41  ;;  %v2858_v44 = vmul.f32 1.442695, %v2782_v0  ;;  %v2783_v33 = vsub.f32 %v6975_v49, %v2619_v35  ;;  %v3154_v45 = vpack.c.bf16 %v5981_v23, %v5979_v25 }
 0x362   : > { %v5983_v59 = vpop.eup %5982  ;;  %v2634_v1 = vpop.xlane.xlu0 %2633  ;;  %2987 = vadd.xlane.f32.xlu0 %v2986_v26  ;;  %v2971_v49 = vsel %vm353_vm1, %v5975_v19, 0.0  ;;  %v2965_v24 = vsel %vm353_vm1, %v5981_v23, 0.0 }
 0x363   : > { %5996 = vpow2.f32 %v2858_v44  ;;  %v2860_v18 = vmul.f32 1.442695, %v2783_v33  ;;  %v2788_v38 = vsub.f32 %v6971_v47, %v2634_v1  ;;  %5695 = vmatprep.mubr.msk.bf16.mxu0 %vm353_vm1, %v3154_v45  ;;  %v3158_v30 = vpack.c.bf16 %v5983_v59, %v5973_v6 }
 0x364   : > { %v2637_v48 = vpop.xlane.xlu1 %2636  ;;  %5696 = vmatmul.mubr.msk.bf16.vlgmr.msra.gmra.mxu0 %vm353_vm1, %v3155_v5  ;;  %2972 = vadd.xlane.f32.xlu1 %v2971_v49  ;;  %v2989_v55 = vsel %vm353_vm1, %v5983_v59, 0.0 }
 0x365   : > { %5998 = vpow2.f32 %v2860_v18  ;;  %v2789_v40 = vsub.f32 %v6987_v57, %v2637_v48  ;;  %5714 = vmatpush3.bf16.xpose.msra.mxu0 %v3367_v14  ;;  %v2870_v47 = vmul.f32 1.442695, %v2788_v38  ;;  %5705 = vmatprep.mubr.msk.bf16.mxu1 %vm353_vm1, %v3158_v30 }
 0x366   : > { %5865 = vmatprep.subr.msk.bf16.mxu0 %vm353_vm1, %v7202_v31  ;;  %v2658_v39 = vpop.xlane.xlu0 %2657  ;;  %5706 = vmatmul.mubr.msk.bf16.vlgmr.msra.gmra.mxu1 %vm353_vm1, %v3159_v11 }
 0x367   : > { %v2796_v57 = vsub.f32 %v6981_v54, %v2658_v39  ;;  %2963 = vadd.xlane.f32.xlu0 %v2962_v9  ;;  %5724 = vmatpush3.bf16.xpose.msra.mxu1 %v3447_v28  ;;  %v2872_v22 = vmul.f32 1.442695, %v2789_v40  ;;  %6000 = vpow2.f32 %v2870_v47 }
 0x368   : > { %v7212_v6 = vpop.eup %5984  ;;  %v2661_v19 = vpop.xlane.xlu1 %2660  ;;  %5866 = vmatprep.subr.msk.bf16.mxu1 %vm353_vm1, %v7214_v34  ;;  %2990 = vadd.xlane.f32.xlu1 %v2989_v55 }
 0x369   : > { %v3004_v42 = vsel %vm353_vm1, %v7212_v6, 0.0  ;;  %v5987_v10 = vpop.eup %5986  ;;  %v2886_v54 = vmul.f32 1.442695, %v2796_v57  ;;  %v2797_v25 = vsub.f32 %v6995_v61, %v2661_v19  ;;  %6002 = vpow2.f32 %v2872_v22 }
 0x36a   : > { %v2628_v20 = vpop.xlane.xlu0 %2627  ;;  %v5989_v32 = vpop.eup %5988  ;;  %v2980_v5 = vsel %vm353_vm1, %v5987_v10, 0.0 }
 0x36b   : > { %v2786_v41 = vsub.f32 %v6979_v53, %v2628_v20  ;;  %3005 = vadd.xlane.f32.xlu0 %v3004_v42  ;;  %v5991_v0 = vpop.eup %5990  ;;  %6004 = vpow2.f32 %v2886_v54  ;;  %v2888_v1 = vmul.f32 1.442695, %v2797_v25  ;;  %v3157_v48 = vpack.c.bf16 %v5989_v32, %v5987_v10 }
 0x36c   : > { %v2631_v35 = vpop.xlane.xlu1 %2630  ;;  %v5993_v26 = vpop.eup %5992  ;;  %2966 = vadd.xlane.f32.xlu1 %v2965_v24  ;;  %v3007_v30 = vsel %vm353_vm1, %v5991_v0, 0.0  ;;  %v2983_v28 = vsel %vm353_vm1, %v5989_v32, 0.0 }
 0x36d   : > { %v2866_v44 = vmul.f32 1.442695, %v2786_v41  ;;  %v2787_v33 = vsub.f32 %v6999_v63, %v2631_v35 }
 0x36e   : > { %v5995_v45 = vpop.eup %5994  ;;  %v2652_v59 = vpop.xlane.xlu0 %2651 }
 0x36f   : > { %v2868_v61 = vmul.f32 1.442695, %v2787_v33  ;;  %v2794_v53 = vsub.f32 %v6989_v58, %v2652_v59  ;;  %2981 = vadd.xlane.f32.xlu0 %v2980_v5  ;;  %v3156_v18 = vpack.c.bf16 %v5995_v45, %v5993_v26  ;;  %6006 = vpow2.f32 %v2866_v44 }
 0x370   : > { %v5997_v38 = vpop.eup %5996  ;;  %v2655_v23 = vpop.xlane.xlu1 %2654  ;;  %3008 = vadd.xlane.f32.xlu1 %v3007_v30 }
 0x371   : > { %6008 = vpow2.f32 %v2868_v61  ;;  %v2882_v63 = vmul.f32 1.442695, %v2794_v53  ;;  %v2795_v14 = vsub.f32 %v7007_v52, %v2655_v23  ;;  %5699 = vmatprep.mubr.msk.bf16.mxu0 %vm353_vm1, %v3156_v18  ;;  %v2998_v49 = vsel %vm353_vm1, %v5997_v38, 0.0 }
 0x372   : > { %v5999_v11 = vpop.eup %5998  ;;  %v2646_v40 = vpop.xlane.xlu0 %2645  ;;  %5700 = vmatmul.mubr.msk.bf16.gmra.mxu0 %vm353_vm1, %v3157_v48  ;;  %6010 = vpow2.f32 %v2888_v1  ;;  %v3161_v52 = vpack.c.bf16 %v5991_v0, %v7212_v6 }
 0x373   : > { %v2884_v58 = vmul.f32 1.442695, %v2795_v14  ;;  %v2792_v47 = vsub.f32 %v7003_v51, %v2646_v40  ;;  %2999 = vadd.xlane.f32.xlu0 %v2998_v49  ;;  %v3160_v39 = vpack.c.bf16 %v5999_v11, %v5997_v38  ;;  %6012 = vpow2.f32 %v2882_v63 }
 0x374   : > { %v2649_v9 = vpop.xlane.xlu1 %2648  ;;  %2984 = vadd.xlane.f32.xlu1 %v2983_v28  ;;  %v2974_v51 = vsel %vm353_vm1, %v5993_v26, 0.0  ;;  %v6001_v22 = vpop.eup %6000  ;;  %v3001_v54 = vsel %vm353_vm1, %v5999_v11, 0.0  ;;  %v3607_v28 = vsel %vm353_vm1, %v7214_v34, 0 }
 0x375   : > { %6014 = vpow2.f32 %v2884_v58  ;;  %v2793_v57 = vsub.f32 %v7019_v7, %v2649_v9  ;;  %5709 = vmatprep.mubr.msk.bf16.mxu1 %vm353_vm1, %v3160_v39  ;;  %v2878_v19 = vmul.f32 1.442695, %v2792_v47  ;;  %v3016_v25 = vsel %vm353_vm1, %v6001_v22, 0.0  ;;  %v7256_v58 = vld [vmem:[#allocation3 + $0x18] sm:$0xf] }
 0x376   : > { %5710 = vmatmul.mubr.msk.bf16.gmra.mxu1 %vm353_vm1, %v3161_v52  ;;  %v2670_v55 = vpop.xlane.xlu0 %2669  ;;  %v6003_v20 = vpop.eup %6002 }
 0x377   : > { %v2800_v42 = vsub.f32 %v7013_v4, %v2670_v55  ;;  %2975 = vadd.xlane.f32.xlu0 %v2974_v51  ;;  %v2880_v6 = vmul.f32 1.442695, %v2793_v57  ;;  %6016 = vpow2.f32 %v2878_v19  ;;  %v2977_v4 = vsel %vm353_vm1, %v5995_v45, 0.0  ;;  %v7268_v51 = vld [vmem:[#allocation3 + $0x1c] sm:$0xf] }
 0x378   : > { %v2673_v10 = vpop.xlane.xlu1 %2672  ;;  %3002 = vadd.xlane.f32.xlu1 %v3001_v54  ;;  %v6005_v41 = vpop.eup %6004  ;;  %v3163_v38 = vpack.c.bf16 %v6003_v20, %v6001_v22  ;;  %v3019_v23 = vsel %vm353_vm1, %v6003_v20, 0.0 }
 0x379   : > { %v2894_v7 = vmul.f32 1.442695, %v2800_v42  ;;  %v2801_v0 = vsub.f32 %v7027_v13, %v2673_v10  ;;  %6018 = vpow2.f32 %v2880_v6  ;;  %v3040_v1 = vsel %vm353_vm1, %v6005_v41, 0.0 }
 0x37a   : > { %v2640_v32 = vpop.xlane.xlu0 %2639 }
 0x37b   : > { %v2790_v35 = vsub.f32 %v7011_v3, %v2640_v32  ;;  %3017 = vadd.xlane.f32.xlu0 %v3016_v25  ;;  %6020 = vpow2.f32 %v2894_v7  ;;  %v2896_v61 = vmul.f32 1.442695, %v2801_v0 }
 0x37c   : > { %v2643_v24 = vpop.xlane.xlu1 %2642  ;;  %v6007_v26 = vpop.eup %6006  ;;  %2978 = vadd.xlane.f32.xlu1 %v2977_v4 }
 0x37d   : > { %v2874_v44 = vmul.f32 1.442695, %v2790_v35  ;;  %v2791_v33 = vsub.f32 %v7031_v15, %v2643_v24  ;;  %v3010_v49 = vsel %vm353_vm1, %v6007_v26, 0.0 }
 0x37e   : > { %v6009_v59 = vpop.eup %6008  ;;  %v2664_v5 = vpop.xlane.xlu0 %2663 }
 0x37f   : > { %v2876_v53 = vmul.f32 1.442695, %v2791_v33  ;;  %v2798_v13 = vsub.f32 %v7021_v8, %v2664_v5  ;;  %3041 = vadd.xlane.f32.xlu0 %v3040_v1  ;;  %v3162_v3 = vpack.c.bf16 %v6009_v59, %v6007_v26  ;;  %v6011_v18 = vpop.eup %6010  ;;  %6022 = vpow2.f32 %v2874_v44 }
 0x380   : > { %v2667_v45 = vpop.xlane.xlu1 %2666  ;;  %v6013_v30 = vpop.eup %6012  ;;  %3020 = vadd.xlane.f32.xlu1 %v3019_v23  ;;  %v3527_v8 = vsel %vm353_vm1, %v7202_v31, 0  ;;  %v3167_v47 = vpack.c.bf16 %v6011_v18, %v6005_v41  ;;  %v3043_v9 = vsel %vm353_vm1, %v6011_v18, 0.0  ;;  %v3013_v22 = vsel %vm353_vm1, %v6009_v59, 0.0 }
 0x381   : > { %6024 = vpow2.f32 %v2876_v53  ;;  %v2890_v15 = vmul.f32 1.442695, %v2798_v13  ;;  %v2799_v48 = vsub.f32 %v7039_v21, %v2667_v45  ;;  %5715 = vmatprep.mubr.msk.bf16.mxu0 %vm353_vm1, %v3162_v3  ;;  %v3034_v57 = vsel %vm353_vm1, %v6013_v30, 0.0 }
 0x382   : > { %v6015_v63 = vpop.eup %6014  ;;  %v2682_v14 = vpop.xlane.xlu0 %2681  ;;  %5716 = vmatmul.mubr.msk.bf16.vlgmr.msra.gmra.mxu0 %vm353_vm1, %v3163_v38  ;;  %6026 = vpow2.f32 %v2896_v61 }
 0x383   : > { %v2892_v11 = vmul.f32 1.442695, %v2799_v48  ;;  %v2804_v40 = vsub.f32 %v7035_v17, %v2682_v14  ;;  %5734 = vmatpush3.bf16.xpose.msra.mxu0 %v3527_v8  ;;  %3011 = vadd.xlane.f32.xlu0 %v3010_v49  ;;  %v3166_v21 = vpack.c.bf16 %v6015_v63, %v6013_v30  ;;  %6028 = vpow2.f32 %v2890_v15 }
 0x384   : > { %5867 = vmatprep.subr.msk.bf16.mxu0 %vm353_vm1, %v7256_v58  ;;  %v2685_v39 = vpop.xlane.xlu1 %2684  ;;  %3044 = vadd.xlane.f32.xlu1 %v3043_v9  ;;  %v6017_v19 = vpop.eup %6016  ;;  %v3037_v25 = vsel %vm353_vm1, %v6015_v63, 0.0 }
 0x385   : > { %6030 = vpow2.f32 %v2892_v11  ;;  %v2805_v31 = vsub.f32 %v7051_v36, %v2685_v39  ;;  %5725 = vmatprep.mubr.msk.bf16.mxu1 %vm353_vm1, %v3166_v21  ;;  %v2902_v17 = vmul.f32 1.442695, %v2804_v40  ;;  %v3028_v6 = vsel %vm353_vm1, %v6017_v19, 0.0 }
 0x386   : > { %5726 = vmatmul.mubr.msk.bf16.vlgmr.msra.gmra.mxu1 %vm353_vm1, %v3167_v47  ;;  %v2706_v52 = vpop.xlane.xlu0 %2705  ;;  %v6019_v10 = vpop.eup %6018 }
 0x387   : > { %5744 = vmatpush3.bf16.xpose.msra.mxu1 %v3607_v28  ;;  %v2812_v55 = vsub.f32 %v7045_v29, %v2706_v52  ;;  %3035 = vadd.xlane.f32.xlu0 %v3034_v57  ;;  %v2904_v42 = vmul.f32 1.442695, %v2805_v31  ;;  %6032 = vpow2.f32 %v2902_v17  ;;  %v3031_v1 = vsel %vm353_vm1, %v6019_v10, 0.0 }
 0x388   : > { %5868 = vmatprep.subr.msk.bf16.mxu1 %vm353_vm1, %v7268_v51  ;;  %v2709_v36 = vpop.xlane.xlu1 %2708  ;;  %3014 = vadd.xlane.f32.xlu1 %v3013_v22  ;;  %v6021_v20 = vpop.eup %6020  ;;  %v3165_v61 = vpack.c.bf16 %v6019_v10, %v6017_v19 }
 0x389   : > { %v2918_v34 = vmul.f32 1.442695, %v2812_v55  ;;  %v2813_v29 = vsub.f32 %v7059_v43, %v2709_v36  ;;  %6034 = vpow2.f32 %v2904_v42  ;;  %v3052_v26 = vsel %vm353_vm1, %v6021_v20, 0.0 }
 0x38a   : > { %v2676_v54 = vpop.xlane.xlu0 %2675 }
 0x38b   : > { %v2802_v7 = vsub.f32 %v7043_v27, %v2676_v54  ;;  %3029 = vadd.xlane.f32.xlu0 %v3028_v6  ;;  %6036 = vpow2.f32 %v2918_v34  ;;  %v2920_v44 = vmul.f32 1.442695, %v2813_v29 }
 0x38c   : > { %v2679_v32 = vpop.xlane.xlu1 %2678  ;;  %v6023_v41 = vpop.eup %6022  ;;  %3038 = vadd.xlane.f32.xlu1 %v3037_v25  ;;  %v7782_v25 = vld [vmem:[#allocation9_spill] sm:$0xff] }
 0x38d   : > { %v2898_v0 = vmul.f32 1.442695, %v2802_v7  ;;  %v2803_v35 = vsub.f32 %v7063_v46, %v2679_v32 }
 0x38e   : > { %v6025_v24 = vpop.eup %6024  ;;  %v2700_v4 = vpop.xlane.xlu0 %2699 }
 0x38f   : > { %v2900_v33 = vmul.f32 1.442695, %v2803_v35  ;;  %v2810_v43 = vsub.f32 %v7053_v37, %v2700_v4  ;;  %3053 = vadd.xlane.f32.xlu0 %v3052_v26  ;;  %v3164_v27 = vpack.c.bf16 %v6025_v24, %v6023_v41  ;;  %v6027_v59 = vpop.eup %6026  ;;  %6038 = vpow2.f32 %v2898_v0 }
 0x390   : > { %v2703_v5 = vpop.xlane.xlu1 %2702  ;;  %v6029_v53 = vpop.eup %6028  ;;  %3032 = vadd.xlane.f32.xlu1 %v3031_v1  ;;  %v3022_v37 = vsel %vm353_vm1, %v6023_v41, 0.0  ;;  %v3055_v15 = vsel %vm353_vm1, %v6027_v59, 0.0  ;;  %v3025_v40 = vsel %vm353_vm1, %v6025_v24, 0.0  ;;  %v3687_v24 = vsel %vm353_vm1, %v7256_v58, 0  ;;  %v7784_v1 = vld [vmem:[#allocation12_spill] sm:$0xff] }
 0x391   : > { %6040 = vpow2.f32 %v2900_v33  ;;  %v2914_v46 = vmul.f32 1.442695, %v2810_v43  ;;  %v2811_v13 = vsub.f32 %v7071_v56, %v2703_v5  ;;  %5719 = vmatprep.mubr.msk.bf16.mxu0 %vm353_vm1, %v3164_v27  ;;  %v3169_v56 = vpack.c.bf16 %v6027_v59, %v6021_v20 }
 0x392   : > { %v6031_v3 = vpop.eup %6030  ;;  %v2694_v18 = vpop.xlane.xlu0 %2693  ;;  %5720 = vmatmul.mubr.msk.bf16.gmra.mxu0 %vm353_vm1, %v3165_v61  ;;  %6042 = vpow2.f32 %v2920_v44  ;;  %v3046_v8 = vsel %vm353_vm1, %v6029_v53, 0.0  ;;  %v7783_v44 = vld [vmem:[#allocation8_spill] sm:$0xff] }
 0x393   : > { %v2916_v38 = vmul.f32 1.442695, %v2811_v13  ;;  %v2808_v45 = vsub.f32 %v7067_v50, %v2694_v18  ;;  %3023 = vadd.xlane.f32.xlu0 %v3022_v37  ;;  %v3168_v23 = vpack.c.bf16 %v6031_v3, %v6029_v53  ;;  %6044 = vpow2.f32 %v2914_v46  ;;  %v7785_v18 = vld [vmem:[#allocation11_spill] sm:$0xff] }
 0x394   : > { %v2697_v30 = vpop.xlane.xlu1 %2696  ;;  %3056 = vadd.xlane.f32.xlu1 %v3055_v15  ;;  %v6033_v50 = vpop.eup %6032  ;;  %v3767_v53 = vsel %vm353_vm1, %v7268_v51, 0 }
 0x395   : > { %6046 = vpow2.f32 %v2916_v38  ;;  %v2809_v48 = vsub.f32 %v7083_v2, %v2697_v30  ;;  %5729 = vmatprep.mubr.msk.bf16.mxu1 %vm353_vm1, %v3168_v23  ;;  %v2910_v63 = vmul.f32 1.442695, %v2808_v45  ;;  %v3064_v9 = vsel %vm353_vm1, %v6033_v50, 0.0 }
 0x396   : > { %5730 = vmatmul.mubr.msk.bf16.gmra.mxu1 %vm353_vm1, %v3169_v56  ;;  %v2718_v14 = vpop.xlane.xlu0 %2717  ;;  %v6035_v47 = vpop.eup %6034 }
 0x397   : > { %v2816_v49 = vsub.f32 %v7077_v62, %v2718_v14  ;;  %3047 = vadd.xlane.f32.xlu0 %v3046_v8  ;;  %v2912_v21 = vmul.f32 1.442695, %v2809_v48  ;;  %6048 = vpow2.f32 %v2910_v63  ;;  %v3049_v62 = vsel %vm353_vm1, %v6031_v3, 0.0  ;;  %v7786_v63 = vld [vmem:[#allocation15_spill] sm:$0xff]  ;;  %v7787_v8 = vld [vmem:[#allocation10_spill] sm:$0xff] }
 0x398   : > { %v2721_v11 = vpop.xlane.xlu1 %2720  ;;  %3026 = vadd.xlane.f32.xlu1 %v3025_v40  ;;  %v6037_v31 = vpop.eup %6036  ;;  %v3171_v20 = vpack.c.bf16 %v6035_v47, %v6033_v50  ;;  %v3067_v7 = vsel %vm353_vm1, %v6035_v47, 0.0  ;;  %v7788_v47 = vld [vmem:[#allocation14_spill] sm:$0xff] }
 0x399   : > { %v2926_v2 = vmul.f32 1.442695, %v2816_v49  ;;  %v2817_v17 = vsub.f32 %v7091_v12, %v2721_v11  ;;  %6050 = vpow2.f32 %v2912_v21  ;;  %v3088_v42 = vsel %vm353_vm1, %v6037_v31, 0.0  ;;  %v7781_v12 = vld [vmem:[#allocation7_spill] sm:$0xff] }
 0x39a   : > { %v2688_v39 = vpop.xlane.xlu0 %2687 }
 0x39b   : > { %v2806_v28 = vsub.f32 %v7075_v60, %v2688_v39  ;;  %3065 = vadd.xlane.f32.xlu0 %v3064_v9  ;;  %6052 = vpow2.f32 %v2926_v2  ;;  %v2928_v10 = vmul.f32 1.442695, %v2817_v17  ;;  %v7325_v39 = vld [vmem:[%s7740_s5] sm:$0xf] }
 0x39c   : > { %v2691_v52 = vpop.xlane.xlu1 %2690  ;;  %v6039_v57 = vpop.eup %6038  ;;  %3050 = vadd.xlane.f32.xlu1 %v3049_v62  ;;  %v7789_v62 = vld [vmem:[#allocation13_spill] sm:$0xff] }
 0x39d   : > { %v2906_v19 = vmul.f32 1.442695, %v2806_v28  ;;  %v2807_v55 = vsub.f32 %v7095_v16, %v2691_v52  ;;  %v3058_v4 = vsel %vm353_vm1, %v6039_v57, 0.0 }
 0x39e   : > { %v6041_v36 = vpop.eup %6040  ;;  %v2712_v22 = vpop.xlane.xlu0 %2711 }
 0x39f   : > { %v2908_v34 = vmul.f32 1.442695, %v2807_v55  ;;  %v2814_v54 = vsub.f32 %v7781_v12, %v2712_v22  ;;  %3089 = vadd.xlane.f32.xlu0 %v3088_v42  ;;  %v3170_v60 = vpack.c.bf16 %v6041_v36, %v6039_v57  ;;  %v6043_v6 = vpop.eup %6042  ;;  %6054 = vpow2.f32 %v2906_v19  ;;  %v7334_v55 = vld [vmem:[%s7740_s5 + $0x4] sm:$0xf] }
 0x3a0   : > { %v2715_v29 = vpop.xlane.xlu1 %2714  ;;  %v6045_v32 = vpop.eup %6044  ;;  %3068 = vadd.xlane.f32.xlu1 %v3067_v7  ;;  %v3175_v27 = vpack.c.bf16 %v6043_v6, %v6037_v31  ;;  %v3091_v5 = vsel %vm353_vm1, %v6043_v6, 0.0  ;;  %v3061_v45 = vsel %vm353_vm1, %v6041_v36, 0.0 }
 0x3a1   : > { %6056 = vpow2.f32 %v2908_v34  ;;  %v2922_v16 = vmul.f32 1.442695, %v2814_v54  ;;  %v2815_v41 = vsub.f32 %v7782_v25, %v2715_v29  ;;  %5735 = vmatprep.mubr.msk.bf16.mxu0 %vm353_vm1, %v3170_v60  ;;  %v3082_v13 = vsel %vm353_vm1, %v6045_v32, 0.0  ;;  %v7790_v54 = vld [vmem:[#allocation17_spill] sm:$0xff] }
 0x3a2   : > { %v6047_v0 = vpop.eup %6046  ;;  %v2730_v35 = vpop.xlane.xlu0 %2729  ;;  %5736 = vmatmul.mubr.msk.bf16.vlgmr.msra.gmra.mxu0 %vm353_vm1, %v3171_v20  ;;  %6058 = vpow2.f32 %v2928_v10 }
 0x3a3   : > { %v2924_v26 = vmul.f32 1.442695, %v2815_v41  ;;  %v2820_v33 = vsub.f32 %v7783_v44, %v2730_v35  ;;  %5754 = vmatpush3.bf16.xpose.msra.mxu0 %v3687_v24  ;;  %3059 = vadd.xlane.f32.xlu0 %v3058_v4  ;;  %v3174_v43 = vpack.c.bf16 %v6047_v0, %v6045_v32  ;;  %6060 = vpow2.f32 %v2922_v16  ;;  %v7791_v32 = vld [vmem:[#allocation16_spill] sm:$0xff] }
 0x3a4   : > { %v2733_v59 = vpop.xlane.xlu1 %2732  ;;  %3092 = vadd.xlane.f32.xlu1 %v3091_v5  ;;  %v6049_v3 = vpop.eup %6048  ;;  %v3085_v11 = vsel %vm353_vm1, %v6047_v0, 0.0  ;;  %5869 = vmatprep.subr.msk.bf16.mxu0 %vm1949_vm3, %v7334_v55  ;;  %v7792_v24 = vld [vmem:[#allocation20_spill] sm:$0xff] }
 0x3a5   : > { %6062 = vpow2.f32 %v2924_v26  ;;  %v2821_v61 = vsub.f32 %v7784_v1, %v2733_v59  ;;  %5745 = vmatprep.mubr.msk.bf16.mxu1 %vm353_vm1, %v3174_v43  ;;  %v2934_v58 = vmul.f32 1.442695, %v2820_v33  ;;  %v3076_v48 = vsel %vm353_vm1, %v6049_v3, 0.0  ;;  %v7793_v59 = vld [vmem:[#allocation18_spill] sm:$0xff] }
 0x3a6   : > { %5746 = vmatmul.mubr.msk.bf16.vlgmr.msra.gmra.mxu1 %vm353_vm1, %v3175_v27  ;;  %v2754_v46 = vpop.xlane.xlu0 %2753  ;;  %v6051_v30 = vpop.eup %6050 }
 0x3a7   : > { %5764 = vmatpush3.bf16.xpose.msra.mxu1 %v3767_v53  ;;  %v2828_v37 = vsub.f32 %v7785_v18, %v2754_v46  ;;  %3083 = vadd.xlane.f32.xlu0 %v3082_v13  ;;  %v2936_v23 = vmul.f32 1.442695, %v2821_v61  ;;  %6064 = vpow2.f32 %v2934_v58  ;;  %v3079_v42 = vsel %vm353_vm1, %v6051_v30, 0.0  ;;  %v7794_v53 = vld [vmem:[#allocation22_spill] sm:$0xff] }
 0x3a8   : > { %v2757_v38 = vpop.xlane.xlu1 %2756  ;;  %3062 = vadd.xlane.f32.xlu1 %v3061_v45  ;;  %v6053_v51 = vpop.eup %6052  ;;  %5870 = vmatprep.subr.msk.bf16.mxu1 %vm1949_vm3, %v7325_v39  ;;  %v3173_v10 = vpack.c.bf16 %v6051_v30, %v6049_v3  ;;  %v7795_v45 = vld [vmem:[#allocation21_spill] sm:$0xff] }
 0x3a9   : > { %v2950_v15 = vmul.f32 1.442695, %v2828_v37  ;;  %v2829_v14 = vsub.f32 %v7786_v63, %v2757_v38  ;;  %6066 = vpow2.f32 %v2936_v23  ;;  %v3100_v17 = vsel %vm353_vm1, %v6053_v51, 0.0 }
 0x3aa   : > { %v2724_v56 = vpop.xlane.xlu0 %2723 }
 0x3ab   : > { %v2818_v50 = vsub.f32 %v7787_v8, %v2724_v56  ;;  %3077 = vadd.xlane.f32.xlu0 %v3076_v48  ;;  %6068 = vpow2.f32 %v2950_v15  ;;  %v2952_v28 = vmul.f32 1.442695, %v2829_v14 }
 0x3ac   : > { %v2727_v49 = vpop.xlane.xlu1 %2726  ;;  %v6055_v40 = vpop.eup %6054  ;;  %3086 = vadd.xlane.f32.xlu1 %v3085_v11  ;;  %v7797_v11 = vld [vmem:[#allocation19_spill] sm:$0xff] }
 0x3ad   : > { %v2930_v21 = vmul.f32 1.442695, %v2818_v50  ;;  %v2819_v2 = vsub.f32 %v7788_v47, %v2727_v49  ;;  %v3070_v29 = vsel %vm353_vm1, %v6055_v40, 0.0 }
 0x3ae   : > { %v6057_v9 = vpop.eup %6056  ;;  %v2748_v31 = vpop.xlane.xlu0 %2747 }
 0x3af   : > { %v2932_v52 = vmul.f32 1.442695, %v2819_v2  ;;  %v2826_v57 = vsub.f32 %v7789_v62, %v2748_v31  ;;  %3101 = vadd.xlane.f32.xlu0 %v3100_v17  ;;  %v3172_v19 = vpack.c.bf16 %v6057_v9, %v6055_v40  ;;  %v6059_v36 = vpop.eup %6058  ;;  %6070 = vpow2.f32 %v2930_v21  ;;  %v7798_v62 = vld [vmem:[#allocation23_spill] sm:$0xff] }
 0x3b0   : > { %v2751_v22 = vpop.xlane.xlu1 %2750  ;;  %v6061_v34 = vpop.eup %6060  ;;  %3080 = vadd.xlane.f32.xlu1 %v3079_v42  ;;  %v3103_v0 = vsel %vm353_vm1, %v6059_v36, 0.0  ;;  %v3177_v35 = vpack.c.bf16 %v6059_v36, %v6053_v51  ;;  %v3073_v1 = vsel %vm353_vm1, %v6057_v9, 0.0  ;;  %v7796_v51 = vld [vmem:[#allocation24_spill] sm:$0xff]  ;;  %v3986_v17 = vsel %vm1949_vm3, %v7334_v55, 0 }
 0x3b1   : > { %6072 = vpow2.f32 %v2932_v52  ;;  %v2946_v12 = vmul.f32 1.442695, %v2826_v57  ;;  %v2827_v60 = vsub.f32 %v7790_v54, %v2751_v22  ;;  %5739 = vmatprep.mubr.msk.bf16.mxu0 %vm353_vm1, %v3172_v19  ;;  %v3094_v44 = vsel %vm353_vm1, %v6061_v34, 0.0 }
 0x3b2   : > { %v6063_v6 = vpop.eup %6062  ;;  %5740 = vmatmul.mubr.msk.bf16.gmra.mxu0 %vm353_vm1, %v3173_v10  ;;  %v2742_v20 = vpop.xlane.xlu0 %2741  ;;  %6074 = vpow2.f32 %v2952_v28 }
 0x3b3   : > { %v2948_v7 = vmul.f32 1.442695, %v2827_v60  ;;  %v2824_v16 = vsub.f32 %v7791_v32, %v2742_v20  ;;  %3071 = vadd.xlane.f32.xlu0 %v3070_v29  ;;  %v3176_v25 = vpack.c.bf16 %v6063_v6, %v6061_v34  ;;  %6076 = vpow2.f32 %v2946_v12  ;;  %v7376_v32 = vld [vmem:[%s7740_s5 + $0x8] sm:$0xf] }
 0x3b4   : > { %v2745_v41 = vpop.xlane.xlu1 %2744  ;;  %3104 = vadd.xlane.f32.xlu1 %v3103_v0  ;;  %v6065_v43 = vpop.eup %6064  ;;  %v3097_v30 = vsel %vm353_vm1, %v6063_v6, 0.0  ;;  %v4066_v34 = vsel %vm1949_vm3, %v7325_v39, 0 }
 0x3b5   : > { %6078 = vpow2.f32 %v2948_v7  ;;  %v2825_v4 = vsub.f32 %v7792_v24, %v2745_v41  ;;  %5749 = vmatprep.mubr.msk.bf16.mxu1 %vm353_vm1, %v3176_v25  ;;  %v2942_v26 = vmul.f32 1.442695, %v2824_v16  ;;  %v3112_v3 = vsel %vm353_vm1, %v6065_v43, 0.0 }
 0x3b6   : > { %5750 = vmatmul.mubr.msk.bf16.gmra.mxu1 %vm353_vm1, %v3177_v35  ;;  %v2736_v33 = vpop.xlane.xlu0 %2735  ;;  %v6067_v13 = vpop.eup %6066 }
 0x3b7   : > { %v2944_v27 = vmul.f32 1.442695, %v2825_v4  ;;  %3095 = vadd.xlane.f32.xlu0 %v3094_v44  ;;  %v2822_v5 = vsub.f32 %v7793_v59, %v2736_v33  ;;  %6080 = vpow2.f32 %v2942_v26  ;;  %v3179_v2 = vpack.c.bf16 %v6067_v13, %v6065_v43  ;;  %v7387_v4 = vld [vmem:[%s7740_s5 + $0xc] sm:$0xf] }
 0x3b8   : > { %v2739_v61 = vpop.xlane.xlu1 %2738  ;;  %3074 = vadd.xlane.f32.xlu1 %v3073_v1  ;;  %v6069_v37 = vpop.eup %6068  ;;  %v3115_v9 = vsel %vm353_vm1, %v6067_v13, 0.0 }
 0x3b9   : > { %v2938_v58 = vmul.f32 1.442695, %v2822_v5  ;;  %v2823_v46 = vsub.f32 %v7794_v53, %v2739_v61  ;;  %6082 = vpow2.f32 %v2944_v27  ;;  %v3136_v8 = vsel %vm353_vm1, %v6069_v37, 0.0 }
 0x3ba   : > { %v2760_v18 = vpop.xlane.xlu0 %2759 }
 0x3bb   : > { %v2940_v38 = vmul.f32 1.442695, %v2823_v46  ;;  %3113 = vadd.xlane.f32.xlu0 %v3112_v3  ;;  %v2830_v23 = vsub.f32 %v7795_v45, %v2760_v18  ;;  %6084 = vpow2.f32 %v2938_v58 }
 0x3bc   : > { %v2763_v15 = vpop.xlane.xlu1 %2762  ;;  %v6071_v56 = vpop.eup %6070  ;;  %3098 = vadd.xlane.f32.xlu1 %v3097_v30 }
 0x3bd   : > { %6086 = vpow2.f32 %v2940_v38  ;;  %v2954_v48 = vmul.f32 1.442695, %v2830_v23  ;;  %v2831_v63 = vsub.f32 %v7796_v51, %v2763_v15  ;;  %v3106_v36 = vsel %vm353_vm1, %v6071_v56, 0.0 }
 0x3be   : > { %v6073_v14 = vpop.eup %6072  ;;  %v2766_v50 = vpop.xlane.xlu0 %2765 }
 0x3bf   : > { %v2956_v49 = vmul.f32 1.442695, %v2831_v63  ;;  %3137 = vadd.xlane.f32.xlu0 %v3136_v8  ;;  %v2832_v40 = vsub.f32 %v7797_v11, %v2766_v50  ;;  %v3178_v21 = vpack.c.bf16 %v6073_v14, %v6071_v56  ;;  %v6075_v47 = vpop.eup %6074  ;;  %6088 = vpow2.f32 %v2954_v48 }
 0x3c0   : > { %v2769_v31 = vpop.xlane.xlu1 %2768  ;;  %v6077_v28 = vpop.eup %6076  ;;  %3116 = vadd.xlane.f32.xlu1 %v3115_v9  ;;  %v3183_v10 = vpack.c.bf16 %v6075_v47, %v6069_v37  ;;  %v3139_v55 = vsel %vm353_vm1, %v6075_v47, 0.0  ;;  %v3109_v6 = vsel %vm353_vm1, %v6073_v14, 0.0 }
 0x3c1   : > { %6090 = vpow2.f32 %v2956_v49  ;;  %v2958_v52 = vmul.f32 1.442695, %v2832_v40  ;;  %v2833_v57 = vsub.f32 %v7798_v62, %v2769_v31  ;;  %5755 = vmatprep.mubr.msk.bf16.mxu0 %vm353_vm1, %v3178_v21  ;;  %v3130_v12 = vsel %vm353_vm1, %v6077_v28, 0.0 }
 0x3c2   : > { %v6079_v19 = vpop.eup %6078  ;;  %5756 = vmatmul.mubr.msk.bf16.vlgmr.msra.gmra.mxu0 %vm353_vm1, %v3179_v2 }
 0x3c3   : > { %v2960_v22 = vmul.f32 1.442695, %v2833_v57  ;;  %3107 = vadd.xlane.f32.xlu0 %v3106_v36  ;;  %v3182_v42 = vpack.c.bf16 %v6079_v19, %v6077_v28  ;;  %5774 = vmatpush3.bf16.msra.mxu0 %v3986_v17  ;;  %6092 = vpow2.f32 %v2958_v52  ;;  %v3133_v16 = vsel %vm353_vm1, %v6079_v19, 0.0 }
 0x3c4   : > { %3140 = vadd.xlane.f32.xlu1 %v3139_v55  ;;  %v6081_v54 = vpop.eup %6080  ;;  %5871 = vmatprep.subr.msk.bf16.mxu0 %vm1949_vm3, %v7376_v32 }
 0x3c5   : > { %6094 = vpow2.f32 %v2960_v22  ;;  %5765 = vmatprep.mubr.msk.bf16.mxu1 %vm353_vm1, %v3182_v42  ;;  %v3124_v7 = vsel %vm353_vm1, %v6081_v54, 0.0 }
 0x3c6   : > { %5766 = vmatmul.mubr.msk.bf16.vlgmr.msra.gmra.mxu1 %vm353_vm1, %v3183_v10  ;;  %v6083_v60 = vpop.eup %6082 }
 0x3c7   : > { %3131 = vadd.xlane.f32.xlu0 %v3130_v12  ;;  %5784 = vmatpush3.bf16.msra.mxu1 %v4066_v34  ;;  %v3181_v25 = vpack.c.bf16 %v6083_v60, %v6081_v54  ;;  %v3127_v26 = vsel %vm353_vm1, %v6083_v60, 0.0 }
 0x3c8   : > { %v6085_v20 = vpop.eup %6084  ;;  %3110 = vadd.xlane.f32.xlu1 %v3109_v6  ;;  %5872 = vmatprep.subr.msk.bf16.mxu1 %vm1949_vm3, %v7387_v4 }
 0x3c9   : > { %v3118_v35 = vsel %vm353_vm1, %v6085_v20, 0.0 }
 0x3ca   : > { %v6087_v29 = vpop.eup %6086 }
 0x3cb   : > { %3125 = vadd.xlane.f32.xlu0 %v3124_v7  ;;  %v3180_v39 = vpack.c.bf16 %v6087_v29, %v6085_v20  ;;  %v3121_v59 = vsel %vm353_vm1, %v6087_v29, 0.0 }
 0x3cc   : > { %v6089_v41 = vpop.eup %6088  ;;  %3134 = vadd.xlane.f32.xlu1 %v3133_v16 }
 0x3cd   : > { %5759 = vmatprep.mubr.msk.bf16.mxu0 %vm353_vm1, %v3180_v39  ;;  %v3142_v43 = vsel %vm353_vm1, %v6089_v41, 0.0 }
 0x3ce   : > { %v6091_v0 = vpop.eup %6090  ;;  %5760 = vmatmul.mubr.msk.bf16.gmra.mxu0 %vm353_vm1, %v3181_v25 }
 0x3cf   : > { %3119 = vadd.xlane.f32.xlu0 %v3118_v35  ;;  %v3184_v24 = vpack.c.bf16 %v6091_v0, %v6089_v41  ;;  %v3145_v1 = vsel %vm353_vm1, %v6091_v0, 0.0 }
 0x3d0   : > { %v6093_v44 = vpop.eup %6092  ;;  %3128 = vadd.xlane.f32.xlu1 %v3127_v26  ;;  %v4246_v26 = vsel %vm1949_vm3, %v7387_v4, 0 }
 0x3d1   : > { %5769 = vmatprep.mubr.msk.bf16.mxu1 %vm353_vm1, %v3184_v24  ;;  %v3148_v5 = vsel %vm353_vm1, %v6093_v44, 0.0 }
 0x3d2   : > { %v6095_v33 = vpop.eup %6094 }
 0x3d3   : > { %3143 = vadd.xlane.f32.xlu0 %v3142_v43  ;;  %v3185_v27 = vpack.c.bf16 %v6095_v33, %v6093_v44  ;;  %v3151_v61 = vsel %vm353_vm1, %v6095_v33, 0.0 }
 0x3d4   : > { %3122 = vadd.xlane.f32.xlu1 %v3121_v59 }
 0x3d5   : > { %5770 = vmatmul.mubr.msk.bf16.gmra.mxu1 %vm353_vm1, %v3185_v27 }
 0x3d7   : > { %3149 = vadd.xlane.f32.xlu0 %v3148_v5 }
 0x3d8   : > { %3146 = vadd.xlane.f32.xlu1 %v3145_v1  ;;  %v7441_v1 = vld [vmem:[%s7740_s5 + $0x14] sm:$0xf] }
 0x3dc   : > { %3152 = vadd.xlane.f32.xlu1 %v3151_v61 }
 0x3e3   : > { %v2994_v58 = vpop.xlane.xlu0 %2993 }
 0x3e7   : > { %v2970_v53 = vpop.xlane.xlu0 %2969 }
 0x3e8   : > { %6096 = vrcp.f32 %v2970_v53  ;;  %v4152_v53 = vsel %vm1949_vm3, %v7376_v32, 0 }
 0x3e9   : > { %v2997_v46 = vpop.xlane.xlu1 %2996 }
 0x3eb   : > { %v2988_v13 = vpop.xlane.xlu0 %2987 }
 0x3ed   : > { %v2973_v3 = vpop.xlane.xlu1 %2972 }
 0x3ee   : > { %6098 = vrcp.f32 %v2973_v3 }
 0x3f0   : > { %v2964_v18 = vpop.xlane.xlu0 %2963 }
 0x3f1   : > { %v2991_v37 = vpop.xlane.xlu1 %2990  ;;  %6100 = vrcp.f32 %v2964_v18 }
 0x3f4   : > { %v7399_v38 = vpop.xlane.xlu0 %3005 }
 0x3f5   : > { %v2967_v45 = vpop.xlane.xlu1 %2966  ;;  %v6097_v19 = vpop.eup %6096 }
 0x3f6   : > { %6102 = vrcp.f32 %v2967_v45 }
 0x3f7   : > { %6104 = vrcp.f32 %v2997_v46 }
 0x3f8   : > { %v2982_v23 = vpop.xlane.xlu0 %2981  ;;  %6106 = vrcp.f32 %v2988_v13  ;;  %v7453_v13 = vld [vmem:[%s7740_s5 + $0x10] sm:$0xf] }
 0x3f9   : > { %v3009_v30 = vpop.xlane.xlu1 %3008  ;;  %6108 = vrcp.f32 %v2991_v37 }
 0x3fa   : > { %6110 = vrcp.f32 %v2994_v58 }
 0x3fb   : > { %v6099_v22 = vpop.eup %6098 }
 0x3fc   : > { %v3000_v15 = vpop.xlane.xlu0 %2999 }
 0x3fd   : > { %v2985_v56 = vpop.xlane.xlu1 %2984 }
 0x3fe   : > { %v6101_v10 = vpop.eup %6100  ;;  %6112 = vrcp.f32 %v2985_v56 }
 0x400   : > { %v2976_v48 = vpop.xlane.xlu0 %2975 }
 0x401   : > { %v3003_v51 = vpop.xlane.xlu1 %3002  ;;  %6114 = vrcp.f32 %v2976_v48 }
 0x403   : > { %v6103_v12 = vpop.eup %6102 }
 0x404   : > { %v7401_v63 = vpop.xlane.xlu0 %3017  ;;  %v6105_v6 = vpop.eup %6104 }
 0x405   : > { %v2979_v14 = vpop.xlane.xlu1 %2978  ;;  %v6107_v16 = vpop.eup %6106 }
 0x406   : > { %6116 = vrcp.f32 %v2979_v14  ;;  %v6109_v41 = vpop.eup %6108 }
 0x407   : > { %6118 = vrcp.f32 %v2982_v23  ;;  %v6111_v44 = vpop.eup %6110 }
 0x408   : > { %v7403_v8 = vpop.xlane.xlu0 %3041  ;;  %6120 = vrcp.f32 %v3009_v30 }
 0x409   : > { %v7405_v50 = vpop.xlane.xlu1 %3020  ;;  %6122 = vrcp.f32 %v3000_v15 }
 0x40a   : > { %6124 = vrcp.f32 %v3003_v51 }
 0x40b   : > { %6126 = vrcp.f32 %v7399_v38  ;;  %v6113_v32 = vpop.eup %6112 }
 0x40c   : > { %v7407_v49 = vpop.xlane.xlu0 %3011  ;;  %6128 = vrcp.f32 %v7405_v50 }
 0x40d   : > { %v7409_v11 = vpop.xlane.xlu1 %3044  ;;  %6130 = vrcp.f32 %v7407_v49 }
 0x40e   : > { %v6115_v38 = vpop.eup %6114 }
 0x410   : > { %v7413_v21 = vpop.xlane.xlu0 %3035 }
 0x411   : > { %v7411_v40 = vpop.xlane.xlu1 %3014 }
 0x412   : > { %6132 = vrcp.f32 %v7411_v40 }
 0x413   : > { %v6117_v30 = vpop.eup %6116  ;;  %6134 = vrcp.f32 %v7401_v63 }
 0x414   : > { %v7417_v2 = vpop.xlane.xlu0 %3029  ;;  %v6119_v48 = vpop.eup %6118  ;;  %6136 = vrcp.f32 %v7409_v11 }
 0x415   : > { %v7415_v47 = vpop.xlane.xlu1 %3038  ;;  %6138 = vrcp.f32 %v7413_v21 }
 0x416   : > { %6140 = vrcp.f32 %v7415_v47 }
 0x417   : > { %6142 = vrcp.f32 %v7403_v8 }
 0x418   : > { %v7423_v17 = vpop.xlane.xlu0 %3053 }
 0x419   : > { %v7419_v9 = vpop.xlane.xlu1 %3032 }
 0x41a   : > { %6144 = vrcp.f32 %v7419_v9  ;;  %v4340_v9 = vsel %vm1949_vm3, %v7453_v13, 0 }
 0x41c   : > { %v7427_v62 = vpop.xlane.xlu0 %3023 }
 0x41d   : > { %v7421_v31 = vpop.xlane.xlu1 %3056  ;;  %6146 = vrcp.f32 %v7427_v62 }
 0x420   : > { %v7431_v20 = vpop.xlane.xlu0 %3047 }
 0x421   : > { %v7425_v28 = vpop.xlane.xlu1 %3026 }
 0x422   : > { %6148 = vrcp.f32 %v7425_v28  ;;  %v7500_v28 = vld [vmem:[%s7740_s5 + $0x18] sm:$0xf] }
 0x423   : > { %6150 = vrcp.f32 %v7417_v2 }
 0x424   : > { %v5697_v52 = vpop.f32.mrf.mxu0  ;;  %v7445_v4 = vpop.xlane.xlu0 %3065 }
 0x425   : > { %v7429_v55 = vpop.xlane.xlu1 %3050  ;;  %v3900_v25 = vmul.f32 %v6097_v19, %v5697_v52  ;;  %v6121_v19 = vpop.eup %6120  ;;  %6152 = vrcp.f32 %v7421_v31  ;;  %v4434_v31 = vsel %vm1949_vm3, %v7441_v1, 0 }
 0x426   : > { %v3243_v57 = vpop.f32.mrf.mxu0  ;;  %v5707_v36 = vpop.f32.mrf.mxu1 }
 0x427   : > { %v3898_v29 = vmul.f32 %v6101_v10, %v3243_v57  ;;  %v3908_v59 = vmul.f32 %v6111_v44, %v5707_v36  ;;  %v6123_v10 = vpop.eup %6122  ;;  %6154 = vrcp.f32 %v7431_v20  ;;  %v7517_v20 = vld [vmem:[%s7740_s5 + $0x1c] sm:$0xf] }
 0x428   : > { %v5698_v42 = vpop.f32.mrf.mxu0  ;;  %v3323_v34 = vpop.f32.mrf.mxu1 }
 0x429   : > { %v3901_v54 = vmul.f32 %v6099_v22, %v5698_v42  ;;  %v3906_v43 = vmul.f32 %v6107_v16, %v3323_v34  ;;  %v7435_v5 = vpop.xlane.xlu1 %3068  ;;  %v7462_v45 = vpop.xlane.xlu0 %3089 }
 0x42a   : > { %v3246_v60 = vpop.f32.mrf.mxu0  ;;  %v5708_v39 = vpop.f32.mrf.mxu1 }
 0x42b   : > { %v3899_v7 = vmul.f32 %v6103_v12, %v3246_v60  ;;  %v3909_v35 = vmul.f32 %v6105_v6, %v5708_v39  ;;  %v3963_v33 = vpack.c.bf16 %v3901_v54, %v3900_v25  ;;  %v6125_v12 = vpop.eup %6124  ;;  %6156 = vrcp.f32 %v7429_v55 }
 0x42c   : > { %v3326_v24 = vpop.f32.mrf.mxu1  ;;  %v6127_v49 = vpop.eup %6126  ;;  %6158 = vrcp.f32 %v7423_v17 }
 0x42d   : > { %v3962_v0 = vpack.c.bf16 %v3899_v7, %v3898_v29  ;;  %v3907_v27 = vmul.f32 %v6109_v41, %v3326_v24  ;;  %v3968_v58 = vpack.c.bf16 %v3909_v35, %v3908_v59  ;;  %v7458_v18 = vpop.xlane.xlu1 %3092  ;;  %v7470_v54 = vpop.xlane.xlu0 %3059 }
 0x42e   : > { %v6129_v41 = vpop.eup %6128  ;;  %6160 = vrcp.f32 %v7435_v5 }
 0x42f   : > { %5785 = vmatprep.mubr.msk.bf16.mxu1 %vm1936_vm4, %v3962_v0  ;;  %v3967_v61 = vpack.c.bf16 %v3907_v27, %v3906_v43  ;;  %v6131_v21 = vpop.eup %6130  ;;  %6162 = vrcp.f32 %v7470_v54 }
 0x430   : > { %5786 = vmatmul.mubr.msk.bf16.vlgmr.msra.gmra.mxu1 %vm1936_vm4, %v3963_v33  ;;  %v6133_v24 = vpop.eup %6132 }
 0x431   : > { %5804 = vmatpush3.bf16.msra.mxu1 %v4246_v26  ;;  %5775 = vmatprep.mubr.msk.bf16.mxu0 %vm1936_vm4, %v3967_v61  ;;  %v7467_v36 = vpop.xlane.xlu1 %3062  ;;  %v7481_v25 = vpop.xlane.xlu0 %3083 }
 0x432   : > { %v5701_v46 = vpop.f32.mrf.mxu0  ;;  %5874 = vmatprep.subr.msk.bf16.mxu1 %vm1949_vm3, %v7441_v1  ;;  %5776 = vmatmul.mubr.msk.bf16.vlgmr.msra.gmra.mxu0 %vm1936_vm4, %v3968_v58  ;;  %v6135_v44 = vpop.eup %6134  ;;  %6164 = vrcp.f32 %v7467_v36 }
 0x433   : > { %5794 = vmatpush3.bf16.msra.mxu0 %v4152_v53  ;;  %v3904_v57 = vmul.f32 %v6119_v48, %v5701_v46  ;;  %v6137_v58 = vpop.eup %6136  ;;  %6166 = vrcp.f32 %v7445_v4 }
 0x434   : > { %v3259_v3 = vpop.f32.mrf.mxu0  ;;  %5873 = vmatprep.subr.msk.bf16.mxu0 %vm1949_vm3, %v7453_v13  ;;  %6168 = vrcp.f32 %v7458_v18 }
 0x435   : > { %v3902_v51 = vmul.f32 %v6115_v38, %v3259_v3  ;;  %v7478_v7 = vpop.xlane.xlu1 %3086  ;;  %v7487_v33 = vpop.xlane.xlu0 %3077 }
 0x436   : > { %v5702_v37 = vpop.f32.mrf.mxu0  ;;  %v5711_v23 = vpop.f32.mrf.mxu1 }
 0x437   : > { %v3905_v15 = vmul.f32 %v6113_v32, %v5702_v37  ;;  %v3912_v29 = vmul.f32 %v6127_v49, %v5711_v23  ;;  %v6139_v3 = vpop.eup %6138  ;;  %6170 = vrcp.f32 %v7481_v25 }
 0x438   : > { %v3262_v56 = vpop.f32.mrf.mxu0  ;;  %v3339_v52 = vpop.f32.mrf.mxu1 }
 0x439   : > { %v3903_v14 = vmul.f32 %v6117_v30, %v3262_v56  ;;  %v3965_v34 = vpack.c.bf16 %v3905_v15, %v3904_v57  ;;  %v3910_v6 = vmul.f32 %v6123_v10, %v3339_v52  ;;  %v7484_v35 = vpop.xlane.xlu1 %3080  ;;  %v6141_v37 = vpop.eup %6140  ;;  %6172 = vrcp.f32 %v7478_v7 }
 0x43a   : > { %v5712_v42 = vpop.f32.mrf.mxu1  ;;  %v6143_v62 = vpop.eup %6142  ;;  %6174 = vrcp.f32 %v7462_v45 }
 0x43b   : > { %v3964_v22 = vpack.c.bf16 %v3903_v14, %v3902_v51  ;;  %v3913_v50 = vmul.f32 %v6121_v19, %v5712_v42  ;;  %v7505_v13 = vpop.xlane.xlu0 %3101  ;;  %v6145_v17 = vpop.eup %6144  ;;  %6176 = vrcp.f32 %v7484_v35 }
 0x43c   : > { %v3342_v60 = vpop.f32.mrf.mxu1  ;;  %v6147_v19 = vpop.eup %6146 }
 0x43d   : > { %5789 = vmatprep.mubr.msk.bf16.mxu1 %vm1936_vm4, %v3964_v22  ;;  %v3911_v40 = vmul.f32 %v6125_v12, %v3342_v60  ;;  %v3970_v39 = vpack.c.bf16 %v3913_v50, %v3912_v29  ;;  %v7494_v38 = vpop.xlane.xlu1 %3104  ;;  %v6149_v42 = vpop.eup %6148 }
 0x43e   : > { %5790 = vmatmul.mubr.msk.bf16.gmra.mxu1 %vm1936_vm4, %v3965_v34  ;;  %v6151_v12 = vpop.eup %6150 }
 0x43f   : > { %v3969_v63 = vpack.c.bf16 %v3911_v40, %v3910_v6  ;;  %v3072_v57 = vpop.xlane.xlu0 %3071  ;;  %v6153_v29 = vpop.eup %6152 }
 0x440   : > { %6178 = vrcp.f32 %v3072_v57 }
 0x441   : > { %5779 = vmatprep.mubr.msk.bf16.mxu0 %vm1936_vm4, %v3969_v63  ;;  %v7519_v52 = vpop.xlane.xlu1 %3074 }
 0x442   : > { %v5717_v16 = vpop.f32.mrf.mxu0  ;;  %5780 = vmatmul.mubr.msk.bf16.gmra.mxu0 %vm1936_vm4, %v3970_v39  ;;  %6180 = vrcp.f32 %v7519_v52 }
 0x443   : > { %v3916_v61 = vmul.f32 %v6135_v44, %v5717_v16  ;;  %v3096_v63 = vpop.xlane.xlu0 %3095  ;;  %6182 = vrcp.f32 %v7487_v33 }
 0x444   : > { %v3403_v11 = vpop.f32.mrf.mxu0  ;;  %6184 = vrcp.f32 %v7494_v38 }
 0x445   : > { %v3914_v43 = vmul.f32 %v6131_v21, %v3403_v11  ;;  %v7525_v50 = vpop.xlane.xlu1 %3098  ;;  %v6155_v11 = vpop.eup %6154  ;;  %6186 = vrcp.f32 %v3096_v63 }
 0x446   : > { %v5718_v0 = vpop.f32.mrf.mxu0  ;;  %v5727_v47 = vpop.f32.mrf.mxu1 }
 0x447   : > { %v3917_v26 = vmul.f32 %v6129_v41, %v5718_v0  ;;  %v3924_v56 = vmul.f32 %v6143_v62, %v5727_v47  ;;  %v6157_v0 = vpop.eup %6156  ;;  %6188 = vrcp.f32 %v7525_v50 }
 0x448   : > { %v3406_v8 = vpop.f32.mrf.mxu0  ;;  %v3483_v59 = vpop.f32.mrf.mxu1 }
 0x449   : > { %v3915_v27 = vmul.f32 %v6133_v24, %v3406_v8  ;;  %v4134_v32 = vpack.c.bf16 %v3917_v26, %v3916_v61  ;;  %v3922_v2 = vmul.f32 %v6139_v3, %v3483_v59  ;;  %v6159_v47 = vpop.eup %6158  ;;  %v7534_v36 = vpop.xlane.xlu1 %3116  ;;  %6190 = vrcp.f32 %v7505_v13 }
 0x44a   : > { %v5728_v46 = vpop.f32.mrf.mxu1  ;;  %v7538_v8 = vpop.xlane.xlu0 %3113 }
 0x44b   : > { %v4133_v53 = vpack.c.bf16 %v3915_v27, %v3914_v43  ;;  %v3925_v23 = vmul.f32 %v6137_v58, %v5728_v46  ;;  %v6161_v25 = vpop.eup %6160  ;;  %6192 = vrcp.f32 %v7534_v36 }
 0x44c   : > { %v3486_v30 = vpop.f32.mrf.mxu1  ;;  %v6163_v61 = vpop.eup %6162 }
 0x44d   : > { %5795 = vmatprep.mubr.msk.bf16.mxu0 %vm1936_vm4, %v4133_v53  ;;  %v3923_v15 = vmul.f32 %v6141_v37, %v3486_v30  ;;  %v4228_v51 = vpack.c.bf16 %v3925_v23, %v3924_v56  ;;  %v7542_v27 = vpop.xlane.xlu1 %3140  ;;  %v6165_v53 = vpop.eup %6164 }
 0x44e   : > { %5796 = vmatmul.mubr.msk.bf16.vlgmr.msra.gmra.mxu0 %vm1936_vm4, %v4134_v32  ;;  %v7544_v58 = vpop.xlane.xlu0 %3137  ;;  %v6167_v3 = vpop.eup %6166 }
 0x44f   : > { %5814 = vmatpush3.bf16.msra.mxu0 %v4340_v9  ;;  %v4227_v48 = vpack.c.bf16 %v3923_v15, %v3922_v2  ;;  %v6169_v30 = vpop.eup %6168 }
 0x450   : > { %5875 = vmatprep.subr.msk.bf16.mxu0 %vm1949_vm3, %v7500_v28  ;;  %v6171_v56 = vpop.eup %6170 }
 0x451   : > { %5805 = vmatprep.mubr.msk.bf16.mxu1 %vm1936_vm4, %v4227_v48  ;;  %v3111_v62 = vpop.xlane.xlu1 %3110 }
 0x452   : > { %v5721_v14 = vpop.f32.mrf.mxu0  ;;  %5806 = vmatmul.mubr.msk.bf16.vlgmr.msra.gmra.mxu1 %vm1936_vm4, %v4228_v51  ;;  %v4528_v51 = vsel %vm1949_vm3, %v7500_v28, 0  ;;  %v3108_v35 = vpop.xlane.xlu0 %3107 }
 0x453   : > { %5824 = vmatpush3.bf16.msra.mxu1 %v4434_v31  ;;  %v3920_v40 = vmul.f32 %v6151_v12, %v5721_v14  ;;  %v6173_v31 = vpop.eup %6172  ;;  %6194 = vrcp.f32 %v3108_v35 }
 0x454   : > { %v3419_v55 = vpop.f32.mrf.mxu0  ;;  %5876 = vmatprep.subr.msk.bf16.mxu1 %vm1949_vm3, %v7517_v20  ;;  %v6175_v57 = vpop.eup %6174  ;;  %6196 = vrcp.f32 %v3111_v62 }
 0x455   : > { %v3918_v60 = vmul.f32 %v6147_v19, %v3419_v55  ;;  %v4622_v19 = vsel %vm1949_vm3, %v7517_v20, 0  ;;  %6198 = vrcp.f32 %v7538_v8 }
 0x456   : > { %v5722_v1 = vpop.f32.mrf.mxu0  ;;  %v5731_v22 = vpop.f32.mrf.mxu1  ;;  %6200 = vrcp.f32 %v7542_v27 }
 0x457   : > { %v3921_v10 = vmul.f32 %v6145_v17, %v5722_v1  ;;  %v3928_v26 = vmul.f32 %v6159_v47, %v5731_v22  ;;  %v3135_v1 = vpop.xlane.xlu1 %3134 }
 0x458   : > { %v3422_v34 = vpop.f32.mrf.mxu0  ;;  %v3499_v6 = vpop.f32.mrf.mxu1 }
 0x459   : > { %v3919_v49 = vmul.f32 %v6149_v42, %v3422_v34  ;;  %v4136_v41 = vpack.c.bf16 %v3921_v10, %v3920_v40  ;;  %v3926_v54 = vmul.f32 %v6155_v11, %v3499_v6  ;;  %v3132_v42 = vpop.xlane.xlu0 %3131  ;;  %v6177_v34 = vpop.eup %6176 }
 0x45a   : > { %v5732_v16 = vpop.f32.mrf.mxu1  ;;  %6202 = vrcp.f32 %v3132_v42 }
 0x45b   : > { %v4135_v39 = vpack.c.bf16 %v3919_v49, %v3918_v60  ;;  %v3929_v5 = vmul.f32 %v6153_v29, %v5732_v16  ;;  %v6179_v60 = vpop.eup %6178  ;;  %v3129_v49 = vpop.xlane.xlu1 %3128  ;;  %6204 = vrcp.f32 %v3135_v1 }
 0x45c   : > { %v3502_v21 = vpop.f32.mrf.mxu1  ;;  %v6181_v13 = vpop.eup %6180  ;;  %6206 = vrcp.f32 %v7544_v58 }
 0x45d   : > { %5799 = vmatprep.mubr.msk.bf16.mxu0 %vm1936_vm4, %v4135_v39  ;;  %v3927_v24 = vmul.f32 %v6157_v0, %v3502_v21  ;;  %v4230_v44 = vpack.c.bf16 %v3929_v5, %v3928_v26  ;;  %v6183_v63 = vpop.eup %6182  ;;  %v3126_v20 = vpop.xlane.xlu0 %3125 }
 0x45e   : > { %5800 = vmatmul.mubr.msk.bf16.gmra.mxu0 %vm1936_vm4, %v4136_v41  ;;  %v6185_v11 = vpop.eup %6184 }
 0x45f   : > { %v4229_v4 = vpack.c.bf16 %v3927_v24, %v3926_v54  ;;  %v6187_v5 = vpop.eup %6186 }
 0x460   : > { %v6189_v47 = vpop.eup %6188 }
 0x461   : > { %5809 = vmatprep.mubr.msk.bf16.mxu1 %vm1936_vm4, %v4229_v4  ;;  %v6191_v4 = vpop.eup %6190 }
 0x462   : > { %v5737_v18 = vpop.f32.mrf.mxu0  ;;  %5810 = vmatmul.mubr.msk.bf16.gmra.mxu1 %vm1936_vm4, %v4230_v44 }
 0x463   : > { %v3932_v23 = vmul.f32 %v6167_v3, %v5737_v18  ;;  %v3123_v18 = vpop.xlane.xlu1 %3122 }
 0x464   : > { %v3563_v43 = vpop.f32.mrf.mxu0 }
 0x465   : > { %v3930_v32 = vmul.f32 %v6163_v61, %v3563_v43 }
 0x466   : > { %v5738_v59 = vpop.f32.mrf.mxu0  ;;  %v5747_v7 = vpop.f32.mrf.mxu1 }
 0x467   : > { %v3933_v46 = vmul.f32 %v6161_v25, %v5738_v59  ;;  %v3940_v33 = vmul.f32 %v6175_v57, %v5747_v7  ;;  %v3120_v25 = vpop.xlane.xlu0 %3119  ;;  %v3147_v27 = vpop.xlane.xlu1 %3146 }
 0x468   : > { %v3566_v45 = vpop.f32.mrf.mxu0  ;;  %v3643_v37 = vpop.f32.mrf.mxu1  ;;  %6208 = vrcp.f32 %v3120_v25 }
 0x469   : > { %v3931_v9 = vmul.f32 %v6165_v53, %v3566_v45  ;;  %v4322_v48 = vpack.c.bf16 %v3933_v46, %v3932_v23  ;;  %v3938_v52 = vmul.f32 %v6171_v56, %v3643_v37  ;;  %v6193_v46 = vpop.eup %6192  ;;  %6210 = vrcp.f32 %v3129_v49 }
 0x46a   : > { %v5748_v15 = vpop.f32.mrf.mxu1  ;;  %6212 = vrcp.f32 %v3123_v18 }
 0x46b   : > { %v4321_v2 = vpack.c.bf16 %v3931_v9, %v3930_v32  ;;  %v3941_v14 = vmul.f32 %v6169_v30, %v5748_v15  ;;  %v3144_v53 = vpop.xlane.xlu0 %3143  ;;  %v6195_v32 = vpop.eup %6194  ;;  %6214 = vrcp.f32 %v3126_v20 }
 0x46c   : > { %v3646_v55 = vpop.f32.mrf.mxu1  ;;  %v6197_v9 = vpop.eup %6196  ;;  %6216 = vrcp.f32 %v3144_v53 }
 0x46d   : > { %5815 = vmatprep.mubr.msk.bf16.mxu0 %vm1936_vm4, %v4321_v2  ;;  %v3939_v17 = vmul.f32 %v6173_v31, %v3646_v55  ;;  %v4416_v38 = vpack.c.bf16 %v3941_v14, %v3940_v33  ;;  %v6199_v30 = vpop.eup %6198  ;;  %v3153_v56 = vpop.xlane.xlu1 %3152 }
 0x46e   : > { %5816 = vmatmul.mubr.msk.bf16.vlgmr.msra.gmra.mxu0 %vm1936_vm4, %v4322_v48  ;;  %v6201_v15 = vpop.eup %6200  ;;  %6218 = vrcp.f32 %v3153_v56 }
 0x46f   : > { %5834 = vmatpush3.bf16.msra.mxu0 %v4528_v51  ;;  %v4415_v28 = vpack.c.bf16 %v3939_v17, %v3938_v52  ;;  %v6203_v31 = vpop.eup %6202  ;;  %v3150_v55 = vpop.xlane.xlu0 %3149  ;;  %6220 = vrcp.f32 %v3147_v27 }
 0x470   : > { %v6205_v14 = vpop.eup %6204  ;;  %6222 = vrcp.f32 %v3150_v55 }
 0x471   : > { %5825 = vmatprep.mubr.msk.bf16.mxu1 %vm1936_vm4, %v4415_v28  ;;  %v6207_v33 = vpop.eup %6206 }
 0x472   : > { %v5741_v22 = vpop.f32.mrf.mxu0  ;;  %5826 = vmatmul.mubr.msk.bf16.vlgmr.msra.gmra.mxu1 %vm1936_vm4, %v4416_v38 }
 0x473   : > { %5844 = vmatpush3.bf16.msra.mxu1 %v4622_v19  ;;  %v3936_v41 = vmul.f32 %v6183_v63, %v5741_v22 }
 0x474   : > { %v3579_v10 = vpop.f32.mrf.mxu0 }
 0x475   : > { %v3934_v39 = vmul.f32 %v6179_v60, %v3579_v10 }
 0x476   : > { %v5742_v12 = vpop.f32.mrf.mxu0  ;;  %v5751_v50 = vpop.f32.mrf.mxu1 }
 0x477   : > { %v3937_v6 = vmul.f32 %v6177_v34, %v5742_v12  ;;  %v3944_v43 = vmul.f32 %v6191_v4, %v5751_v50  ;;  %v6209_v34 = vpop.eup %6208 }
 0x478   : > { %v3582_v40 = vpop.f32.mrf.mxu0  ;;  %v3659_v29 = vpop.f32.mrf.mxu1 }
 0x479   : > { %v3935_v16 = vmul.f32 %v6181_v13, %v3582_v40  ;;  %v4324_v54 = vpack.c.bf16 %v3937_v6, %v3936_v41  ;;  %v3942_v36 = vmul.f32 %v6187_v5, %v3659_v29  ;;  %v6211_v50 = vpop.eup %6210 }
 0x47a   : > { %v5752_v0 = vpop.f32.mrf.mxu1  ;;  %v6213_v60 = vpop.eup %6212 }
 0x47b   : > { %v4323_v21 = vpack.c.bf16 %v3935_v16, %v3934_v39  ;;  %v3945_v24 = vmul.f32 %v6185_v11, %v5752_v0  ;;  %v6215_v6 = vpop.eup %6214 }
 0x47c   : > { %v3662_v26 = vpop.f32.mrf.mxu1  ;;  %v6217_v41 = vpop.eup %6216 }
 0x47d   : > { %v3943_v44 = vmul.f32 %v6189_v47, %v3662_v26  ;;  %5819 = vmatprep.mubr.msk.bf16.mxu0 %vm1936_vm4, %v4323_v21  ;;  %v4418_v8 = vpack.c.bf16 %v3945_v24, %v3944_v43  ;;  %v6219_v5 = vpop.eup %6218 }
 0x47e   : > { %5820 = vmatmul.mubr.msk.bf16.gmra.mxu0 %vm1936_vm4, %v4324_v54  ;;  %v6221_v21 = vpop.eup %6220 }
 0x47f   : > { %v4417_v59 = vpack.c.bf16 %v3943_v44, %v3942_v36  ;;  %v6223_v24 = vpop.eup %6222 }
 0x481   : > { %5829 = vmatprep.mubr.msk.bf16.mxu1 %vm1936_vm4, %v4417_v59 }
 0x482   : > { %v5757_v61 = vpop.f32.mrf.mxu0  ;;  %5830 = vmatmul.mubr.msk.bf16.gmra.mxu1 %vm1936_vm4, %v4418_v8 }
 0x483   : > { %v3948_v48 = vmul.f32 %v6199_v30, %v5757_v61 }
 0x484   : > { %v3723_v7 = vpop.f32.mrf.mxu0 }
 0x485   : > { %v3946_v62 = vmul.f32 %v6195_v32, %v3723_v7 }
 0x486   : > { %v5758_v45 = vpop.f32.mrf.mxu0  ;;  %v5767_v3 = vpop.f32.mrf.mxu1 }
 0x487   : > { %v3949_v37 = vmul.f32 %v6193_v46, %v5758_v45  ;;  %v3956_v38 = vmul.f32 %v6207_v33, %v5767_v3 }
 0x488   : > { %v3726_v58 = vpop.f32.mrf.mxu0  ;;  %v3803_v23 = vpop.f32.mrf.mxu1 }
 0x489   : > { %v3947_v2 = vmul.f32 %v6197_v9, %v3726_v58  ;;  %v4510_v57 = vpack.c.bf16 %v3949_v37, %v3948_v48  ;;  %v3954_v28 = vmul.f32 %v6203_v31, %v3803_v23 }
 0x48a   : > { %v5768_v51 = vpop.f32.mrf.mxu1 }
 0x48b   : > { %v4509_v35 = vpack.c.bf16 %v3947_v2, %v3946_v62  ;;  %v3957_v52 = vmul.f32 %v6201_v15, %v5768_v51 }
 0x48c   : > { %v3806_v17 = vpop.f32.mrf.mxu1 }
 0x48d   : > { %v3955_v1 = vmul.f32 %v6205_v14, %v3806_v17  ;;  %5835 = vmatprep.mubr.msk.bf16.mxu0 %vm1936_vm4, %v4509_v35  ;;  %v4604_v42 = vpack.c.bf16 %v3957_v52, %v3956_v38 }
 0x48e   : > { %v5761_v19 = vpop.f32.mrf.mxu0  ;;  %5836 = vmatmul.mubr.msk.bf16.vlgmr.msra.gmra.mxu0 %vm1936_vm4, %v4510_v57 }
 0x48f   : > { %v4603_v22 = vpack.c.bf16 %v3955_v1, %v3954_v28  ;;  %v3952_v20 = vmul.f32 %v6215_v6, %v5761_v19 }
 0x490   : > { %v3739_v10 = vpop.f32.mrf.mxu0 }
 0x491   : > { %5845 = vmatprep.mubr.msk.bf16.mxu1 %vm1936_vm4, %v4603_v22  ;;  %v3950_v40 = vmul.f32 %v6209_v34, %v3739_v10 }
 0x492   : > { %v5762_v12 = vpop.f32.mrf.mxu0  ;;  %5846 = vmatmul.mubr.msk.bf16.vlgmr.msra.gmra.mxu1 %vm1936_vm4, %v4604_v42 }
 0x493   : > { %v3953_v49 = vmul.f32 %v6211_v50, %v5762_v12 }
 0x494   : > { %v3742_v13 = vpop.f32.mrf.mxu0 }
 0x495   : > { %v3951_v29 = vmul.f32 %v6213_v60, %v3742_v13  ;;  %v5771_v63 = vpop.f32.mrf.mxu1  ;;  %v4512_v11 = vpack.c.bf16 %v3953_v49, %v3952_v20 }
 0x496   : > { %v3960_v36 = vmul.f32 %v6223_v24, %v5771_v63 }
 0x497   : > { %v4511_v39 = vpack.c.bf16 %v3951_v29, %v3950_v40  ;;  %v3819_v16 = vpop.f32.mrf.mxu1 }
 0x498   : > { %v3958_v26 = vmul.f32 %v6217_v41, %v3819_v16 }
 0x499   : > { %v5772_v0 = vpop.f32.mrf.mxu1  ;;  %5839 = vmatprep.mubr.msk.bf16.mxu0 %vm1936_vm4, %v4511_v39 }
 0x49a   : > { %5840 = vmatmul.mubr.msk.bf16.gmra.mxu0 %vm1936_vm4, %v4512_v11  ;;  %v3961_v47 = vmul.f32 %v6219_v5, %v5772_v0 }
 0x49b   : > { %v3822_v54 = vpop.f32.mrf.mxu1 }
 0x49c   : > { %v3959_v4 = vmul.f32 %v6221_v21, %v3822_v54  ;;  %v4606_v18 = vpack.c.bf16 %v3961_v47, %v3960_v36 }
 0x49e   : > { %v4605_v44 = vpack.c.bf16 %v3959_v4, %v3958_v26 }
 0x4a0   : > { %5849 = vmatprep.mubr.msk.bf16.mxu1 %vm1936_vm4, %v4605_v44 }
 0x4a1   : > { %5850 = vmatmul.mubr.msk.bf16.gmra.mxu1 %vm1936_vm4, %v4606_v18 }
 0x4f0   : > { %v5787_v25 = vpop.f32.mrf.mxu1 }
 0x4f2   : > { %v5777_v43 = vpop.f32.mrf.mxu0  ;;  %v4102_v8 = vpop.f32.mrf.mxu1 }
 0x4f3   : > { %v4111_v13 = vadd.f32 %v5787_v25, %v5777_v43 }
 0x4f4   : > { %v4022_v59 = vpop.f32.mrf.mxu0  ;;  %v5788_v27 = vpop.f32.mrf.mxu1 }
 0x4f5   : > { %v4103_v29 = vadd.f32 %v4102_v8, %v4022_v59 }
 0x4f6   : > { %v5778_v61 = vpop.f32.mrf.mxu0  ;;  %v4105_v46 = vpop.f32.mrf.mxu1 }
 0x4f7   : > { %v4114_v20 = vadd.f32 %v5788_v27, %v5778_v61 }
 0x4f8   : > { %v4025_v7 = vpop.f32.mrf.mxu0 }
 0x4f9   : > { %v4106_v0 = vadd.f32 %v4105_v46, %v4025_v7  ;;  %v7628_v7 = vld [vmem:[%s7741_s6] ss:$0 sm:$0xff] }
 0x4fe   : > { %v7578_v45 = vpop.f32.mrf.mxu1 }
 0x500   : > { %v7582_v32 = vpop.f32.mrf.mxu1 }
 0x502   : > { %v7576_v53 = vpop.f32.mrf.mxu0  ;;  %v7586_v37 = vpop.f32.mrf.mxu1 }
 0x504   : > { %v7580_v3 = vpop.f32.mrf.mxu0  ;;  %v7590_v30 = vpop.f32.mrf.mxu1 }
 0x506   : > { %v7584_v9 = vpop.f32.mrf.mxu0 }
 0x508   : > { %v7588_v58 = vpop.f32.mrf.mxu0 }
 0x50e   : > { %v5797_v23 = vpop.f32.mrf.mxu0 }
 0x50f   : > { %v4221_v63 = vadd.f32 %v5797_v23, %v4111_v13 }
 0x510   : > { %v4188_v62 = vpop.f32.mrf.mxu0 }
 0x511   : > { %v4219_v39 = vadd.f32 %v4188_v62, %v4103_v29  ;;  %v4130_v29 = vadd.f32 %v7586_v37, %v7584_v9 }
 0x512   : > { %v5807_v2 = vpop.f32.mrf.mxu1  ;;  %v5798_v15 = vpop.f32.mrf.mxu0 }
 0x513   : > { %v4315_v16 = vadd.f32 %v5807_v2, %v4221_v63  ;;  %v4222_v5 = vadd.f32 %v5798_v15, %v4114_v20 }
 0x514   : > { %v4282_v56 = vpop.f32.mrf.mxu1  ;;  %v4191_v48 = vpop.f32.mrf.mxu0 }
 0x515   : > { %v4313_v21 = vadd.f32 %v4282_v56, %v4219_v39  ;;  %v4220_v24 = vadd.f32 %v4191_v48, %v4106_v0 }
 0x516   : > { %v5808_v51 = vpop.f32.mrf.mxu1 }
 0x517   : > { %v4316_v26 = vadd.f32 %v5808_v51, %v4222_v5 }
 0x518   : > { %v4285_v35 = vpop.f32.mrf.mxu1 }
 0x519   : > { %v4314_v43 = vadd.f32 %v4285_v35, %v4220_v24 }
 0x51e   : > { %v7592_v31 = vpop.f32.mrf.mxu0 }
 0x520   : > { %v7594_v14 = vpop.f32.mrf.mxu0 }
 0x522   : > { %v7596_v55 = vpop.f32.mrf.mxu1  ;;  %v7598_v57 = vpop.f32.mrf.mxu0 }
 0x524   : > { %v7600_v52 = vpop.f32.mrf.mxu1  ;;  %v7602_v17 = vpop.f32.mrf.mxu0 }
 0x526   : > { %v7604_v33 = vpop.f32.mrf.mxu1 }
 0x528   : > { %v7606_v1 = vpop.f32.mrf.mxu1 }
 0x52e   : > { %v5817_v28 = vpop.f32.mrf.mxu0 }
 0x52f   : > { %v4409_v47 = vadd.f32 %v5817_v28, %v4315_v16 }
 0x530   : > { %v4376_v38 = vpop.f32.mrf.mxu0 }
 0x531   : > { %v4407_v4 = vadd.f32 %v4376_v38, %v4313_v21  ;;  %v4127_v38 = vadd.f32 %v7578_v45, %v7576_v53 }
 0x532   : > { %v5827_v19 = vpop.f32.mrf.mxu1  ;;  %v5818_v22 = vpop.f32.mrf.mxu0 }
 0x533   : > { %v4503_v36 = vadd.f32 %v5827_v19, %v4409_v47  ;;  %v4410_v25 = vadd.f32 %v5818_v22, %v4316_v26 }
 0x534   : > { %v4470_v42 = vpop.f32.mrf.mxu1  ;;  %v4379_v10 = vpop.f32.mrf.mxu0 }
 0x535   : > { %v4501_v59 = vadd.f32 %v4470_v42, %v4407_v4  ;;  %v4408_v46 = vadd.f32 %v4379_v10, %v4314_v43 }
 0x536   : > { %v5828_v34 = vpop.f32.mrf.mxu1 }
 0x537   : > { %v4504_v23 = vadd.f32 %v5828_v34, %v4410_v25  ;;  %v4119_v34 = vadd.f32 %v7582_v32, %v7580_v3  ;;  %v4122_v32 = vadd.f32 %v7590_v30, %v7588_v58 }
 0x538   : > { %v4473_v50 = vpop.f32.mrf.mxu1 }
 0x539   : > { %v4502_v48 = vadd.f32 %v4473_v50, %v4408_v46  ;;  %v4225_v50 = vadd.f32 %v7592_v31, %v4127_v38  ;;  %v4223_v63 = vadd.f32 %v7594_v14, %v4119_v34  ;;  %v4226_v31 = vadd.f32 %v7598_v57, %v4130_v29 }
 0x53a   : > { %v4224_v9 = vadd.f32 %v7602_v17, %v4122_v32 }
 0x53b   : > { %v4319_v20 = vadd.f32 %v7596_v55, %v4225_v50  ;;  %v4317_v16 = vadd.f32 %v7600_v52, %v4223_v63  ;;  %v4320_v37 = vadd.f32 %v7604_v33, %v4226_v31 }
 0x53c   : > { %v4318_v58 = vadd.f32 %v7606_v1, %v4224_v9 }
 0x53e   : > { %v7608_v12 = vpop.f32.mrf.mxu0 }
 0x53f   : > { %v4413_v0 = vadd.f32 %v7608_v12, %v4319_v20 }
 0x540   : > { %v7610_v60 = vpop.f32.mrf.mxu0 }
 0x541   : > { %v4411_v14 = vadd.f32 %v7610_v60, %v4317_v16 }
 0x542   : > { %v7612_v49 = vpop.f32.mrf.mxu1  ;;  %v7614_v6 = vpop.f32.mrf.mxu0 }
 0x543   : > { %v4507_v55 = vadd.f32 %v7612_v49, %v4413_v0  ;;  %v4414_v30 = vadd.f32 %v7614_v6, %v4320_v37 }
 0x544   : > { %v7616_v40 = vpop.f32.mrf.mxu1  ;;  %v7618_v11 = vpop.f32.mrf.mxu0 }
 0x545   : > { %v4505_v57 = vadd.f32 %v7616_v40, %v4411_v14  ;;  %v4412_v47 = vadd.f32 %v7618_v11, %v4318_v58 }
 0x546   : > { %v7620_v41 = vpop.f32.mrf.mxu1 }
 0x547   : > { %v4508_v17 = vadd.f32 %v7620_v41, %v4414_v30 }
 0x548   : > { %v4489_v44 = vpop.f32.mrf.mxu1 }
 0x549   : > { %v4506_v24 = vadd.f32 %v4489_v44, %v4412_v47 }
 0x54e   : > { %v5837_v54 = vpop.f32.mrf.mxu0 }
 0x54f   : > { %v4597_v8 = vadd.f32 %v5837_v54, %v4503_v36 }
 0x550   : > { %v4564_v18 = vpop.f32.mrf.mxu0 }
 0x551   : > { %v4595_v62 = vadd.f32 %v4564_v18, %v4501_v59 }
 0x552   : > { %v5838_v61 = vpop.f32.mrf.mxu0  ;;  %v5847_v27 = vpop.f32.mrf.mxu1 }
 0x553   : > { %v4691_v2 = vadd.f32 %v5847_v27, %v4597_v8  ;;  %v4598_v51 = vadd.f32 %v5838_v61, %v4504_v23 }
 0x554   : > { %v4567_v15 = vpop.f32.mrf.mxu0  ;;  %v4658_v56 = vpop.f32.mrf.mxu1 }
 0x555   : > { %v4706_v35 = vadd.f32 %v7628_v7, %v4691_v2  ;;  %v4689_v28 = vadd.f32 %v4658_v56, %v4595_v62  ;;  %v4596_v22 = vadd.f32 %v4567_v15, %v4502_v48 }
 0x556   : > { %v5848_v19 = vpop.f32.mrf.mxu1 }
 0x557   : > { %4714 = vst.msk [vmem:[%s7633_s12 + $0x10] sm:$0xff] %vm353_vm1, %v4706_v35  ;;  %v4704_v42 = vadd.f32 %v7628_v7, %v4689_v28  ;;  %v4692_v10 = vadd.f32 %v5848_v19, %v4598_v51 }
 0x558   : > { %v4661_v13 = vpop.f32.mrf.mxu1 }
 0x559   : > { %4712 = vst.msk [vmem:[%s7633_s12] sm:$0xff] %vm353_vm1, %v4704_v42  ;;  %v4707_v53 = vadd.f32 %v7628_v7, %v4692_v10  ;;  %v4690_v45 = vadd.f32 %v4661_v13, %v4596_v22 }
 0x55a   : > { %v5841_v39 = vpop.f32.mrf.mxu0 }
 0x55b   : > { %4715 = vst.msk [vmem:[%s7633_s12 + $0x18] sm:$0xff] %vm353_vm1, %v4707_v53  ;;  %v4705_v3 = vadd.f32 %v7628_v7, %v4690_v45  ;;  %v4601_v52 = vadd.f32 %v5841_v39, %v4507_v55 }
 0x55c   : > { %v4580_v5 = vpop.f32.mrf.mxu0 }
 0x55d   : > { %4713 = vst.msk [vmem:[%s7633_s12 + $0x8] sm:$0xff] %vm353_vm1, %v4705_v3  ;;  %v4599_v33 = vadd.f32 %v4580_v5, %v4505_v57 }
 0x55e   : > { %v5842_v21 = vpop.f32.mrf.mxu0 }
 0x55f   : > { %v4602_v1 = vadd.f32 %v5842_v21, %v4508_v17 }
 0x560   : > { %v4583_v49 = vpop.f32.mrf.mxu0 }
 0x561   : > { %v5851_v12 = vpop.f32.mrf.mxu1  ;;  %v4600_v4 = vadd.f32 %v4583_v49, %v4506_v24 }
 0x562   : > { %v4695_v60 = vadd.f32 %v5851_v12, %v4601_v52 }
 0x563   : > { %v4674_v54 = vpop.f32.mrf.mxu1 }
 0x564   : > { %v4710_v6 = vadd.f32 %v7628_v7, %v4695_v60  ;;  %v4693_v26 = vadd.f32 %v4674_v54, %v4599_v33 }
 0x565   : > { %v5852_v40 = vpop.f32.mrf.mxu1 }
 0x566   : > { %4718 = vst.msk [vmem:[%s7633_s12 + $0x30] sm:$0xff] %vm353_vm1, %v4710_v6  ;;  %v4708_v11 = vadd.f32 %v7628_v7, %v4693_v26  ;;  %v4696_v41 = vadd.f32 %v5852_v40, %v4602_v1 }
 0x567   : > { %v4677_v36 = vpop.f32.mrf.mxu1 }
 0x568   : > { %4716 = vst.msk [vmem:[%s7633_s12 + $0x20] sm:$0xff] %vm353_vm1, %v4708_v11  ;;  %v4711_v44 = vadd.f32 %v7628_v7, %v4696_v41  ;;  %v4694_v18 = vadd.f32 %v4677_v36, %v4600_v4 }
 0x56a   : > { %4719 = vst.msk [vmem:[%s7633_s12 + $0x38] sm:$0xff] %vm353_vm1, %v4711_v44  ;;  %v4709_v43 = vadd.f32 %v7628_v7, %v4694_v18 }
 0x56c   : > { %4717 = vst.msk [vmem:[%s7633_s12 + $0x28] sm:$0xff] %vm353_vm1, %v4709_v43 }
 0x56d   : > { %6237 = shalt.err (!%p6234_p5)
}
 0x56e   : > { %s6238_s21 = scalar_lea.hbm %s7679_s22, 1024  ;;  %s6242_s12 = scalar_lea.hbm %s7742_s7, 2048 }
 0x56f   : > { %p6239_p6 = scmp.ne.s32.totalorder %s7679_s22, %s6238_s21  ;;  %p6243_p10 = scmp.lt.s32.totalorder %s7679_s22, %s7742_s7 }
 0x570   : > { %p6244_p11 = scmp.lt.s32.totalorder %s6242_s12, %s6238_s21 }
 0x571   : > { %p6240_p7 = pnand %p6239_p6, %p6387_p4 }
 0x572   : > { %p6245_p12 = por %p6244_p11, %p6243_p10 }
 0x573   : > { %p6241_p9 = pneg %p6240_p7 }
 0x575   : > { %p6246_p13 = pnand %p6245_p12, %p6241_p9 }
 0x577   : > { %6249 = shalt.err (!%p6246_p13)
}
 0x578   : > { %s6305_s20 = smov 128   ;;  %s6306_s23 = smov 8  }
 0x579   : > { %5877 = dma.vmem_to_hbm [thread:$0]  (%p6387_p4), %s7681_s18, 1024, %s7679_s22, %s7690_s27, %s6305_s20, %s6305_s20, %s6306_s23  }
 0x57a PF: > { %p5883_p0 = scmp.ge.s32.totalorder %s6300_s29, 2  ;;  %s4751_s30 = sand.u32 1, %s6280_s24  }
 0x57b   : > { %s4752_s8 = scalar_lea.sflag [#allocation5], %s4751_s30 }
 0x57c   : > { %p5880_p1 = pnand %p5883_p0, %p6394_p8 }
 0x57e   : > { %p5881_p2 = pneg %p5880_p1 }
 0x580   : > { %6275 = dma.done.wait (%p5881_p2), %s4752_s8, 1024  }
 0x581   : > { %6277 = vsyncadd (%p5881_p2), %s4752_s8, 4294966272  ;;  %s20_s29 = sadd.s32 1, %s6300_s29   ;;  %s7799_s24 = smov %s6284_s25 }
 0x582   : > { %p17_p3 = scmp.ge.s32.totalorder %s20_s29, 4   ;;  %s7800_s25 = smov %s6288_s26 }
 0x583   : > { %s7801_s26 = smov %s6400_s14  ;;  %s7802_s27 = smov %s6296_s28 }
 0x584   : > { %s7803_s28 = smov %s7805_s9  ;;  %19 = sbr.rel (!%p17_p3) target bundleno = 4 (0x4), region = 97 }
 0x589   :  { %4757 = vsyncpa [#allocation5], 1 }
 0x58a   :  { %4759 = vsyncpa [#allocation5 + $0x1], 1 }

</bundles_post_ra>
